<compile_context>
chip_gen: v7x
topology: tpu7x:2x2x1
jax: 0.10.0
libtpu: 0.0.40
codegen_flags: <defaults>
</compile_context>

<pallas_src>
import functools
import math

import jax
import jax.numpy as jnp
from jax import lax
from jax.experimental import pallas as pl
from jax.experimental.pallas import tpu as pltpu

# ----------------------------- config (small) -----------------------------
HIDDEN = 64
INTERMEDIATE = 128
NUM_LAYERS = 2
NUM_HEADS = 4
HEAD_DIM = HIDDEN // NUM_HEADS
NUM_CHANNELS = 3
IMAGE_SIZE = 32
PATCH_SIZE = 8
NUM_PATCHES = (IMAGE_SIZE // PATCH_SIZE) ** 2  # 16
LN_EPS = 1e-6
BATCH = 2

_GELU_C = math.sqrt(2.0 / math.pi)


# ------------------------------ in-kernel math -----------------------------
def _layernorm(x, g, b, eps):
    # One-pass LN: the two reductions (sum, sum of squares) are independent.
    mu = jnp.mean(x, axis=-1, keepdims=True)
    ms = jnp.mean(x * x, axis=-1, keepdims=True)
    var = ms - mu * mu
    return (x - mu) * lax.rsqrt(var + eps) * g + b


def _gelu_tanh(x):
    return 0.5 * x * (1.0 + jnp.tanh(_GELU_C * (x + 0.044715 * x * x * x)))


# ------------------------- fused forward-pass kernel ------------------------
def siglip_fused_kernel(patch_ref, pw_ref, posb_ref,
                        ln_ref, qkvw_ref, qkvb_ref, ow_ref, ob_ref,
                        w1_ref, b1_ref, w2_ref, b2_ref, post_ref,
                        out_ref,
                        *, batch, seq, num_layers, num_heads, head_dim, eps):
    f32, bf16 = jnp.float32, jnp.bfloat16
    B, S, H, hd = batch, seq, num_heads, head_dim
    D = H * hd
    scale = hd ** (-0.5)

    def mm(a, w):
        # bf16 operands + f32 accumulation: native single-pass MXU path.
        return jnp.dot(a.astype(bf16), w.astype(bf16),
                       preferred_element_type=f32)

    def split_heads(t):                      # (B*S, D) -> (B*H, S, hd)
        t = t.reshape(B, S, H, hd)
        return jnp.swapaxes(t, 1, 2).reshape(B * H, S, hd)

    def merge_heads(t):                      # (B*H, S, hd) -> (B*S, D)
        t = t.reshape(B, H, S, hd)
        return jnp.swapaxes(t, 1, 2).reshape(B * S, D)

    # ---- patch embedding (+ pos-emb; conv bias pre-folded & pre-tiled) ----
    x = mm(patch_ref[...], pw_ref[...]) + posb_ref[...]              # (B*S, D)

    # ---- encoder layers, Python-unrolled; all weights VMEM-resident ----
    for l in range(num_layers):
        ln_l = ln_ref[l]                                             # (4, D)

        # -- self-attention block --
        h = _layernorm(x, ln_l[0:1, :], ln_l[1:2, :], eps)
        hb = h.astype(bf16)
        q = jnp.dot(hb, qkvw_ref[l, 0], preferred_element_type=f32) + qkvb_ref[l, 0]
        k = jnp.dot(hb, qkvw_ref[l, 1], preferred_element_type=f32) + qkvb_ref[l, 1]
        v = jnp.dot(hb, qkvw_ref[l, 2], preferred_element_type=f32) + qkvb_ref[l, 2]

        qh = split_heads(q).astype(bf16)                             # (B*H,S,hd)
        kh = split_heads(k).astype(bf16)
        vh = split_heads(v).astype(bf16)

        scores = jnp.einsum('zqd,zkd->zqk', qh, kh,
                            preferred_element_type=f32) * scale      # (B*H,S,S)
        m = jnp.max(scores, axis=-1, keepdims=True)
        e = jnp.exp(scores - m)
        p = e / jnp.sum(e, axis=-1, keepdims=True)                   # exact divide
        ctx = jnp.einsum('zqk,zkd->zqd', p.astype(bf16), vh,
                         preferred_element_type=f32)                 # (B*H,S,hd)

        attn = mm(merge_heads(ctx), ow_ref[l]) + ob_ref[l]           # (B*S, D)
        x = x + attn

        # -- MLP block --
        h2 = _layernorm(x, ln_l[2:3, :], ln_l[3:4, :], eps)
        m1 = mm(h2, w1_ref[l]) + b1_ref[l]
        m1 = _gelu_tanh(m1)
        x = x + mm(m1, w2_ref[l]) + b2_ref[l]

    # ---- post layernorm ----
    out_ref[...] = _layernorm(x, post_ref[0:1, :], post_ref[1:2, :], eps)


# ------------------------------ wrappers -----------------------------------
def extract_patches(pixel_values, patch_size):
    # NCHW -> (B, num_patches, C*P*P); patch vector ordered (c, ph, pw),
    # patches row-major over (H/P, W/P) -- matches Conv2d(stride=P) + flatten.T
    B, C, H, W = pixel_values.shape
    P = patch_size
    x = pixel_values.reshape(B, C, H // P, P, W // P, P)
    x = x.transpose(0, 2, 4, 1, 3, 5)
    return x.reshape(B, (H // P) * (W // P), C * P * P)


def siglip_vision_transformer(pixel_values, params):
    patches = extract_patches(pixel_values, PATCH_SIZE)      # (B, N, CPP)
    B, N, CPP = patches.shape
    D, L = HIDDEN, NUM_LAYERS
    bf16 = jnp.bfloat16

    patches_flat = patches.reshape(B * N, CPP)               # batch folded
    # conv bias folded into the positional-embedding add (exact), tiled per image
    posb = jnp.tile(params["pos_emb"] + params["patch_b"], (B, 1))   # (B*N, D)

    kern = functools.partial(siglip_fused_kernel, batch=B, seq=N,
                             num_layers=L, num_heads=NUM_HEADS,
                             head_dim=HEAD_DIM, eps=LN_EPS)

    vmem = pl.BlockSpec(memory_space=pltpu.MemorySpace.VMEM)
    out = pl.pallas_call(
        kern,
        out_shape=jax.ShapeDtypeStruct((B * N, D), jnp.float32),
        in_specs=[vmem] * 13,
        out_specs=vmem,
        cost_estimate=pl.CostEstimate(flops=5_300_000,
                                      transcendentals=13_000,
                                      bytes_accessed=220_000),
    )(patches_flat,
      params["patch_w"].astype(bf16),     # matmul weights pre-cast to bf16
      posb,
      params["ln"],
      params["qkv_w"].astype(bf16), params["qkv_b"],
      params["o_w"].astype(bf16), params["o_b"],
      params["fc1_w"].astype(bf16), params["fc1_b"],
      params["fc2_w"].astype(bf16), params["fc2_b"],
      params["post"])
    return out.reshape(B, N, D)


# ------------------------------ parameter init -----------------------------
def init_params(key):
    D, I, L = HIDDEN, INTERMEDIATE, NUM_LAYERS
    CPP, N = NUM_CHANNELS * PATCH_SIZE ** 2, NUM_PATCHES
    keys = iter(jax.random.split(key, 24))

    def nrm(shape, scale=0.02):
        return scale * jax.random.normal(next(keys), shape, dtype=jnp.float32)

    params = {
        # (C*P*P, D) == flattened-transposed Conv2d weight
        "patch_w": nrm((CPP, D)),
        "patch_b": nrm((1, D)),
        "pos_emb": nrm((N, D)),
        # per-layer weights stacked on leading L dim
        "qkv_w": nrm((L, 3, D, D)),     # axis 1 = [Wq, Wk, Wv]
        "qkv_b": nrm((L, 3, 1, D)),
        "o_w": nrm((L, D, D)),
        "o_b": nrm((L, 1, D)),
        "fc1_w": nrm((L, D, I)),
        "fc1_b": nrm((L, 1, I)),
        "fc2_w": nrm((L, I, D)),
        "fc2_b": nrm((L, 1, D)),
    }
    # layernorm params, rows = [ln1_g, ln1_b, ln2_g, ln2_b]
    ln1_g = 1.0 + nrm((L, 1, D))
    ln1_b = nrm((L, 1, D))
    ln2_g = 1.0 + nrm((L, 1, D))
    ln2_b = nrm((L, 1, D))
    params["ln"] = jnp.concatenate([ln1_g, ln1_b, ln2_g, ln2_b], axis=1)
    params["post"] = jnp.concatenate([1.0 + nrm((1, D)), nrm((1, D))], axis=0)
    return params


# ------------------------------ pure-JAX reference --------------------------
def _ref_forward(pixel_values, params):
    def ln(x, g, b):
        mu = jnp.mean(x, -1, keepdims=True)
        var = jnp.mean((x - mu) ** 2, -1, keepdims=True)
        return (x - mu) / jnp.sqrt(var + LN_EPS) * g + b

    D = HIDDEN
    h = extract_patches(pixel_values, PATCH_SIZE) @ params["patch_w"]
    h = h + params["patch_b"] + params["pos_emb"][None]
    B, S, _ = h.shape
    for l in range(NUM_LAYERS):
        lnp = params["ln"][l]
        x = h
        t = ln(x, lnp[0], lnp[1])
        q = t @ params["qkv_w"][l, 0] + params["qkv_b"][l, 0]
        k = t @ params["qkv_w"][l, 1] + params["qkv_b"][l, 1]
        v = t @ params["qkv_w"][l, 2] + params["qkv_b"][l, 2]
        q = q.reshape(B, S, NUM_HEADS, HEAD_DIM).transpose(0, 2, 1, 3)
        k = k.reshape(B, S, NUM_HEADS, HEAD_DIM).transpose(0, 2, 1, 3)
        v = v.reshape(B, S, NUM_HEADS, HEAD_DIM).transpose(0, 2, 1, 3)
        s = jnp.einsum("bhqd,bhkd->bhqk", q, k) * HEAD_DIM ** (-0.5)
        p = jax.nn.softmax(s, axis=-1)
        a = jnp.einsum("bhqk,bhkd->bhqd", p, v).transpose(0, 2, 1, 3).reshape(B, S, D)
        x = x + (a @ params["o_w"][l] + params["o_b"][l])
        t = ln(x, lnp[2], lnp[3])
        m = t @ params["fc1_w"][l] + params["fc1_b"][l]
        m = 0.5 * m * (1.0 + jnp.tanh(_GELU_C * (m + 0.044715 * m ** 3)))
        h = x + (m @ params["fc2_w"][l] + params["fc2_b"][l])
    return ln(h, params["post"][0], params["post"][1])


# ---------------------------------- main ------------------------------------
if __name__ == "__main__":
    key = jax.random.PRNGKey(0)
    k_img, k_par = jax.random.split(key)
    pixel_values = jax.random.normal(
        k_img, (BATCH, NUM_CHANNELS, IMAGE_SIZE, IMAGE_SIZE), dtype=jnp.float32)
    params = init_params(k_par)

    out = siglip_vision_transformer(pixel_values, params)
    out = jax.block_until_ready(out)

    ref = _ref_forward(pixel_values, params)
    assert out.shape == (BATCH, NUM_PATCHES, HIDDEN), out.shape
    # Matmul operands are bf16 (native MXU path, per perf review); the f32
    # reference therefore needs a looser tolerance than pure-f32 matmuls.
    max_err = float(jnp.max(jnp.abs(out - ref)))
    assert jnp.allclose(out, ref, rtol=3e-2, atol=3e-2), max_err
    print("KERNEL_OK")
</pallas_src>

<mosaic_0001>
module attributes {stable_mosaic.version = 11 : i64} {
  func.func @siglip_fused_kernel(%arg0: memref<32x192xf32, #tpu.memory_space<vmem>>, %arg1: memref<192x64xbf16, #tpu.memory_space<vmem>>, %arg2: memref<32x64xf32, #tpu.memory_space<vmem>>, %arg3: memref<2x4x64xf32, #tpu.memory_space<vmem>>, %arg4: memref<2x3x64x64xbf16, #tpu.memory_space<vmem>>, %arg5: memref<2x3x1x64xf32, #tpu.memory_space<vmem>>, %arg6: memref<2x64x64xbf16, #tpu.memory_space<vmem>>, %arg7: memref<2x1x64xf32, #tpu.memory_space<vmem>>, %arg8: memref<2x64x128xbf16, #tpu.memory_space<vmem>>, %arg9: memref<2x1x128xf32, #tpu.memory_space<vmem>>, %arg10: memref<2x128x64xbf16, #tpu.memory_space<vmem>>, %arg11: memref<2x1x64xf32, #tpu.memory_space<vmem>>, %arg12: memref<2x64xf32, #tpu.memory_space<vmem>>, %arg13: memref<32x64xf32, #tpu.memory_space<vmem>>) attributes {dimension_semantics = [], scalar_prefetch = 0 : i64, scratch_operands = 0 : i64, tpu.core_type = #tpu.core_type<tc>} {
    %c0 = arith.constant 0 : index
    %c0_0 = arith.constant 0 : index
    %0 = vector.load %arg0[%c0, %c0_0] : memref<32x192xf32, #tpu.memory_space<vmem>>, vector<32x192xf32>
    %c0_1 = arith.constant 0 : index
    %c0_2 = arith.constant 0 : index
    %1 = vector.load %arg1[%c0_1, %c0_2] : memref<192x64xbf16, #tpu.memory_space<vmem>>, vector<192x64xbf16>
    %2 = arith.truncf %0 : vector<32x192xf32> to vector<32x192xbf16>
    %cst = arith.constant dense<0.000000e+00> : vector<32x64xf32>
    %3 = tpu.matmul %2, %1, %cst {dimension_numbers = #tpu.dot_dimension_numbers<[1], [0], [0], [1], [0, 0, 1, 1], [], []>} : vector<32x192xbf16>, vector<192x64xbf16>, vector<32x64xf32> -> vector<32x64xf32>
    %c0_3 = arith.constant 0 : index
    %c0_4 = arith.constant 0 : index
    %4 = vector.load %arg2[%c0_3, %c0_4] : memref<32x64xf32, #tpu.memory_space<vmem>>, vector<32x64xf32>
    %5 = arith.addf %3, %4 : vector<32x64xf32>
    %c0_5 = arith.constant 0 : index
    %c0_6 = arith.constant 0 : index
    %c0_7 = arith.constant 0 : index
    %6 = vector.load %arg3[%c0_5, %c0_6, %c0_7] : memref<2x4x64xf32, #tpu.memory_space<vmem>>, vector<1x4x64xf32>
    %7 = vector.shape_cast %6 : vector<1x4x64xf32> to vector<4x64xf32>
    %8 = vector.extract_strided_slice %7 {offsets = [0, 0], sizes = [1, 64], strides = [1, 1]} : vector<4x64xf32> to vector<1x64xf32>
    %9 = vector.extract_strided_slice %7 {offsets = [1, 0], sizes = [1, 64], strides = [1, 1]} : vector<4x64xf32> to vector<1x64xf32>
    %cst_8 = arith.constant dense<0.000000e+00> : vector<32xf32>
    %10 = vector.multi_reduction <add>, %5, %cst_8 [1] : vector<32x64xf32> to vector<32xf32>
    %11 = vector.shape_cast %10 : vector<32xf32> to vector<32x1xf32>
    %cst_9 = arith.constant 6.400000e+01 : f32
    %12 = vector.broadcast %cst_9 : f32 to vector<32x1xf32>
    %13 = arith.divf %11, %12 : vector<32x1xf32>
    %14 = arith.mulf %5, %5 : vector<32x64xf32>
    %cst_10 = arith.constant dense<0.000000e+00> : vector<32xf32>
    %15 = vector.multi_reduction <add>, %14, %cst_10 [1] : vector<32x64xf32> to vector<32xf32>
    %16 = vector.shape_cast %15 : vector<32xf32> to vector<32x1xf32>
    %cst_11 = arith.constant 6.400000e+01 : f32
    %17 = vector.broadcast %cst_11 : f32 to vector<32x1xf32>
    %18 = arith.divf %16, %17 : vector<32x1xf32>
    %19 = arith.mulf %13, %13 : vector<32x1xf32>
    %20 = arith.subf %18, %19 : vector<32x1xf32>
    %21 = vector.broadcast %13 : vector<32x1xf32> to vector<32x64xf32>
    %22 = arith.subf %5, %21 : vector<32x64xf32>
    %cst_12 = arith.constant 9.99999997E-7 : f32
    %23 = vector.broadcast %cst_12 : f32 to vector<32x1xf32>
    %24 = arith.addf %20, %23 : vector<32x1xf32>
    %25 = math.rsqrt %24 : vector<32x1xf32>
    %26 = vector.broadcast %25 : vector<32x1xf32> to vector<32x64xf32>
    %27 = arith.mulf %22, %26 : vector<32x64xf32>
    %28 = vector.broadcast %8 : vector<1x64xf32> to vector<32x64xf32>
    %29 = arith.mulf %27, %28 : vector<32x64xf32>
    %30 = vector.broadcast %9 : vector<1x64xf32> to vector<32x64xf32>
    %31 = arith.addf %29, %30 : vector<32x64xf32>
    %32 = arith.truncf %31 : vector<32x64xf32> to vector<32x64xbf16>
    %c0_13 = arith.constant 0 : index
    %c0_14 = arith.constant 0 : index
    %c0_15 = arith.constant 0 : index
    %c0_16 = arith.constant 0 : index
    %33 = vector.load %arg4[%c0_13, %c0_14, %c0_15, %c0_16] : memref<2x3x64x64xbf16, #tpu.memory_space<vmem>>, vector<1x1x64x64xbf16>
    %34 = vector.shape_cast %33 : vector<1x1x64x64xbf16> to vector<64x64xbf16>
    %cst_17 = arith.constant dense<0.000000e+00> : vector<32x64xf32>
    %35 = tpu.matmul %32, %34, %cst_17 {dimension_numbers = #tpu.dot_dimension_numbers<[1], [0], [0], [1], [0, 0, 1, 1], [], []>} : vector<32x64xbf16>, vector<64x64xbf16>, vector<32x64xf32> -> vector<32x64xf32>
    %c0_18 = arith.constant 0 : index
    %c0_19 = arith.constant 0 : index
    %c0_20 = arith.constant 0 : index
    %c0_21 = arith.constant 0 : index
    %36 = vector.load %arg5[%c0_18, %c0_19, %c0_20, %c0_21] : memref<2x3x1x64xf32, #tpu.memory_space<vmem>>, vector<1x1x1x64xf32>
    %37 = vector.shape_cast %36 : vector<1x1x1x64xf32> to vector<1x64xf32>
    %38 = vector.broadcast %37 : vector<1x64xf32> to vector<32x64xf32>
    %39 = arith.addf %35, %38 : vector<32x64xf32>
    %c0_22 = arith.constant 0 : index
    %c1 = arith.constant 1 : index
    %c0_23 = arith.constant 0 : index
    %c0_24 = arith.constant 0 : index
    %40 = vector.load %arg4[%c0_22, %c1, %c0_23, %c0_24] : memref<2x3x64x64xbf16, #tpu.memory_space<vmem>>, vector<1x1x64x64xbf16>
    %41 = vector.shape_cast %40 : vector<1x1x64x64xbf16> to vector<64x64xbf16>
    %cst_25 = arith.constant dense<0.000000e+00> : vector<32x64xf32>
    %42 = tpu.matmul %32, %41, %cst_25 {dimension_numbers = #tpu.dot_dimension_numbers<[1], [0], [0], [1], [0, 0, 1, 1], [], []>} : vector<32x64xbf16>, vector<64x64xbf16>, vector<32x64xf32> -> vector<32x64xf32>
    %c0_26 = arith.constant 0 : index
    %c1_27 = arith.constant 1 : index
    %c0_28 = arith.constant 0 : index
    %c0_29 = arith.constant 0 : index
    %43 = vector.load %arg5[%c0_26, %c1_27, %c0_28, %c0_29] : memref<2x3x1x64xf32, #tpu.memory_space<vmem>>, vector<1x1x1x64xf32>
    %44 = vector.shape_cast %43 : vector<1x1x1x64xf32> to vector<1x64xf32>
    %45 = vector.broadcast %44 : vector<1x64xf32> to vector<32x64xf32>
    %46 = arith.addf %42, %45 : vector<32x64xf32>
    %c0_30 = arith.constant 0 : index
    %c2 = arith.constant 2 : index
    %c0_31 = arith.constant 0 : index
    %c0_32 = arith.constant 0 : index
    %47 = vector.load %arg4[%c0_30, %c2, %c0_31, %c0_32] : memref<2x3x64x64xbf16, #tpu.memory_space<vmem>>, vector<1x1x64x64xbf16>
    %48 = vector.shape_cast %47 : vector<1x1x64x64xbf16> to vector<64x64xbf16>
    %cst_33 = arith.constant dense<0.000000e+00> : vector<32x64xf32>
    %49 = tpu.matmul %32, %48, %cst_33 {dimension_numbers = #tpu.dot_dimension_numbers<[1], [0], [0], [1], [0, 0, 1, 1], [], []>} : vector<32x64xbf16>, vector<64x64xbf16>, vector<32x64xf32> -> vector<32x64xf32>
    %c0_34 = arith.constant 0 : index
    %c2_35 = arith.constant 2 : index
    %c0_36 = arith.constant 0 : index
    %c0_37 = arith.constant 0 : index
    %50 = vector.load %arg5[%c0_34, %c2_35, %c0_36, %c0_37] : memref<2x3x1x64xf32, #tpu.memory_space<vmem>>, vector<1x1x1x64xf32>
    %51 = vector.shape_cast %50 : vector<1x1x1x64xf32> to vector<1x64xf32>
    %52 = vector.broadcast %51 : vector<1x64xf32> to vector<32x64xf32>
    %53 = arith.addf %49, %52 : vector<32x64xf32>
    %54 = vector.shape_cast %39 : vector<32x64xf32> to vector<2x16x4x16xf32>
    %55 = tpu.transpose %54, [0, 2, 1, 3] : vector<2x16x4x16xf32> -> vector<2x4x16x16xf32>
    %56 = vector.shape_cast %55 : vector<2x4x16x16xf32> to vector<8x16x16xf32>
    %57 = arith.truncf %56 : vector<8x16x16xf32> to vector<8x16x16xbf16>
    %58 = vector.shape_cast %46 : vector<32x64xf32> to vector<2x16x4x16xf32>
    %59 = tpu.transpose %58, [0, 2, 1, 3] : vector<2x16x4x16xf32> -> vector<2x4x16x16xf32>
    %60 = vector.shape_cast %59 : vector<2x4x16x16xf32> to vector<8x16x16xf32>
    %61 = arith.truncf %60 : vector<8x16x16xf32> to vector<8x16x16xbf16>
    %62 = vector.shape_cast %53 : vector<32x64xf32> to vector<2x16x4x16xf32>
    %63 = tpu.transpose %62, [0, 2, 1, 3] : vector<2x16x4x16xf32> -> vector<2x4x16x16xf32>
    %64 = vector.shape_cast %63 : vector<2x4x16x16xf32> to vector<8x16x16xf32>
    %65 = arith.truncf %64 : vector<8x16x16xf32> to vector<8x16x16xbf16>
    "tpu.trace_start"() <{level = 10 : i32, message = "zqd,zkd->zqk"}> : () -> ()
    %cst_38 = arith.constant dense<0.000000e+00> : vector<8x16x16xf32>
    %66 = tpu.matmul %57, %61, %cst_38 {dimension_numbers = #tpu.dot_dimension_numbers<[2], [2], [1], [1], [0, 0, 0, 1, 1, 1], [0], [0]>} : vector<8x16x16xbf16>, vector<8x16x16xbf16>, vector<8x16x16xf32> -> vector<8x16x16xf32>
    "tpu.trace_stop"() : () -> ()
    %cst_39 = arith.constant 2.500000e-01 : f32
    %67 = vector.broadcast %cst_39 : f32 to vector<8x16x16xf32>
    %68 = arith.mulf %66, %67 : vector<8x16x16xf32>
    %cst_40 = arith.constant dense<0xFF800000> : vector<8x16xf32>
    %69 = vector.multi_reduction <maximumf>, %68, %cst_40 [2] : vector<8x16x16xf32> to vector<8x16xf32>
    %70 = vector.shape_cast %69 : vector<8x16xf32> to vector<8x16x1xf32>
    %71 = vector.broadcast %70 : vector<8x16x1xf32> to vector<8x16x16xf32>
    %72 = arith.subf %68, %71 : vector<8x16x16xf32>
    %73 = math.exp %72 : vector<8x16x16xf32>
    %cst_41 = arith.constant dense<0.000000e+00> : vector<8x16xf32>
    %74 = vector.multi_reduction <add>, %73, %cst_41 [2] : vector<8x16x16xf32> to vector<8x16xf32>
    %75 = vector.shape_cast %74 : vector<8x16xf32> to vector<8x16x1xf32>
    %76 = vector.broadcast %75 : vector<8x16x1xf32> to vector<8x16x16xf32>
    %77 = arith.divf %73, %76 : vector<8x16x16xf32>
    %78 = arith.truncf %77 : vector<8x16x16xf32> to vector<8x16x16xbf16>
    "tpu.trace_start"() <{level = 10 : i32, message = "zqk,zkd->zqd"}> : () -> ()
    %cst_42 = arith.constant dense<0.000000e+00> : vector<8x16x16xf32>
    %79 = tpu.matmul %78, %65, %cst_42 {dimension_numbers = #tpu.dot_dimension_numbers<[2], [1], [1], [2], [0, 0, 0, 1, 1, 2], [0], [0]>} : vector<8x16x16xbf16>, vector<8x16x16xbf16>, vector<8x16x16xf32> -> vector<8x16x16xf32>
    "tpu.trace_stop"() : () -> ()
    %80 = vector.shape_cast %79 : vector<8x16x16xf32> to vector<2x4x16x16xf32>
    %81 = tpu.transpose %80, [0, 2, 1, 3] : vector<2x4x16x16xf32> -> vector<2x16x4x16xf32>
    %82 = vector.shape_cast %81 : vector<2x16x4x16xf32> to vector<32x64xf32>
    %c0_43 = arith.constant 0 : index
    %c0_44 = arith.constant 0 : index
    %c0_45 = arith.constant 0 : index
    %83 = vector.load %arg6[%c0_43, %c0_44, %c0_45] : memref<2x64x64xbf16, #tpu.memory_space<vmem>>, vector<1x64x64xbf16>
    %84 = vector.shape_cast %83 : vector<1x64x64xbf16> to vector<64x64xbf16>
    %85 = arith.truncf %82 : vector<32x64xf32> to vector<32x64xbf16>
    %cst_46 = arith.constant dense<0.000000e+00> : vector<32x64xf32>
    %86 = tpu.matmul %85, %84, %cst_46 {dimension_numbers = #tpu.dot_dimension_numbers<[1], [0], [0], [1], [0, 0, 1, 1], [], []>} : vector<32x64xbf16>, vector<64x64xbf16>, vector<32x64xf32> -> vector<32x64xf32>
    %c0_47 = arith.constant 0 : index
    %c0_48 = arith.constant 0 : index
    %c0_49 = arith.constant 0 : index
    %87 = vector.load %arg7[%c0_47, %c0_48, %c0_49] : memref<2x1x64xf32, #tpu.memory_space<vmem>>, vector<1x1x64xf32>
    %88 = vector.shape_cast %87 : vector<1x1x64xf32> to vector<1x64xf32>
    %89 = vector.broadcast %88 : vector<1x64xf32> to vector<32x64xf32>
    %90 = arith.addf %86, %89 : vector<32x64xf32>
    %91 = arith.addf %5, %90 : vector<32x64xf32>
    %92 = vector.extract_strided_slice %7 {offsets = [2, 0], sizes = [1, 64], strides = [1, 1]} : vector<4x64xf32> to vector<1x64xf32>
    %93 = vector.extract_strided_slice %7 {offsets = [3, 0], sizes = [1, 64], strides = [1, 1]} : vector<4x64xf32> to vector<1x64xf32>
    %cst_50 = arith.constant dense<0.000000e+00> : vector<32xf32>
    %94 = vector.multi_reduction <add>, %91, %cst_50 [1] : vector<32x64xf32> to vector<32xf32>
    %95 = vector.shape_cast %94 : vector<32xf32> to vector<32x1xf32>
    %cst_51 = arith.constant 6.400000e+01 : f32
    %96 = vector.broadcast %cst_51 : f32 to vector<32x1xf32>
    %97 = arith.divf %95, %96 : vector<32x1xf32>
    %98 = arith.mulf %91, %91 : vector<32x64xf32>
    %cst_52 = arith.constant dense<0.000000e+00> : vector<32xf32>
    %99 = vector.multi_reduction <add>, %98, %cst_52 [1] : vector<32x64xf32> to vector<32xf32>
    %100 = vector.shape_cast %99 : vector<32xf32> to vector<32x1xf32>
    %cst_53 = arith.constant 6.400000e+01 : f32
    %101 = vector.broadcast %cst_53 : f32 to vector<32x1xf32>
    %102 = arith.divf %100, %101 : vector<32x1xf32>
    %103 = arith.mulf %97, %97 : vector<32x1xf32>
    %104 = arith.subf %102, %103 : vector<32x1xf32>
    %105 = vector.broadcast %97 : vector<32x1xf32> to vector<32x64xf32>
    %106 = arith.subf %91, %105 : vector<32x64xf32>
    %cst_54 = arith.constant 9.99999997E-7 : f32
    %107 = vector.broadcast %cst_54 : f32 to vector<32x1xf32>
    %108 = arith.addf %104, %107 : vector<32x1xf32>
    %109 = math.rsqrt %108 : vector<32x1xf32>
    %110 = vector.broadcast %109 : vector<32x1xf32> to vector<32x64xf32>
    %111 = arith.mulf %106, %110 : vector<32x64xf32>
    %112 = vector.broadcast %92 : vector<1x64xf32> to vector<32x64xf32>
    %113 = arith.mulf %111, %112 : vector<32x64xf32>
    %114 = vector.broadcast %93 : vector<1x64xf32> to vector<32x64xf32>
    %115 = arith.addf %113, %114 : vector<32x64xf32>
    %c0_55 = arith.constant 0 : index
    %c0_56 = arith.constant 0 : index
    %c0_57 = arith.constant 0 : index
    %116 = vector.load %arg8[%c0_55, %c0_56, %c0_57] : memref<2x64x128xbf16, #tpu.memory_space<vmem>>, vector<1x64x128xbf16>
    %117 = vector.shape_cast %116 : vector<1x64x128xbf16> to vector<64x128xbf16>
    %118 = arith.truncf %115 : vector<32x64xf32> to vector<32x64xbf16>
    %cst_58 = arith.constant dense<0.000000e+00> : vector<32x128xf32>
    %119 = tpu.matmul %118, %117, %cst_58 {dimension_numbers = #tpu.dot_dimension_numbers<[1], [0], [0], [1], [0, 0, 1, 1], [], []>} : vector<32x64xbf16>, vector<64x128xbf16>, vector<32x128xf32> -> vector<32x128xf32>
    %c0_59 = arith.constant 0 : index
    %c0_60 = arith.constant 0 : index
    %c0_61 = arith.constant 0 : index
    %120 = vector.load %arg9[%c0_59, %c0_60, %c0_61] : memref<2x1x128xf32, #tpu.memory_space<vmem>>, vector<1x1x128xf32>
    %121 = vector.shape_cast %120 : vector<1x1x128xf32> to vector<1x128xf32>
    %122 = vector.broadcast %121 : vector<1x128xf32> to vector<32x128xf32>
    %123 = arith.addf %119, %122 : vector<32x128xf32>
    %cst_62 = arith.constant 5.000000e-01 : f32
    %124 = vector.broadcast %cst_62 : f32 to vector<32x128xf32>
    %125 = arith.mulf %124, %123 : vector<32x128xf32>
    %cst_63 = arith.constant 4.471500e-02 : f32
    %126 = vector.broadcast %cst_63 : f32 to vector<32x128xf32>
    %127 = arith.mulf %126, %123 : vector<32x128xf32>
    %128 = arith.mulf %127, %123 : vector<32x128xf32>
    %129 = arith.mulf %128, %123 : vector<32x128xf32>
    %130 = arith.addf %123, %129 : vector<32x128xf32>
    %cst_64 = arith.constant 0.797884583 : f32
    %131 = vector.broadcast %cst_64 : f32 to vector<32x128xf32>
    %132 = arith.mulf %131, %130 : vector<32x128xf32>
    %133 = math.tanh %132 : vector<32x128xf32>
    %cst_65 = arith.constant 1.000000e+00 : f32
    %134 = vector.broadcast %cst_65 : f32 to vector<32x128xf32>
    %135 = arith.addf %134, %133 : vector<32x128xf32>
    %136 = arith.mulf %125, %135 : vector<32x128xf32>
    %c0_66 = arith.constant 0 : index
    %c0_67 = arith.constant 0 : index
    %c0_68 = arith.constant 0 : index
    %137 = vector.load %arg10[%c0_66, %c0_67, %c0_68] : memref<2x128x64xbf16, #tpu.memory_space<vmem>>, vector<1x128x64xbf16>
    %138 = vector.shape_cast %137 : vector<1x128x64xbf16> to vector<128x64xbf16>
    %139 = arith.truncf %136 : vector<32x128xf32> to vector<32x128xbf16>
    %cst_69 = arith.constant dense<0.000000e+00> : vector<32x64xf32>
    %140 = tpu.matmul %139, %138, %cst_69 {dimension_numbers = #tpu.dot_dimension_numbers<[1], [0], [0], [1], [0, 0, 1, 1], [], []>} : vector<32x128xbf16>, vector<128x64xbf16>, vector<32x64xf32> -> vector<32x64xf32>
    %141 = arith.addf %91, %140 : vector<32x64xf32>
    %c0_70 = arith.constant 0 : index
    %c0_71 = arith.constant 0 : index
    %c0_72 = arith.constant 0 : index
    %142 = vector.load %arg11[%c0_70, %c0_71, %c0_72] : memref<2x1x64xf32, #tpu.memory_space<vmem>>, vector<1x1x64xf32>
    %143 = vector.shape_cast %142 : vector<1x1x64xf32> to vector<1x64xf32>
    %144 = vector.broadcast %143 : vector<1x64xf32> to vector<32x64xf32>
    %145 = arith.addf %141, %144 : vector<32x64xf32>
    %c1_73 = arith.constant 1 : index
    %c0_74 = arith.constant 0 : index
    %c0_75 = arith.constant 0 : index
    %146 = vector.load %arg3[%c1_73, %c0_74, %c0_75] : memref<2x4x64xf32, #tpu.memory_space<vmem>>, vector<1x4x64xf32>
    %147 = vector.shape_cast %146 : vector<1x4x64xf32> to vector<4x64xf32>
    %148 = vector.extract_strided_slice %147 {offsets = [0, 0], sizes = [1, 64], strides = [1, 1]} : vector<4x64xf32> to vector<1x64xf32>
    %149 = vector.extract_strided_slice %147 {offsets = [1, 0], sizes = [1, 64], strides = [1, 1]} : vector<4x64xf32> to vector<1x64xf32>
    %cst_76 = arith.constant dense<0.000000e+00> : vector<32xf32>
    %150 = vector.multi_reduction <add>, %145, %cst_76 [1] : vector<32x64xf32> to vector<32xf32>
    %151 = vector.shape_cast %150 : vector<32xf32> to vector<32x1xf32>
    %cst_77 = arith.constant 6.400000e+01 : f32
    %152 = vector.broadcast %cst_77 : f32 to vector<32x1xf32>
    %153 = arith.divf %151, %152 : vector<32x1xf32>
    %154 = arith.mulf %145, %145 : vector<32x64xf32>
    %cst_78 = arith.constant dense<0.000000e+00> : vector<32xf32>
    %155 = vector.multi_reduction <add>, %154, %cst_78 [1] : vector<32x64xf32> to vector<32xf32>
    %156 = vector.shape_cast %155 : vector<32xf32> to vector<32x1xf32>
    %cst_79 = arith.constant 6.400000e+01 : f32
    %157 = vector.broadcast %cst_79 : f32 to vector<32x1xf32>
    %158 = arith.divf %156, %157 : vector<32x1xf32>
    %159 = arith.mulf %153, %153 : vector<32x1xf32>
    %160 = arith.subf %158, %159 : vector<32x1xf32>
    %161 = vector.broadcast %153 : vector<32x1xf32> to vector<32x64xf32>
    %162 = arith.subf %145, %161 : vector<32x64xf32>
    %cst_80 = arith.constant 9.99999997E-7 : f32
    %163 = vector.broadcast %cst_80 : f32 to vector<32x1xf32>
    %164 = arith.addf %160, %163 : vector<32x1xf32>
    %165 = math.rsqrt %164 : vector<32x1xf32>
    %166 = vector.broadcast %165 : vector<32x1xf32> to vector<32x64xf32>
    %167 = arith.mulf %162, %166 : vector<32x64xf32>
    %168 = vector.broadcast %148 : vector<1x64xf32> to vector<32x64xf32>
    %169 = arith.mulf %167, %168 : vector<32x64xf32>
    %170 = vector.broadcast %149 : vector<1x64xf32> to vector<32x64xf32>
    %171 = arith.addf %169, %170 : vector<32x64xf32>
    %172 = arith.truncf %171 : vector<32x64xf32> to vector<32x64xbf16>
    %c1_81 = arith.constant 1 : index
    %c0_82 = arith.constant 0 : index
    %c0_83 = arith.constant 0 : index
    %c0_84 = arith.constant 0 : index
    %173 = vector.load %arg4[%c1_81, %c0_82, %c0_83, %c0_84] : memref<2x3x64x64xbf16, #tpu.memory_space<vmem>>, vector<1x1x64x64xbf16>
    %174 = vector.shape_cast %173 : vector<1x1x64x64xbf16> to vector<64x64xbf16>
    %cst_85 = arith.constant dense<0.000000e+00> : vector<32x64xf32>
    %175 = tpu.matmul %172, %174, %cst_85 {dimension_numbers = #tpu.dot_dimension_numbers<[1], [0], [0], [1], [0, 0, 1, 1], [], []>} : vector<32x64xbf16>, vector<64x64xbf16>, vector<32x64xf32> -> vector<32x64xf32>
    %c1_86 = arith.constant 1 : index
    %c0_87 = arith.constant 0 : index
    %c0_88 = arith.constant 0 : index
    %c0_89 = arith.constant 0 : index
    %176 = vector.load %arg5[%c1_86, %c0_87, %c0_88, %c0_89] : memref<2x3x1x64xf32, #tpu.memory_space<vmem>>, vector<1x1x1x64xf32>
    %177 = vector.shape_cast %176 : vector<1x1x1x64xf32> to vector<1x64xf32>
    %178 = vector.broadcast %177 : vector<1x64xf32> to vector<32x64xf32>
    %179 = arith.addf %175, %178 : vector<32x64xf32>
    %c1_90 = arith.constant 1 : index
    %c1_91 = arith.constant 1 : index
    %c0_92 = arith.constant 0 : index
    %c0_93 = arith.constant 0 : index
    %180 = vector.load %arg4[%c1_90, %c1_91, %c0_92, %c0_93] : memref<2x3x64x64xbf16, #tpu.memory_space<vmem>>, vector<1x1x64x64xbf16>
    %181 = vector.shape_cast %180 : vector<1x1x64x64xbf16> to vector<64x64xbf16>
    %cst_94 = arith.constant dense<0.000000e+00> : vector<32x64xf32>
    %182 = tpu.matmul %172, %181, %cst_94 {dimension_numbers = #tpu.dot_dimension_numbers<[1], [0], [0], [1], [0, 0, 1, 1], [], []>} : vector<32x64xbf16>, vector<64x64xbf16>, vector<32x64xf32> -> vector<32x64xf32>
    %c1_95 = arith.constant 1 : index
    %c1_96 = arith.constant 1 : index
    %c0_97 = arith.constant 0 : index
    %c0_98 = arith.constant 0 : index
    %183 = vector.load %arg5[%c1_95, %c1_96, %c0_97, %c0_98] : memref<2x3x1x64xf32, #tpu.memory_space<vmem>>, vector<1x1x1x64xf32>
    %184 = vector.shape_cast %183 : vector<1x1x1x64xf32> to vector<1x64xf32>
    %185 = vector.broadcast %184 : vector<1x64xf32> to vector<32x64xf32>
    %186 = arith.addf %182, %185 : vector<32x64xf32>
    %c1_99 = arith.constant 1 : index
    %c2_100 = arith.constant 2 : index
    %c0_101 = arith.constant 0 : index
    %c0_102 = arith.constant 0 : index
    %187 = vector.load %arg4[%c1_99, %c2_100, %c0_101, %c0_102] : memref<2x3x64x64xbf16, #tpu.memory_space<vmem>>, vector<1x1x64x64xbf16>
    %188 = vector.shape_cast %187 : vector<1x1x64x64xbf16> to vector<64x64xbf16>
    %cst_103 = arith.constant dense<0.000000e+00> : vector<32x64xf32>
    %189 = tpu.matmul %172, %188, %cst_103 {dimension_numbers = #tpu.dot_dimension_numbers<[1], [0], [0], [1], [0, 0, 1, 1], [], []>} : vector<32x64xbf16>, vector<64x64xbf16>, vector<32x64xf32> -> vector<32x64xf32>
    %c1_104 = arith.constant 1 : index
    %c2_105 = arith.constant 2 : index
    %c0_106 = arith.constant 0 : index
    %c0_107 = arith.constant 0 : index
    %190 = vector.load %arg5[%c1_104, %c2_105, %c0_106, %c0_107] : memref<2x3x1x64xf32, #tpu.memory_space<vmem>>, vector<1x1x1x64xf32>
    %191 = vector.shape_cast %190 : vector<1x1x1x64xf32> to vector<1x64xf32>
    %192 = vector.broadcast %191 : vector<1x64xf32> to vector<32x64xf32>
    %193 = arith.addf %189, %192 : vector<32x64xf32>
    %194 = vector.shape_cast %179 : vector<32x64xf32> to vector<2x16x4x16xf32>
    %195 = tpu.transpose %194, [0, 2, 1, 3] : vector<2x16x4x16xf32> -> vector<2x4x16x16xf32>
    %196 = vector.shape_cast %195 : vector<2x4x16x16xf32> to vector<8x16x16xf32>
    %197 = arith.truncf %196 : vector<8x16x16xf32> to vector<8x16x16xbf16>
    %198 = vector.shape_cast %186 : vector<32x64xf32> to vector<2x16x4x16xf32>
    %199 = tpu.transpose %198, [0, 2, 1, 3] : vector<2x16x4x16xf32> -> vector<2x4x16x16xf32>
    %200 = vector.shape_cast %199 : vector<2x4x16x16xf32> to vector<8x16x16xf32>
    %201 = arith.truncf %200 : vector<8x16x16xf32> to vector<8x16x16xbf16>
    %202 = vector.shape_cast %193 : vector<32x64xf32> to vector<2x16x4x16xf32>
    %203 = tpu.transpose %202, [0, 2, 1, 3] : vector<2x16x4x16xf32> -> vector<2x4x16x16xf32>
    %204 = vector.shape_cast %203 : vector<2x4x16x16xf32> to vector<8x16x16xf32>
    %205 = arith.truncf %204 : vector<8x16x16xf32> to vector<8x16x16xbf16>
    "tpu.trace_start"() <{level = 10 : i32, message = "zqd,zkd->zqk"}> : () -> ()
    %cst_108 = arith.constant dense<0.000000e+00> : vector<8x16x16xf32>
    %206 = tpu.matmul %197, %201, %cst_108 {dimension_numbers = #tpu.dot_dimension_numbers<[2], [2], [1], [1], [0, 0, 0, 1, 1, 1], [0], [0]>} : vector<8x16x16xbf16>, vector<8x16x16xbf16>, vector<8x16x16xf32> -> vector<8x16x16xf32>
    "tpu.trace_stop"() : () -> ()
    %cst_109 = arith.constant 2.500000e-01 : f32
    %207 = vector.broadcast %cst_109 : f32 to vector<8x16x16xf32>
    %208 = arith.mulf %206, %207 : vector<8x16x16xf32>
    %cst_110 = arith.constant dense<0xFF800000> : vector<8x16xf32>
    %209 = vector.multi_reduction <maximumf>, %208, %cst_110 [2] : vector<8x16x16xf32> to vector<8x16xf32>
    %210 = vector.shape_cast %209 : vector<8x16xf32> to vector<8x16x1xf32>
    %211 = vector.broadcast %210 : vector<8x16x1xf32> to vector<8x16x16xf32>
    %212 = arith.subf %208, %211 : vector<8x16x16xf32>
    %213 = math.exp %212 : vector<8x16x16xf32>
    %cst_111 = arith.constant dense<0.000000e+00> : vector<8x16xf32>
    %214 = vector.multi_reduction <add>, %213, %cst_111 [2] : vector<8x16x16xf32> to vector<8x16xf32>
    %215 = vector.shape_cast %214 : vector<8x16xf32> to vector<8x16x1xf32>
    %216 = vector.broadcast %215 : vector<8x16x1xf32> to vector<8x16x16xf32>
    %217 = arith.divf %213, %216 : vector<8x16x16xf32>
    %218 = arith.truncf %217 : vector<8x16x16xf32> to vector<8x16x16xbf16>
    "tpu.trace_start"() <{level = 10 : i32, message = "zqk,zkd->zqd"}> : () -> ()
    %cst_112 = arith.constant dense<0.000000e+00> : vector<8x16x16xf32>
    %219 = tpu.matmul %218, %205, %cst_112 {dimension_numbers = #tpu.dot_dimension_numbers<[2], [1], [1], [2], [0, 0, 0, 1, 1, 2], [0], [0]>} : vector<8x16x16xbf16>, vector<8x16x16xbf16>, vector<8x16x16xf32> -> vector<8x16x16xf32>
    "tpu.trace_stop"() : () -> ()
    %220 = vector.shape_cast %219 : vector<8x16x16xf32> to vector<2x4x16x16xf32>
    %221 = tpu.transpose %220, [0, 2, 1, 3] : vector<2x4x16x16xf32> -> vector<2x16x4x16xf32>
    %222 = vector.shape_cast %221 : vector<2x16x4x16xf32> to vector<32x64xf32>
    %c1_113 = arith.constant 1 : index
    %c0_114 = arith.constant 0 : index
    %c0_115 = arith.constant 0 : index
    %223 = vector.load %arg6[%c1_113, %c0_114, %c0_115] : memref<2x64x64xbf16, #tpu.memory_space<vmem>>, vector<1x64x64xbf16>
    %224 = vector.shape_cast %223 : vector<1x64x64xbf16> to vector<64x64xbf16>
    %225 = arith.truncf %222 : vector<32x64xf32> to vector<32x64xbf16>
    %cst_116 = arith.constant dense<0.000000e+00> : vector<32x64xf32>
    %226 = tpu.matmul %225, %224, %cst_116 {dimension_numbers = #tpu.dot_dimension_numbers<[1], [0], [0], [1], [0, 0, 1, 1], [], []>} : vector<32x64xbf16>, vector<64x64xbf16>, vector<32x64xf32> -> vector<32x64xf32>
    %c1_117 = arith.constant 1 : index
    %c0_118 = arith.constant 0 : index
    %c0_119 = arith.constant 0 : index
    %227 = vector.load %arg7[%c1_117, %c0_118, %c0_119] : memref<2x1x64xf32, #tpu.memory_space<vmem>>, vector<1x1x64xf32>
    %228 = vector.shape_cast %227 : vector<1x1x64xf32> to vector<1x64xf32>
    %229 = vector.broadcast %228 : vector<1x64xf32> to vector<32x64xf32>
    %230 = arith.addf %226, %229 : vector<32x64xf32>
    %231 = arith.addf %145, %230 : vector<32x64xf32>
    %232 = vector.extract_strided_slice %147 {offsets = [2, 0], sizes = [1, 64], strides = [1, 1]} : vector<4x64xf32> to vector<1x64xf32>
    %233 = vector.extract_strided_slice %147 {offsets = [3, 0], sizes = [1, 64], strides = [1, 1]} : vector<4x64xf32> to vector<1x64xf32>
    %cst_120 = arith.constant dense<0.000000e+00> : vector<32xf32>
    %234 = vector.multi_reduction <add>, %231, %cst_120 [1] : vector<32x64xf32> to vector<32xf32>
    %235 = vector.shape_cast %234 : vector<32xf32> to vector<32x1xf32>
    %cst_121 = arith.constant 6.400000e+01 : f32
    %236 = vector.broadcast %cst_121 : f32 to vector<32x1xf32>
    %237 = arith.divf %235, %236 : vector<32x1xf32>
    %238 = arith.mulf %231, %231 : vector<32x64xf32>
    %cst_122 = arith.constant dense<0.000000e+00> : vector<32xf32>
    %239 = vector.multi_reduction <add>, %238, %cst_122 [1] : vector<32x64xf32> to vector<32xf32>
    %240 = vector.shape_cast %239 : vector<32xf32> to vector<32x1xf32>
    %cst_123 = arith.constant 6.400000e+01 : f32
    %241 = vector.broadcast %cst_123 : f32 to vector<32x1xf32>
    %242 = arith.divf %240, %241 : vector<32x1xf32>
    %243 = arith.mulf %237, %237 : vector<32x1xf32>
    %244 = arith.subf %242, %243 : vector<32x1xf32>
    %245 = vector.broadcast %237 : vector<32x1xf32> to vector<32x64xf32>
    %246 = arith.subf %231, %245 : vector<32x64xf32>
    %cst_124 = arith.constant 9.99999997E-7 : f32
    %247 = vector.broadcast %cst_124 : f32 to vector<32x1xf32>
    %248 = arith.addf %244, %247 : vector<32x1xf32>
    %249 = math.rsqrt %248 : vector<32x1xf32>
    %250 = vector.broadcast %249 : vector<32x1xf32> to vector<32x64xf32>
    %251 = arith.mulf %246, %250 : vector<32x64xf32>
    %252 = vector.broadcast %232 : vector<1x64xf32> to vector<32x64xf32>
    %253 = arith.mulf %251, %252 : vector<32x64xf32>
    %254 = vector.broadcast %233 : vector<1x64xf32> to vector<32x64xf32>
    %255 = arith.addf %253, %254 : vector<32x64xf32>
    %c1_125 = arith.constant 1 : index
    %c0_126 = arith.constant 0 : index
    %c0_127 = arith.constant 0 : index
    %256 = vector.load %arg8[%c1_125, %c0_126, %c0_127] : memref<2x64x128xbf16, #tpu.memory_space<vmem>>, vector<1x64x128xbf16>
    %257 = vector.shape_cast %256 : vector<1x64x128xbf16> to vector<64x128xbf16>
    %258 = arith.truncf %255 : vector<32x64xf32> to vector<32x64xbf16>
    %cst_128 = arith.constant dense<0.000000e+00> : vector<32x128xf32>
    %259 = tpu.matmul %258, %257, %cst_128 {dimension_numbers = #tpu.dot_dimension_numbers<[1], [0], [0], [1], [0, 0, 1, 1], [], []>} : vector<32x64xbf16>, vector<64x128xbf16>, vector<32x128xf32> -> vector<32x128xf32>
    %c1_129 = arith.constant 1 : index
    %c0_130 = arith.constant 0 : index
    %c0_131 = arith.constant 0 : index
    %260 = vector.load %arg9[%c1_129, %c0_130, %c0_131] : memref<2x1x128xf32, #tpu.memory_space<vmem>>, vector<1x1x128xf32>
    %261 = vector.shape_cast %260 : vector<1x1x128xf32> to vector<1x128xf32>
    %262 = vector.broadcast %261 : vector<1x128xf32> to vector<32x128xf32>
    %263 = arith.addf %259, %262 : vector<32x128xf32>
    %cst_132 = arith.constant 5.000000e-01 : f32
    %264 = vector.broadcast %cst_132 : f32 to vector<32x128xf32>
    %265 = arith.mulf %264, %263 : vector<32x128xf32>
    %cst_133 = arith.constant 4.471500e-02 : f32
    %266 = vector.broadcast %cst_133 : f32 to vector<32x128xf32>
    %267 = arith.mulf %266, %263 : vector<32x128xf32>
    %268 = arith.mulf %267, %263 : vector<32x128xf32>
    %269 = arith.mulf %268, %263 : vector<32x128xf32>
    %270 = arith.addf %263, %269 : vector<32x128xf32>
    %cst_134 = arith.constant 0.797884583 : f32
    %271 = vector.broadcast %cst_134 : f32 to vector<32x128xf32>
    %272 = arith.mulf %271, %270 : vector<32x128xf32>
    %273 = math.tanh %272 : vector<32x128xf32>
    %cst_135 = arith.constant 1.000000e+00 : f32
    %274 = vector.broadcast %cst_135 : f32 to vector<32x128xf32>
    %275 = arith.addf %274, %273 : vector<32x128xf32>
    %276 = arith.mulf %265, %275 : vector<32x128xf32>
    %c1_136 = arith.constant 1 : index
    %c0_137 = arith.constant 0 : index
    %c0_138 = arith.constant 0 : index
    %277 = vector.load %arg10[%c1_136, %c0_137, %c0_138] : memref<2x128x64xbf16, #tpu.memory_space<vmem>>, vector<1x128x64xbf16>
    %278 = vector.shape_cast %277 : vector<1x128x64xbf16> to vector<128x64xbf16>
    %279 = arith.truncf %276 : vector<32x128xf32> to vector<32x128xbf16>
    %cst_139 = arith.constant dense<0.000000e+00> : vector<32x64xf32>
    %280 = tpu.matmul %279, %278, %cst_139 {dimension_numbers = #tpu.dot_dimension_numbers<[1], [0], [0], [1], [0, 0, 1, 1], [], []>} : vector<32x128xbf16>, vector<128x64xbf16>, vector<32x64xf32> -> vector<32x64xf32>
    %281 = arith.addf %231, %280 : vector<32x64xf32>
    %c1_140 = arith.constant 1 : index
    %c0_141 = arith.constant 0 : index
    %c0_142 = arith.constant 0 : index
    %282 = vector.load %arg11[%c1_140, %c0_141, %c0_142] : memref<2x1x64xf32, #tpu.memory_space<vmem>>, vector<1x1x64xf32>
    %283 = vector.shape_cast %282 : vector<1x1x64xf32> to vector<1x64xf32>
    %284 = vector.broadcast %283 : vector<1x64xf32> to vector<32x64xf32>
    %285 = arith.addf %281, %284 : vector<32x64xf32>
    %c0_143 = arith.constant 0 : index
    %c0_144 = arith.constant 0 : index
    %286 = vector.load %arg12[%c0_143, %c0_144] : memref<2x64xf32, #tpu.memory_space<vmem>>, vector<1x64xf32>
    %c1_145 = arith.constant 1 : index
    %c0_146 = arith.constant 0 : index
    %287 = vector.load %arg12[%c1_145, %c0_146] : memref<2x64xf32, #tpu.memory_space<vmem>>, vector<1x64xf32>
    %cst_147 = arith.constant dense<0.000000e+00> : vector<32xf32>
    %288 = vector.multi_reduction <add>, %285, %cst_147 [1] : vector<32x64xf32> to vector<32xf32>
    %289 = vector.shape_cast %288 : vector<32xf32> to vector<32x1xf32>
    %cst_148 = arith.constant 6.400000e+01 : f32
    %290 = vector.broadcast %cst_148 : f32 to vector<32x1xf32>
    %291 = arith.divf %289, %290 : vector<32x1xf32>
    %292 = arith.mulf %285, %285 : vector<32x64xf32>
    %cst_149 = arith.constant dense<0.000000e+00> : vector<32xf32>
    %293 = vector.multi_reduction <add>, %292, %cst_149 [1] : vector<32x64xf32> to vector<32xf32>
    %294 = vector.shape_cast %293 : vector<32xf32> to vector<32x1xf32>
    %cst_150 = arith.constant 6.400000e+01 : f32
    %295 = vector.broadcast %cst_150 : f32 to vector<32x1xf32>
    %296 = arith.divf %294, %295 : vector<32x1xf32>
    %297 = arith.mulf %291, %291 : vector<32x1xf32>
    %298 = arith.subf %296, %297 : vector<32x1xf32>
    %299 = vector.broadcast %291 : vector<32x1xf32> to vector<32x64xf32>
    %300 = arith.subf %285, %299 : vector<32x64xf32>
    %cst_151 = arith.constant 9.99999997E-7 : f32
    %301 = vector.broadcast %cst_151 : f32 to vector<32x1xf32>
    %302 = arith.addf %298, %301 : vector<32x1xf32>
    %303 = math.rsqrt %302 : vector<32x1xf32>
    %304 = vector.broadcast %303 : vector<32x1xf32> to vector<32x64xf32>
    %305 = arith.mulf %300, %304 : vector<32x64xf32>
    %306 = vector.broadcast %286 : vector<1x64xf32> to vector<32x64xf32>
    %307 = arith.mulf %305, %306 : vector<32x64xf32>
    %308 = vector.broadcast %287 : vector<1x64xf32> to vector<32x64xf32>
    %309 = arith.addf %307, %308 : vector<32x64xf32>
    %c0_152 = arith.constant 0 : index
    %c0_153 = arith.constant 0 : index
    %310 = vector.load %arg13[%c0_152, %c0_153] : memref<32x64xf32, #tpu.memory_space<vmem>>, vector<32x64xf32>
    tpu.vector_store %arg13[%c0_152, %c0_153], %309 {strides = array<i32>} : memref<32x64xf32, #tpu.memory_space<vmem>>, vector<32x64xf32>,
    return
  }
}

</mosaic_0001>

<bundles_post_ra>
// kernel: tpu_custom_call.1
= control target key start
LH: loop header
LB: loop body
LE: loop exit
PB: predicated region body
PF: predicated region fallthrough
CT: control target
= control target key end

     0   :  { %18 = vsyncpa [#allocation3], 0  ;;  %s12213_s0 = inlined_call_operand.vmem [shape: f32[32,192], index: 0, kind: input, shape index: {}]   ;;  %s12214_s1 = inlined_call_operand.vmem [shape: bf16[192,64], index: 1, kind: input, shape index: {}]   ;;  %s12215_s2 = inlined_call_operand.vmem [shape: f32[32,64], index: 2, kind: input, shape index: {}]   ;;  %s12216_s3 = inlined_call_operand.vmem [shape: f32[2,4,64], index: 3, kind: input, shape index: {}]   ;;  %s12217_s4 = inlined_call_operand.vmem [shape: bf16[2,3,64,64], index: 4, kind: input, shape index: {}]   ;;  %s12218_s5 = inlined_call_operand.vmem [shape: f32[2,3,1,64], index: 5, kind: input, shape index: {}]   ;;  %s12219_s6 = inlined_call_operand.hbm [shape: bf16[2,64,64], index: 6, kind: input, shape index: {}]   ;;  %s12220_s7 = inlined_call_operand.vmem [shape: f32[2,1,64], index: 7, kind: input, shape index: {}]   ;;  %s12221_s8 = inlined_call_operand.hbm [shape: bf16[2,64,128], index: 8, kind: input, shape index: {}]   ;;  %s12222_s9 = inlined_call_operand.vmem [shape: f32[2,1,128], index: 9, kind: input, shape index: {}]   ;;  %s12223_s10 = inlined_call_operand.vmem [shape: bf16[2,128,64], index: 10, kind: input, shape index: {}]   ;;  %s12224_s11 = inlined_call_operand.vmem [shape: f32[2,1,64], index: 11, kind: input, shape index: {}]   ;;  %s12225_s12 = inlined_call_operand.vmem [shape: f32[2,64], index: 12, kind: input, shape index: {}]   ;;  %s12226_s13 = inlined_call_operand.hbm [shape: f32[32,64], index: 13, kind: output, shape index: {}]  }
   0x1   :  { %19 = vsyncpa [#allocation6], 0 }
   0x2   :  { %20 = vsyncpa [#allocation4], 0  ;;  %s9718_s25 = smov [#allocation2]   ;;  %s9646_s29 = scalar_lea.hbm %s12219_s6, 1024 }
   0x3   :  { %s38_s26 = sshll.u32 %s9718_s25, 4  ;;  %p9647_p0 = scmp.ne.s32.totalorder %s12219_s6, %s9646_s29  ;;  %s39_s26 = int_to_ptr.vmem [resolvable:$true] %s38_s26 }
   0x4   :  { %p9650_p1 = scmp.lt.u32.totalorder %s9646_s29, %s12219_s6 }
   0x6   :  { %p9652_p2 = pnand %p9650_p1, %p9647_p0 }
   0x8   :  { %9655 = shalt.err (!%p9652_p2)
}
   0x9   :  { %s9656_s17 = scalar_lea.vmem %s39_s26, 1024  ;;  %p9661_p4 = scmp.lt.s32.totalorder %s39_s26, %s39_s26 }
   0xa   :  { %p9657_p3 = scmp.ne.s32.totalorder %s39_s26, %s9656_s17  ;;  %p9662_p5 = scmp.lt.s32.totalorder %s9656_s17, %s9656_s17 }
   0xc   :  { %p9663_p6 = por %p9662_p5, %p9661_p4 }
   0xe   :  { %p9664_p7 = pnand %p9663_p6, %p9657_p3 }
  0x10   :  { %9667 = shalt.err (!%p9664_p7)
}
  0x11   :  { %s9719_s18 = smov 64   ;;  %s9720_s19 = smov 4  }
  0x12   :  { %44 = dma.hbm_to_vmem [thread:$0]  %s12219_s6, 1024, %s39_s26, [#allocation3], %s9719_s18, %s9719_s18, %s9720_s19  }
  0x13   :  { %s9721_s22 = smov [#allocation5]   ;;  %s9668_s27 = scalar_lea.hbm %s12221_s8, 1024 }
  0x14   :  { %s52_s23 = sshll.u32 %s9721_s22, 4  ;;  %p9669_p8 = scmp.ne.s32.totalorder %s12221_s8, %s9668_s27  ;;  %s53_s23 = int_to_ptr.vmem [resolvable:$true] %s52_s23 }
  0x15   :  { %p9672_p9 = scmp.lt.u32.totalorder %s9668_s27, %s12221_s8 }
  0x17   :  { %p9674_p10 = pnand %p9672_p9, %p9669_p8 }
  0x19   :  { %9677 = shalt.err (!%p9674_p10)
}
  0x1a   :  { %s9678_s15 = scalar_lea.vmem %s53_s23, 1024  ;;  %p9683_p12 = scmp.lt.s32.totalorder %s53_s23, %s53_s23 }
  0x1b   :  { %p9679_p11 = scmp.ne.s32.totalorder %s53_s23, %s9678_s15  ;;  %p9684_p13 = scmp.lt.s32.totalorder %s9678_s15, %s9678_s15 }
  0x1d   :  { %p9685_p0 = por %p9684_p13, %p9683_p12 }
  0x1f   :  { %p9686_p1 = pnand %p9685_p0, %p9679_p11 }
  0x21   :  { %9689 = shalt.err (!%p9686_p1)
}
  0x22   :  { %58 = dma.hbm_to_vmem [thread:$0]  %s12221_s8, 1024, %s53_s23, [#allocation6], %s9719_s18, %s9719_s18, %s9720_s19  }
  0x23   :  { %9712 = dma.done.wait [#allocation3], 1024  }
  0x24   :  { %9713 = vsyncadd [#allocation3], 4294966272 }
  0x25   :  { %9714 = dma.done.wait [#allocation6], 1024  }
  0x26   :  { %9715 = vsyncadd [#allocation6], 4294966272  ;;  %v9722_v0 = vmov 0   ;;  %v9392_v1 = vld [vmem:[%s12214_s1] sm:$0xff]   ;;  %v9393_v2 = vld [vmem:[%s12214_s1 + $0x8] sm:$0xff]   ;;  %vm186_vm0 = vcmask 523264  }
  0x27   :  { %193 = vmatprep.subr.bf16.mxu0 %v9722_v0  ;;  %v9394_v3 = vld [vmem:[%s12214_s1 + $0x10] sm:$0xff]   ;;  %v9395_v4 = vld [vmem:[%s12214_s1 + $0x18] sm:$0xff]   ;;  %v75_v5 = vld [vmem:[%s12213_s0 + $0x8] sm:$0xff]  ;;  %s9723_s29 = smov 112   ;;  %s9724_s30 = smov 96   ;;  %vm9727_vm1 = vmmov 0  }
  0x28   :  { %194 = vmatpush1.bf16.msra.mxu0 %v9392_v1  ;;  %v77_v6 = vld [vmem:[%s12213_s0 + $0x18] sm:$0xff]  ;;  %v9396_v8 = vld [vmem:[%s12214_s1 + $0x20] sm:$0xff]   ;;  %v9397_v9 = vld [vmem:[%s12214_s1 + $0x28] sm:$0xff]   ;;  %vm2372_vm2 = vcmask 130048   ;;  %s9730_s16 = smov 32   ;;  %s9731_s17 = smov 16  }
  0x29   :  { %195 = vmatprep.subr.bf16.mxu0 %v9722_v0  ;;  %v107_v7 = vpack.c.bf16 %v77_v6, %v75_v5  ;;  %v9398_v10 = vld [vmem:[%s12214_s1 + $0x30] sm:$0xff]   ;;  %v9399_v11 = vld [vmem:[%s12214_s1 + $0x38] sm:$0xff]   ;;  %v9400_v12 = vld [vmem:[%s12214_s1 + $0x40] sm:$0xff]   ;;  %s9732_s20 = smov 48   ;;  %vm3897_vm3 = vcmask 261120   ;;  %vm3902_vm4 = vcmask 392192  }
  0x2a   :  { %v9401_v13 = vld [vmem:[%s12214_s1 + $0x48] sm:$0xff]   ;;  %v9402_v14 = vld [vmem:[%s12214_s1 + $0x50] sm:$0xff]   ;;  %v9403_v15 = vld [vmem:[%s12214_s1 + $0x58] sm:$0xff]   ;;  %s9725_s1 = smov 80  }
  0x2b   :  { %8565 = vmatprep.mubr.msk.bf16.mxu0 %vm186_vm0, %v107_v7  ;;  %v74_v16 = vld [vmem:[%s12213_s0] sm:$0xff]  ;;  %v76_v17 = vld [vmem:[%s12213_s0 + $0x10] sm:$0xff]  ;;  %v79_v18 = vld [vmem:[%s12213_s0 + $0x28] sm:$0xff] }
  0x2c   :  { %196 = vmatpush1.bf16.msra.mxu0 %v9393_v2  ;;  %v81_v19 = vld [vmem:[%s12213_s0 + $0x38] sm:$0xff]  ;;  %v106_v20 = vpack.c.bf16 %v76_v17, %v74_v16  ;;  %v78_v22 = vld [vmem:[%s12213_s0 + $0x20] sm:$0xff]  ;;  %v80_v23 = vld [vmem:[%s12213_s0 + $0x30] sm:$0xff] }
  0x2d   :  { %197 = vmatprep.subr.bf16.mxu0 %v9722_v0  ;;  %v109_v21 = vpack.c.bf16 %v81_v19, %v79_v18  ;;  %v108_v24 = vpack.c.bf16 %v80_v23, %v78_v22  ;;  %v110_v25 = vld [vmem:[%s12215_s2] sm:$0xff]  ;;  %v111_v27 = vld [vmem:[%s12215_s2 + $0x8] sm:$0xff]  ;;  %v112_v35 = vld [vmem:[%s12215_s2 + $0x10] sm:$0xff] }
  0x2e   :  { %v113_v40 = vld [vmem:[%s12215_s2 + $0x18] sm:$0xff]  ;;  %v9404_v53 = vld [vmem:[%s12217_s4 + $0x20] sm:$0xff]   ;;  %v9406_v55 = vld [vmem:[%s12217_s4 + $0x28] sm:$0xff]   ;;  %s9733_s2 = smov [#allocation7]  }
  0x2f   :  { %v9405_v54 = vld [vmem:[%s12217_s4] sm:$0xff]   ;;  %8974 = vmatprep.subr.bf16.mxu1 %v9404_v53  ;;  %v9407_v56 = vld [vmem:[%s12217_s4 + $0x8] sm:$0xff]   ;;  %v9408_v57 = vld [vmem:[%s12217_s4 + $0x30] sm:$0xff]  }
  0x30   :  { %198 = vmatpush1.bf16.msra.mxu0 %v9394_v3  ;;  %8975 = vmatpush3.bf16.msra.mxu1 %v9404_v53  ;;  %v9409_v58 = vld [vmem:[%s12217_s4 + $0x10] sm:$0xff]   ;;  %v9410_v59 = vld [vmem:[%s12217_s4 + $0x38] sm:$0xff]   ;;  %v9959_v61 = vld [vmem:[%s12217_s4 + $0x40] sm:$0xff]  }
  0x31   :  { %199 = vmatprep.subr.bf16.mxu0 %v9722_v0  ;;  %8976 = vmatprep.subr.bf16.mxu1 %v9406_v55  ;;  %v9411_v60 = vld [vmem:[%s12217_s4 + $0x18] sm:$0xff]  }
  0x34   :  { %200 = vmatpush1.bf16.msra.mxu0 %v9395_v4  ;;  %8977 = vmatpush3.bf16.msra.mxu1 %v9406_v55 }
  0x35   :  { %201 = vmatprep.subr.bf16.mxu0 %v9722_v0  ;;  %8978 = vmatprep.subr.bf16.mxu1 %v9408_v57 }
  0x38   :  { %202 = vmatpush1.bf16.msra.mxu0 %v9396_v8  ;;  %8979 = vmatpush3.bf16.msra.mxu1 %v9408_v57 }
  0x39   :  { %203 = vmatprep.subr.bf16.mxu0 %v9722_v0  ;;  %8980 = vmatprep.subr.bf16.mxu1 %v9410_v59 }
  0x3c   :  { %204 = vmatpush1.bf16.msra.mxu0 %v9397_v9  ;;  %8981 = vmatpush3.bf16.msra.mxu1 %v9410_v59  ;;  %v9413_v59 = vld [vmem:[%s12217_s4 + $0x48] sm:$0xff]  }
  0x3d   :  { %205 = vmatprep.subr.bf16.mxu0 %v9722_v0  ;;  %8986 = vmatprep.subr.bf16.mxu1 %v9959_v61 }
  0x40   :  { %206 = vmatpush1.bf16.msra.mxu0 %v9398_v10 }
  0x41   :  { %207 = vmatprep.subr.bf16.mxu0 %v9722_v0 }
  0x44   :  { %208 = vmatpush1.bf16.msra.mxu0 %v9399_v11  ;;  %v304_v11 = vlaneseq }
  0x45   :  { %209 = vmatprep.subr.bf16.mxu0 %v9722_v0 }
  0x48   :  { %210 = vmatpush1.bf16.msra.mxu0 %v9400_v12 }
  0x49   :  { %211 = vmatprep.subr.bf16.mxu0 %v9722_v0 }
  0x4c   :  { %212 = vmatpush1.bf16.msra.mxu0 %v9401_v13 }
  0x4d   :  { %213 = vmatprep.subr.bf16.mxu0 %v9722_v0 }
  0x50   :  { %214 = vmatpush1.bf16.msra.mxu0 %v9402_v14 }
  0x51   :  { %215 = vmatprep.subr.bf16.mxu0 %v9722_v0 }
  0x54   :  { %216 = vmatpush1.bf16.msra.mxu0 %v9403_v15 }
  0x55   :  { %8962 = vmatprep.subr.bf16.mxu0 %v9405_v54 }
  0x57   :  { %226 = vmatmul.mubr.bf16.vlgmr.msra.gmra.mrb[0].mxu0 %v106_v20  ;;  %v9962_v20 = vshrl.u32 %v304_v11, 7 }
  0x58   :  { %8566 = vmatprep.mubr.msk.bf16.mxu0 %vm186_vm0, %v109_v21  ;;  %8963 = vmatpush3.bf16.msra.mxu0 %v9405_v54 }
  0x59   :  { %8964 = vmatprep.subr.bf16.mxu0 %v9407_v56  ;;  %12237 = vst [vmem:[#allocation12_spill] sm:$0xff] %v9962_v20 }
  0x5c   :  { %8965 = vmatpush3.bf16.msra.mxu0 %v9407_v56 }
  0x5d   :  { %8966 = vmatprep.subr.bf16.mxu0 %v9409_v58 }
  0x5f   :  { %234 = vmatmul.mubr.bf16.gmra.mrb[4].mxu0 %v108_v24 }
  0x60   :  { %8967 = vmatpush3.bf16.msra.mxu0 %v9409_v58 }
  0x61   :  { %8968 = vmatprep.subr.bf16.mxu0 %v9411_v60 }
  0x64   :  { %8969 = vmatpush3.bf16.msra.mxu0 %v9411_v60  ;;  %v9414_v60 = vld [vmem:[%s12217_s4 + $0x50] sm:$0xff]  }
 0x12a   :  { %v227_v26 = vpop.f32.mrb[0].mxu0 }
 0x12b   :  { %v9898_v28 = vadd.f32 %v227_v26, %v110_v25  ;;  %v229_v29 = vpop.f32.mrb[1].mxu0  ;;  %v12228_v26 = vsub.s32 0, %v9962_v20 }
 0x12c   :  { %v230_v30 = vpop.f32.mrb[2].mxu0 }
 0x12d   :  { %v9900_v31 = vadd.f32 %v230_v30, %v111_v27  ;;  %v232_v32 = vpop.f32.mrb[3].mxu0  ;;  %v243_v33 = vsel %vm186_vm0, %v9898_v28, 0.0  ;;  %v260_v38 = vmul.f32 %v9898_v28, %v9898_v28  ;;  %v242_v27 = vld [vmem:[%s12216_s3] sm:$0xf] }
 0x12e   :  { %244 = vadd.xlane.f32.xlu0 %v243_v33  ;;  %v307_v32 = vrot.slane %v242_v27, %v12228_v26 }
 0x12f   :  { %v261_v34 = vmul.f32 %v9900_v31, %v9900_v31  ;;  %v246_v37 = vsel %vm186_vm0, %v9900_v31, 0.0  ;;  %v264_v47 = vsel %vm186_vm0, %v260_v38, 0.0 }
 0x131   :  { %v267_v36 = vsel %vm186_vm0, %v261_v34, 0.0  ;;  %v12227_v34 = vsub.s32 1, %v9962_v20 }
 0x132   :  { %v235_v39 = vpop.f32.mrb[4].mxu0  ;;  %268 = vadd.xlane.f32.xlu1 %v267_v36  ;;  %247 = vadd.xlane.f32.xlu0 %v246_v37 }
 0x133   :  { %v9917_v41 = vadd.f32 %v235_v39, %v112_v35  ;;  %v237_v42 = vpop.f32.mrb[5].mxu0 }
 0x134   :  { %v238_v43 = vpop.f32.mrb[6].mxu0  ;;  %v315_v42 = vrot.slane %v242_v27, %v12227_v34 }
 0x135   :  { %v9919_v44 = vadd.f32 %v238_v43, %v113_v40  ;;  %v240_v45 = vpop.f32.mrb[7].mxu0  ;;  %v249_v46 = vsel %vm186_vm0, %v9917_v41, 0.0  ;;  %v262_v48 = vmul.f32 %v9917_v41, %v9917_v41 }
 0x136   :  { %250 = vadd.xlane.f32.xlu1 %v249_v46  ;;  %265 = vadd.xlane.f32.xlu0 %v264_v47 }
 0x137   :  { %12236 = vst [vmem:[#allocation11_spill] sm:$0xff] %v9919_v44  ;;  %v252_v49 = vsel %vm186_vm0, %v9919_v44, 0.0  ;;  %v270_v50 = vsel %vm186_vm0, %v262_v48, 0.0  ;;  %v263_v51 = vmul.f32 %v9919_v44, %v9919_v44 }
 0x139   :  { %v273_v52 = vsel %vm186_vm0, %v263_v51, 0.0 }
 0x13a   :  { %253 = vadd.xlane.f32.xlu1 %v252_v49  ;;  %271 = vadd.xlane.f32.xlu0 %v270_v50 }
 0x13e   :  { %274 = vadd.xlane.f32.xlu1 %v273_v52 }
 0x1bb   :  { %v245_v62 = vpop.xlane.xlu0 %244 }
 0x1bc   :  { %v256_v1 = vmul.f32 0.015625, %v245_v62  ;;  %v9415_v62 = vld [vmem:[%s12217_s4 + $0x58] sm:$0xff]  }
 0x1be   :  { %v280_v7 = vmul.f32 %v256_v1, %v256_v1  ;;  %v288_v36 = vsub.f32 %v9898_v28, %v256_v1 }
 0x1bf   :  { %v269_v63 = vpop.xlane.xlu1 %268  ;;  %v248_v0 = vpop.xlane.xlu0 %247 }
 0x1c0   :  { %v257_v2 = vmul.f32 0.015625, %v248_v0  ;;  %v277_v3 = vmul.f32 0.015625, %v269_v63 }
 0x1c2   :  { %v281_v4 = vmul.f32 %v257_v2, %v257_v2  ;;  %v289_v33 = vsub.f32 %v9900_v31, %v257_v2 }
 0x1c3   :  { %v251_v5 = vpop.xlane.xlu1 %250  ;;  %v266_v6 = vpop.xlane.xlu0 %265 }
 0x1c4   :  { %v285_v8 = vsub.f32 %v277_v3, %v281_v4  ;;  %v258_v9 = vmul.f32 0.015625, %v251_v5  ;;  %v276_v10 = vmul.f32 0.015625, %v266_v6 }
 0x1c6   :  { %v293_v12 = vadd.f32 1e-06, %v285_v8  ;;  %v284_v13 = vsub.f32 %v276_v10, %v280_v7  ;;  %v282_v14 = vmul.f32 %v258_v9, %v258_v9  ;;  %v290_v43 = vsub.f32 %v9917_v41, %v258_v9  ;;  %v8567_v10 = vld [vmem:[%s12218_s5] ss:$0 sm:$0xff] }
 0x1c7   :  { %v254_v15 = vpop.xlane.xlu1 %253  ;;  %v272_v16 = vpop.xlane.xlu0 %271 }
 0x1c8   :  { %9460 = vrsqrt.f32 %v293_v12  ;;  %v292_v17 = vadd.f32 1e-06, %v284_v13  ;;  %v259_v18 = vmul.f32 0.015625, %v254_v15  ;;  %v278_v19 = vmul.f32 0.015625, %v272_v16 }
 0x1ca   :  { %9462 = vrsqrt.f32 %v292_v17  ;;  %v286_v21 = vsub.f32 %v278_v19, %v282_v14  ;;  %v283_v23 = vmul.f32 %v259_v18, %v259_v18  ;;  %v291_v50 = vsub.f32 %v9919_v44, %v259_v18 }
 0x1cb   :  { %v275_v22 = vpop.xlane.xlu1 %274  ;;  %v12229_v19 = vmov 0.0  }
 0x1cc   :  { %v294_v24 = vadd.f32 1e-06, %v286_v21  ;;  %v279_v25 = vmul.f32 0.015625, %v275_v22  ;;  %9004 = vmatprep.subr.bf16.mxu0 %v12229_v19  ;;  %v8599_v22 = vld [vmem:[%s12218_s5 + $0x2] ss:$0 sm:$0xff] }
 0x1ce   :  { %9464 = vrsqrt.f32 %v294_v24  ;;  %v287_v29 = vsub.f32 %v279_v25, %v283_v23 }
 0x1d0   :  { %v295_v30 = vadd.f32 1e-06, %v287_v29 }
 0x1d2   :  { %v9461_v35 = vpop.eup %9460  ;;  %9466 = vrsqrt.f32 %v295_v30 }
 0x1d3   :  { %v301_v37 = vmul.f32 %v9461_v35, %v289_v33 }
 0x1d4   :  { %v9463_v38 = vpop.eup %9462 }
 0x1d5   :  { %v309_v39 = vmul.f32 %v307_v32, %v301_v37  ;;  %v300_v40 = vmul.f32 %v9463_v38, %v288_v36  ;;  %v9729_v37 = vmov 1934713408  }
 0x1d6   :  { %v671_v38 = vunpack.c.l.s4 %v9729_v37 }
 0x1d7   :  { %v308_v45 = vmul.f32 %v307_v32, %v300_v40  ;;  %v317_v49 = vadd.f32 %v315_v42, %v309_v39 }
 0x1d8   :  { %v9465_v46 = vpop.eup %9464 }
 0x1d9   :  { %v302_v47 = vmul.f32 %v9465_v46, %v290_v43  ;;  %v316_v48 = vadd.f32 %v315_v42, %v308_v45  ;;  %v672_v43 = vunpack.c.0.s8 %v671_v38 }
 0x1db   :  { %v320_v51 = vpack.c.bf16 %v317_v49, %v316_v48  ;;  %v310_v53 = vmul.f32 %v307_v32, %v302_v47 }
 0x1dc   :  { %v9467_v52 = vpop.eup %9466 }
 0x1dd   :  { %v303_v54 = vmul.f32 %v9467_v52, %v291_v50  ;;  %8970 = vmatprep.mubr.msk.bf16.mxu0 %vm186_vm0, %v320_v51  ;;  %8982 = vmatprep.mubr.msk.bf16.mxu1 %vm186_vm0, %v320_v51  ;;  %v318_v56 = vadd.f32 %v315_v42, %v310_v53  ;;  %v10110_v52 = vsub.s32 %v672_v43, %v9962_v20 }
 0x1df   :  { %v311_v55 = vmul.f32 %v307_v32, %v303_v54  ;;  %v9728_v32 = vmov 1983009808  }
 0x1e0   :  { %v639_v33 = vunpack.c.l.s4 %v9728_v32 }
 0x1e1   :  { %v319_v57 = vadd.f32 %v315_v42, %v311_v55 }
 0x1e2   :  { %v640_v39 = vunpack.c.0.s8 %v639_v33 }
 0x1e3   :  { %v321_v58 = vpack.c.bf16 %v319_v57, %v318_v56 }
 0x1e4   :  { %v10105_v45 = vsub.s32 %v640_v39, %v9962_v20 }
 0x1e5   :  { %8971 = vmatmul.mubr.msk.bf16.vlgmr.msra.gmra.mrb[8].mxu0 %vm186_vm0, %v321_v58  ;;  %8983 = vmatmul.mubr.msk.bf16.vlgmr.msra.gmra.mrb[0].mxu1 %vm186_vm0, %v321_v58 }
 0x1e6   :  { %8987 = vmatpush3.bf16.msra.mxu1 %v9959_v61  ;;  %8994 = vmatprep.mubr.msk.bf16.mxu1 %vm186_vm0, %v320_v51  ;;  %v8583_v61 = vld [vmem:[%s12218_s5 + $0x1] ss:$0 sm:$0xff] }
 0x1e7   :  { %8988 = vmatprep.subr.bf16.mxu1 %v9413_v59  ;;  %9006 = vmatprep.mubr.msk.bf16.mxu0 %vm9727_vm1, %v12229_v19 }
 0x1ea   :  { %8989 = vmatpush3.bf16.msra.mxu1 %v9413_v59 }
 0x1eb   :  { %8990 = vmatprep.subr.bf16.mxu1 %v9414_v60 }
 0x1ee   :  { %8991 = vmatpush3.bf16.msra.mxu1 %v9414_v60 }
 0x1ef   :  { %8992 = vmatprep.subr.bf16.mxu1 %v9415_v62 }
 0x1f2   :  { %8993 = vmatpush3.bf16.msra.mxu1 %v9415_v62 }
 0x1f3   :  { %8998 = vmatprep.subr.bf16.mxu1 %v12229_v19 }
 0x1f5   :  { %8995 = vmatmul.mubr.msk.bf16.vlgmr.msra.gmra.mrb[4].mxu1 %vm186_vm0, %v321_v58 }
 0x1f6   :  { %9000 = vmatprep.mubr.msk.bf16.mxu1 %vm9727_vm1, %v12229_v19 }
 0x2b8   :  { %v8972_v63 = vpop.f32.mrb[8].mxu0  ;;  %v8984_v0 = vpop.f32.mrb[0].mxu1 }
 0x2b9   :  { %v9996_v1 = vadd.f32 %v8984_v0, %v8583_v61  ;;  %v401_v2 = vpop.f32.mrb[9].mxu0  ;;  %v491_v3 = vpop.f32.mrb[1].mxu1  ;;  %v10043_v18 = vadd.f32 %v8972_v63, %v8567_v10 }
 0x2ba   :  { %v9998_v4 = vadd.f32 %v8583_v61, %v491_v3  ;;  %v8973_v5 = vpop.f32.mrb[10].mxu0  ;;  %v8985_v6 = vpop.f32.mrb[2].mxu1  ;;  %v10023_v13 = vadd.f32 %v8567_v10, %v401_v2 }
 0x2bb   :  { %1196 = vrot.lane.b32.xlu0 %v9996_v1, %s9723_s29  ;;  %v404_v7 = vpop.f32.mrb[11].mxu0  ;;  %v494_v8 = vpop.f32.mrb[3].mxu1  ;;  %v10004_v9 = vadd.f32 %v8985_v6, %v8583_v61  ;;  %v10055_v21 = vadd.f32 %v8973_v5, %v8567_v10 }
 0x2bc   :  { %1204 = vrot.lane.b32.xlu1 %v9998_v4, %s9724_s30  ;;  %v10017_v11 = vadd.f32 %v8583_v61, %v494_v8  ;;  %v10033_v17 = vadd.f32 %v8567_v10, %v404_v7 }
 0x2bf   :  { %1208 = vrot.lane.b32.xlu0 %v9996_v1, %s9724_s30 }
 0x2c0   :  { %1198 = vrot.lane.b32.xlu1 %v10004_v9, %s9723_s29 }
 0x2c3   :  { %1192 = vrot.lane.b32.xlu0 %v9998_v4, %s9723_s29 }
 0x2c4   :  { %1210 = vrot.lane.b32.xlu1 %v10004_v9, %s9724_s30 }
 0x2c7   :  { %1216 = vrot.lane.b32.xlu0 %v9998_v4, %s9725_s1 }
 0x2c8   :  { %v8996_v12 = vpop.f32.mrb[4].mxu1  ;;  %1194 = vrot.lane.b32.xlu1 %v10017_v11, %s9723_s29 }
 0x2c9   :  { %v581_v14 = vpop.f32.mrb[5].mxu1  ;;  %v10064_v23 = vadd.f32 %v8996_v12, %v8599_v22 }
 0x2ca   :  { %v8997_v15 = vpop.f32.mrb[6].mxu1  ;;  %v10070_v24 = vadd.f32 %v8599_v22, %v581_v14 }
 0x2cb   :  { %v584_v16 = vpop.f32.mrb[7].mxu1  ;;  %600 = vrot.lane.b32.xlu0 %v10023_v13, %s9723_s29  ;;  %v10082_v25 = vadd.f32 %v8997_v15, %v8599_v22 }
 0x2cc   :  { %1206 = vrot.lane.b32.xlu1 %v10017_v11, %s9724_s30  ;;  %v10090_v27 = vadd.f32 %v8599_v22, %v584_v16 }
 0x2cf   :  { %612 = vrot.lane.b32.xlu0 %v10023_v13, %s9724_s30 }
 0x2d0   :  { %1218 = vrot.lane.b32.xlu1 %v10017_v11, %s9725_s1 }
 0x2d3   :  { %624 = vrot.lane.b32.xlu0 %v10023_v13, %s9725_s1 }
 0x2d4   :  { %602 = vrot.lane.b32.xlu1 %v10033_v17, %s9723_s29 }
 0x2d7   :  { %1220 = vrot.lane.b32.xlu0 %v9996_v1, %s9725_s1 }
 0x2d8   :  { %614 = vrot.lane.b32.xlu1 %v10033_v17, %s9724_s30 }
 0x2db   :  { %604 = vrot.lane.b32.xlu0 %v10043_v18, %s9723_s29 }
 0x2dc   :  { %626 = vrot.lane.b32.xlu1 %v10033_v17, %s9725_s1 }
 0x2df   :  { %616 = vrot.lane.b32.xlu0 %v10043_v18, %s9724_s30 }
 0x2e0   :  { %1222 = vrot.lane.b32.xlu1 %v10004_v9, %s9725_s1 }
 0x2e3   :  { %628 = vrot.lane.b32.xlu0 %v10043_v18, %s9725_s1 }
 0x2e4   :  { %606 = vrot.lane.b32.xlu1 %v10055_v21, %s9723_s29 }
 0x2e7   :  { %1788 = vrot.lane.b32.xlu0 %v10064_v23, %s9723_s29 }
 0x2e8   :  { %618 = vrot.lane.b32.xlu1 %v10055_v21, %s9724_s30 }
 0x2eb   :  { %1784 = vrot.lane.b32.xlu0 %v10070_v24, %s9723_s29 }
 0x2ec   :  { %630 = vrot.lane.b32.xlu1 %v10055_v21, %s9725_s1 }
 0x2ef   :  { %1808 = vrot.lane.b32.xlu0 %v10070_v24, %s9725_s1 }
 0x2f0   :  { %1800 = vrot.lane.b32.xlu1 %v10064_v23, %s9724_s30 }
 0x2f4   :  { %1796 = vrot.lane.b32.xlu1 %v10070_v24, %s9724_s30 }
 0x2f8   :  { %1790 = vrot.lane.b32.xlu1 %v10082_v25, %s9723_s29 }
 0x2fc   :  { %1786 = vrot.lane.b32.xlu1 %v10090_v27, %s9723_s29 }
 0x300   :  { %1798 = vrot.lane.b32.xlu1 %v10090_v27, %s9724_s30 }
 0x304   :  { %1810 = vrot.lane.b32.xlu1 %v10090_v27, %s9725_s1 }
 0x32d   :  { %v10098_v29 = vpop.permute.xlu0 %1196 }
 0x32e   :  { %v1205_v30 = vpop.permute.xlu1 %1204 }
 0x32f   :  { %v1228_v46 = vcombine.low %v9998_v4, %v1205_v30  ;;  %v1229_v47 = vcombine.high %v9998_v4, %v1205_v30 }
 0x331   :  { %v1209_v35 = vpop.permute.xlu0 %1208  ;;  %v1236_v53 = vrot.slane %v1228_v46, %v10105_v45  ;;  %v1243_v54 = vrot.slane %v1229_v47, %v10105_v45 }
 0x332   :  { %v10100_v36 = vpop.permute.xlu1 %1198  ;;  %v1364_v57 = vcombine.low %v9996_v1, %v1209_v35  ;;  %v1365_v0 = vcombine.high %v9996_v1, %v1209_v35 }
 0x334   :  { %v10123_v6 = vrot.slane %v1364_v57, %v10105_v45 }
 0x335   :  { %v1193_v40 = vpop.permute.xlu0 %1192 }
 0x336   :  { %v10102_v42 = vpop.permute.xlu1 %1210 }
 0x337   :  { %v1432_v7 = vcombine.low %v10004_v9, %v10102_v42 }
 0x339   :  { %v1217_v48 = vpop.permute.xlu0 %1216 }
 0x33a   :  { %v1244_v49 = vcombine.low %v1193_v40, %v1217_v48  ;;  %v1245_v50 = vcombine.high %v1193_v40, %v1217_v48  ;;  %v1195_v51 = vpop.permute.xlu1 %1194  ;;  %v1433_v40 = vcombine.high %v10004_v9, %v10102_v42  ;;  %v10149_v48 = vrot.slane %v1365_v0, %v10105_v45 }
 0x33c   :  { %v1252_v55 = vrot.slane %v1244_v49, %v10105_v45  ;;  %v1259_v56 = vrot.slane %v1245_v50, %v10105_v45 }
 0x33d   :  { %v601_v58 = vpop.permute.xlu0 %600 }
 0x33e   :  { %v1260_v59 = vcombine.low %v1236_v53, %v1252_v55  ;;  %v1261_v60 = vcombine.high %v1236_v53, %v1252_v55  ;;  %v1276_v62 = vcombine.low %v1243_v54, %v1259_v56  ;;  %v1277_v61 = vcombine.high %v1243_v54, %v1259_v56  ;;  %v1207_v63 = vpop.permute.xlu1 %1206 }
 0x33f   :  { %v1296_v8 = vcombine.low %v10017_v11, %v1207_v63  ;;  %v1297_v10 = vcombine.high %v10017_v11, %v1207_v63 }
 0x340   :  { %v1268_v2 = vrot.slane %v1260_v59, %v10110_v52  ;;  %v1275_v3 = vrot.slane %v1261_v60, %v10110_v52  ;;  %v1284_v4 = vrot.slane %v1276_v62, %v10110_v52  ;;  %v1291_v5 = vrot.slane %v1277_v61, %v10110_v52 }
 0x341   :  { %v613_v12 = vpop.permute.xlu0 %612  ;;  %v1304_v43 = vrot.slane %v1296_v8, %v10105_v45  ;;  %v1311_v49 = vrot.slane %v1297_v10, %v10105_v45  ;;  %v10166_v62 = vrot.slane %v1433_v40, %v10105_v45 }
 0x342   :  { %v1500_v1 = vcombine.low %v1268_v2, %v1275_v3  ;;  %v8614_v14 = vcombine.high %v1268_v2, %v1275_v3  ;;  %v1516_v15 = vcombine.low %v1284_v4, %v1291_v5  ;;  %v8615_v16 = vcombine.high %v1284_v4, %v1291_v5  ;;  %v1219_v22 = vpop.permute.xlu1 %1218 }
 0x343   :  { %v636_v30 = vcombine.low %v10023_v13, %v613_v12  ;;  %v637_v32 = vcombine.high %v10023_v13, %v613_v12  ;;  %v1312_v33 = vcombine.low %v1195_v51, %v1219_v22  ;;  %v1313_v35 = vcombine.high %v1195_v51, %v1219_v22 }
 0x344   :  { %v10132_v37 = vrot.slane %v1500_v1, %v10105_v45  ;;  %v10135_v38 = vrot.slane %v8614_v14, %v10105_v45  ;;  %v10138_v11 = vrot.slane %v1516_v15, %v10105_v45  ;;  %v10141_v39 = vrot.slane %v8615_v16, %v10105_v45 }
 0x345   :  { %v1320_v13 = vrot.slane %v1312_v33, %v10105_v45  ;;  %v1327_v46 = vrot.slane %v1313_v35, %v10105_v45  ;;  %v625_v47 = vpop.permute.xlu0 %624  ;;  %v644_v56 = vrot.slane %v636_v30, %v10105_v45  ;;  %v651_v57 = vrot.slane %v637_v32, %v10105_v45 }
 0x346   :  { %v652_v50 = vcombine.low %v601_v58, %v625_v47  ;;  %v653_v51 = vcombine.high %v601_v58, %v625_v47  ;;  %v10152_v53 = vpop.permute.xlu1 %602  ;;  %v1532_v9 = vcombine.low %v10132_v37, %v10135_v38  ;;  %v1548_v42 = vcombine.low %v10138_v11, %v10141_v39 }
 0x347   :  { %v1328_v54 = vcombine.low %v1304_v43, %v1320_v13  ;;  %v1329_v55 = vcombine.high %v1304_v43, %v1320_v13  ;;  %v10163_v58 = vrot.slane %v1432_v7, %v10105_v45  ;;  %v1344_v61 = vcombine.low %v1311_v49, %v1327_v46 }
 0x348   :  { %v660_v59 = vrot.slane %v652_v50, %v10105_v45  ;;  %v667_v60 = vrot.slane %v653_v51, %v10105_v45  ;;  %v1345_v63 = vcombine.high %v1311_v49, %v1327_v46  ;;  %v10175_v7 = vrot.slane %v1532_v9, %v10110_v52 }
 0x349   :  { %v1221_v0 = vpop.permute.xlu0 %1220  ;;  %v10169_v10 = vrot.slane %v1328_v54, %v10110_v52  ;;  %v10172_v12 = vrot.slane %v1329_v55, %v10110_v52  ;;  %v10178_v1 = vrot.slane %v1548_v42, %v10110_v52  ;;  %v10185_v30 = vrot.slane %v1344_v61, %v10110_v52 }
 0x34a   :  { %v668_v2 = vcombine.low %v644_v56, %v660_v59  ;;  %v669_v3 = vcombine.high %v644_v56, %v660_v59  ;;  %v684_v4 = vcombine.low %v651_v57, %v667_v60  ;;  %v685_v5 = vcombine.high %v651_v57, %v667_v60  ;;  %v615_v8 = vpop.permute.xlu1 %614 }
 0x34b   :  { %v10188_v32 = vrot.slane %v1345_v63, %v10110_v52  ;;  %v1380_v33 = vcombine.low %v10098_v29, %v1221_v0  ;;  %v1381_v35 = vcombine.high %v10098_v29, %v1221_v0  ;;  %v704_v54 = vcombine.low %v10033_v17, %v615_v8 }
 0x34c   :  { %v676_v14 = vrot.slane %v668_v2, %v10110_v52  ;;  %v683_v15 = vrot.slane %v669_v3, %v10110_v52  ;;  %v692_v16 = vrot.slane %v684_v4, %v10110_v52  ;;  %v699_v22 = vrot.slane %v685_v5, %v10110_v52 }
 0x34d   :  { %v10192_v40 = vpop.permute.xlu0 %604  ;;  %v1388_v50 = vrot.slane %v1380_v33, %v10105_v45  ;;  %v1395_v51 = vrot.slane %v1381_v35, %v10105_v45  ;;  %v705_v55 = vcombine.high %v10033_v17, %v615_v8  ;;  %v1568_v63 = vcombine.low %v10169_v10, %v10172_v12 }
 0x34e   :  { %v908_v43 = vcombine.low %v676_v14, %v683_v15  ;;  %v8606_v13 = vcombine.high %v676_v14, %v683_v15  ;;  %v924_v46 = vcombine.low %v692_v16, %v699_v22  ;;  %v8607_v47 = vcombine.high %v692_v16, %v699_v22  ;;  %v627_v49 = vpop.permute.xlu1 %626 }
 0x34f   :  { %v1396_v57 = vcombine.low %v10123_v6, %v1388_v50  ;;  %v1397_v59 = vcombine.high %v10123_v6, %v1388_v50  ;;  %v1412_v60 = vcombine.low %v10149_v48, %v1395_v51  ;;  %v1413_v17 = vcombine.high %v10149_v48, %v1395_v51 }
 0x350   :  { %v10199_v9 = vrot.slane %v908_v43, %v10105_v45  ;;  %v10202_v29 = vrot.slane %v8606_v13, %v10105_v45  ;;  %v10205_v42 = vrot.slane %v924_v46, %v10105_v45  ;;  %v10208_v56 = vrot.slane %v8607_v47, %v10105_v45 }
 0x351   :  { %v617_v61 = vpop.permute.xlu0 %616  ;;  %v8616_v0 = vcombine.high %v10169_v10, %v10172_v12  ;;  %v1584_v2 = vcombine.low %v10185_v30, %v10188_v32  ;;  %v8617_v3 = vcombine.high %v10185_v30, %v10188_v32  ;;  %v10223_v6 = vrot.slane %v1396_v57, %v10110_v52 }
 0x352   :  { %v1223_v4 = vpop.permute.xlu1 %1222  ;;  %v10226_v5 = vrot.slane %v1397_v59, %v10110_v52  ;;  %v712_v48 = vrot.slane %v704_v54, %v10105_v45  ;;  %v719_v8 = vrot.slane %v705_v55, %v10105_v45  ;;  %v720_v16 = vcombine.low %v10152_v53, %v627_v49 }
 0x353   :  { %v721_v22 = vcombine.high %v10152_v53, %v627_v49  ;;  %v10241_v43 = vrot.slane %v1412_v60, %v10110_v52  ;;  %v10244_v13 = vrot.slane %v1413_v17, %v10110_v52  ;;  %v772_v50 = vcombine.low %v10043_v18, %v617_v61 }
 0x354   :  { %v728_v46 = vrot.slane %v720_v16, %v10105_v45  ;;  %v773_v53 = vcombine.high %v10043_v18, %v617_v61  ;;  %v1448_v55 = vcombine.low %v10100_v36, %v1223_v4  ;;  %v1449_v57 = vcombine.high %v10100_v36, %v1223_v4 }
 0x355   :  { %v735_v47 = vrot.slane %v721_v22, %v10105_v45  ;;  %v629_v49 = vpop.permute.xlu0 %628  ;;  %v10340_v12 = vrot.slane %v8617_v3, %v10105_v45 }
 0x356   :  { %v10256_v59 = vpop.permute.xlu1 %606  ;;  %v736_v60 = vcombine.low %v712_v48, %v728_v46  ;;  %v737_v17 = vcombine.high %v712_v48, %v728_v46  ;;  %v1456_v34 = vrot.slane %v1448_v55, %v10105_v45  ;;  %v1463_v18 = vrot.slane %v1449_v57, %v10105_v45 }
 0x357   :  { %v752_v16 = vcombine.low %v719_v8, %v735_v47  ;;  %v753_v22 = vcombine.high %v719_v8, %v735_v47  ;;  %v788_v61 = vcombine.low %v10192_v40, %v629_v49  ;;  %v789_v26 = vcombine.high %v10192_v40, %v629_v49 }
 0x358   :  { %v744_v54 = vrot.slane %v736_v60, %v10110_v52  ;;  %v751_v51 = vrot.slane %v737_v17, %v10110_v52  ;;  %v1464_v48 = vcombine.low %v10163_v58, %v1456_v34  ;;  %v1465_v8 = vcombine.high %v10163_v58, %v1456_v34 }
 0x359   :  { %v760_v36 = vrot.slane %v752_v16, %v10110_v52  ;;  %v767_v4 = vrot.slane %v753_v22, %v10110_v52  ;;  %v1480_v46 = vcombine.low %v10166_v62, %v1463_v18  ;;  %v1481_v47 = vcombine.high %v10166_v62, %v1463_v18 }
 0x35a   :  { %v976_v55 = vcombine.low %v744_v54, %v751_v51  ;;  %v8608_v57 = vcombine.high %v744_v54, %v751_v51  ;;  %v10271_v49 = vrot.slane %v1464_v48, %v10110_v52  ;;  %v10274_v60 = vrot.slane %v1465_v8, %v10110_v52  ;;  %v10278_v22 = vpop.permute.xlu1 %618  ;;  %v10290_v54 = vpop.permute.xlu0 %1788 }
 0x35b   :  { %v992_v35 = vcombine.low %v760_v36, %v767_v4  ;;  %v8609_v40 = vcombine.high %v760_v36, %v767_v4  ;;  %v796_v17 = vrot.slane %v788_v61, %v10105_v45  ;;  %v803_v16 = vrot.slane %v789_v26, %v10105_v45 }
 0x35c   :  { %v10285_v62 = vrot.slane %v1480_v46, %v10110_v52  ;;  %v10288_v51 = vrot.slane %v1481_v47, %v10110_v52  ;;  %v10293_v18 = vrot.slane %v976_v55, %v10105_v45  ;;  %v10296_v26 = vrot.slane %v8608_v57, %v10105_v45 }
 0x35d   :  { %v780_v61 = vrot.slane %v772_v50, %v10105_v45  ;;  %v787_v36 = vrot.slane %v773_v53, %v10105_v45  ;;  %v10301_v4 = vrot.slane %v992_v35, %v10105_v45  ;;  %v10304_v48 = vrot.slane %v8609_v40, %v10105_v45 }
 0x35e   :  { %v10316_v35 = vrot.slane %v1568_v63, %v10105_v45  ;;  %v10322_v53 = vrot.slane %v8616_v0, %v10105_v45  ;;  %v10328_v40 = vrot.slane %v1584_v2, %v10105_v45  ;;  %v840_v2 = vcombine.low %v10055_v21, %v10278_v22 }
 0x35f   :  { %v804_v47 = vcombine.low %v780_v61, %v796_v17  ;;  %v805_v55 = vcombine.high %v780_v61, %v796_v17  ;;  %v820_v57 = vcombine.low %v787_v36, %v803_v16  ;;  %v821_v58 = vcombine.high %v787_v36, %v803_v16  ;;  %v631_v36 = vpop.permute.xlu1 %630 }
 0x360   :  { %v1600_v0 = vcombine.low %v10316_v35, %v10322_v53  ;;  %v1008_v10 = vcombine.low %v10293_v18, %v10296_v26  ;;  %v1616_v3 = vcombine.low %v10328_v40, %v10340_v12  ;;  %v1024_v46 = vcombine.low %v10301_v4, %v10304_v48 }
 0x361   :  { %v812_v17 = vrot.slane %v804_v47, %v10110_v52  ;;  %v819_v16 = vrot.slane %v805_v55, %v10110_v52  ;;  %v828_v61 = vrot.slane %v820_v57, %v10110_v52  ;;  %v835_v63 = vrot.slane %v821_v58, %v10110_v52  ;;  %v10346_v47 = vpop.permute.xlu0 %1784 }
 0x362   :  { %v1608_v32 = vrot.slane %v1600_v0, %v10110_v52  ;;  %v856_v0 = vcombine.low %v10256_v59, %v631_v36  ;;  %v857_v34 = vcombine.high %v10256_v59, %v631_v36 }
 0x363   :  { %v1044_v58 = vcombine.low %v812_v17, %v819_v16  ;;  %v8610_v55 = vcombine.high %v812_v17, %v819_v16  ;;  %v1060_v57 = vcombine.low %v828_v61, %v835_v63  ;;  %v8611_v50 = vcombine.high %v828_v61, %v835_v63 }
 0x364   :  { %v841_v16 = vcombine.high %v10055_v21, %v10278_v22  ;;  %v1564_v61 = vcombine.low %v10175_v7, %v10178_v1  ;;  %v1624_v63 = vrot.slane %v1616_v3, %v10110_v52  ;;  %v848_v21 = vrot.slane %v840_v2, %v10105_v45  ;;  %v10379_v22 = vpop.permute.xlu1 %1800 }
 0x365   :  { %v10358_v8 = vrot.slane %v1044_v58, %v10105_v45  ;;  %v10361_v17 = vrot.slane %v8610_v55, %v10105_v45  ;;  %v10371_v30 = vrot.slane %v1060_v57, %v10105_v45  ;;  %v10374_v58 = vrot.slane %v8611_v50, %v10105_v45  ;;  %v1809_v59 = vpop.permute.xlu0 %1808 }
 0x366   :  { %v1565_v55 = vcombine.high %v10175_v7, %v10178_v1  ;;  %v1632_v15 = vcombine.low %v1608_v32, %v1624_v63  ;;  %v1633_v33 = vcombine.high %v1608_v32, %v1624_v63  ;;  %v864_v3 = vrot.slane %v856_v0, %v10105_v45 }
 0x367   :  { %v871_v14 = vrot.slane %v857_v34, %v10105_v45  ;;  %v855_v1 = vrot.slane %v841_v16, %v10105_v45  ;;  %v1092_v63 = vcombine.low %v10371_v30, %v10374_v58  ;;  %v1836_v20 = vcombine.low %v10346_v47, %v1809_v59 }
 0x368   :  { %v1772_v2 = vpack.c.bf16 %v1632_v15, %v1564_v61  ;;  %v1773_v57 = vpack.c.bf16 %v1633_v33, %v1565_v55  ;;  %v872_v19 = vcombine.low %v848_v21, %v864_v3  ;;  %v873_v32 = vcombine.high %v848_v21, %v864_v3  ;;  %v1797_v61 = vpop.permute.xlu1 %1796 }
 0x369   :  { %v888_v34 = vcombine.low %v855_v1, %v871_v14  ;;  %v889_v0 = vcombine.high %v855_v1, %v871_v14  ;;  %v1837_v16 = vcombine.high %v10346_v47, %v1809_v59  ;;  %v1093_v14 = vcombine.high %v10371_v30, %v10374_v58 }
 0x36a   :  { %v2377_v36 = vsel %vm2372_vm2, %v1772_v2, 0  ;;  %v2424_v50 = vsel %vm2372_vm2, %v1773_v57, 0  ;;  %v880_v44 = vrot.slane %v872_v19, %v10110_v52  ;;  %v887_v7 = vrot.slane %v873_v32, %v10110_v52 }
 0x36b   :  { %8999 = vmatpush3.bf16.xpose.msra.mxu1 %v2377_v36  ;;  %9005 = vmatpush3.bf16.xpose.msra.mxu0 %v2424_v50  ;;  %v896_v15 = vrot.slane %v888_v34, %v10110_v52  ;;  %v903_v33 = vrot.slane %v889_v0, %v10110_v52  ;;  %v12238_v3 = vmov 0.0   ;;  %v12239_v36 = vcombine.low %v10199_v9, %v10202_v29 }
 0x36c   :  { %v1112_v55 = vcombine.low %v880_v44, %v887_v7  ;;  %v8612_v21 = vcombine.high %v880_v44, %v887_v7  ;;  %9010 = vmatprep.subr.bf16.mxu1 %v12238_v3  ;;  %9016 = vmatprep.subr.bf16.mxu0 %v12238_v3  ;;  %v12240_v47 = vcombine.low %v10205_v42, %v10208_v56 }
 0x36d   :  { %v1128_v19 = vcombine.low %v896_v15, %v903_v33  ;;  %v8613_v1 = vcombine.high %v896_v15, %v903_v33  ;;  %v948_v50 = vrot.slane %v12239_v36, %v10110_v52  ;;  %v1016_v7 = vrot.slane %v1008_v10, %v10110_v52 }
 0x36e   :  { %v964_v59 = vrot.slane %v12240_v47, %v10110_v52  ;;  %v10413_v2 = vrot.slane %v1112_v55, %v10105_v45  ;;  %v10416_v44 = vrot.slane %v8612_v21, %v10105_v45  ;;  %v1032_v57 = vrot.slane %v1024_v46, %v10110_v52 }
 0x36f   :  { %v10421_v32 = vrot.slane %v1128_v19, %v10105_v45  ;;  %v10424_v34 = vrot.slane %v8613_v1, %v10105_v45  ;;  %v1844_v0 = vrot.slane %v1836_v20, %v10105_v45  ;;  %v1851_v15 = vrot.slane %v1837_v16, %v10105_v45  ;;  %v10436_v1 = vpop.permute.xlu1 %1790 }
 0x370   :  { %v972_v33 = vcombine.low %v948_v50, %v964_v59  ;;  %v1040_v55 = vcombine.low %v1016_v7, %v1032_v57  ;;  %v973_v36 = vcombine.high %v948_v50, %v964_v59  ;;  %v1041_v47 = vcombine.high %v1016_v7, %v1032_v57 }
 0x371   :  { %v1144_v21 = vcombine.low %v10413_v2, %v10416_v44  ;;  %v1533_v10 = vcombine.high %v10132_v37, %v10135_v38  ;;  %v1549_v19 = vcombine.high %v10138_v11, %v10141_v39  ;;  %v1601_v50 = vcombine.high %v10316_v35, %v10322_v53 }
 0x372   :  { %v1180_v20 = vpack.c.bf16 %v1040_v55, %v972_v33  ;;  %v1181_v16 = vpack.c.bf16 %v1041_v47, %v973_v36  ;;  %v1617_v59 = vcombine.high %v10328_v40, %v10340_v12  ;;  %v1820_v46 = vcombine.low %v10070_v24, %v1797_v61 }
 0x373   :  { %v1547_v7 = vrot.slane %v1533_v10, %v10110_v52  ;;  %v1563_v57 = vrot.slane %v1549_v19, %v10110_v52  ;;  %v1821_v37 = vcombine.high %v10070_v24, %v1797_v61  ;;  %v1615_v38 = vrot.slane %v1601_v50, %v10110_v52 }
 0x374   :  { %9001 = vmatmul.mubr.msk.bf16.vlgmr.msra.gmra.mrb[8].mxu1 %vm2372_vm2, %v1180_v20  ;;  %9007 = vmatmul.mubr.msk.bf16.vlgmr.msra.gmra.mrb[12].mxu0 %vm2372_vm2, %v1181_v16  ;;  %v1631_v11 = vrot.slane %v1617_v59, %v10110_v52  ;;  %v12241_v39 = vcombine.high %v10199_v9, %v10202_v29  ;;  %v1828_v12 = vrot.slane %v1820_v46, %v10105_v45  ;;  %v10468_v20 = vpop.permute.xlu1 %1786 }
 0x375   :  { %v1566_v53 = vcombine.low %v1547_v7, %v1563_v57  ;;  %v1567_v40 = vcombine.high %v1547_v7, %v1563_v57  ;;  %v1835_v33 = vrot.slane %v1821_v37, %v10105_v45  ;;  %9012 = vmatprep.mubr.msk.bf16.mxu1 %vm9727_vm1, %v12238_v3  ;;  %9018 = vmatprep.mubr.msk.bf16.mxu0 %vm9727_vm1, %v12238_v3 }
 0x376   :  { %v955_v35 = vrot.slane %v12241_v39, %v10110_v52  ;;  %v1634_v24 = vcombine.low %v1615_v38, %v1631_v11  ;;  %v1635_v61 = vcombine.high %v1615_v38, %v1631_v11  ;;  %v12242_v55 = vcombine.high %v10205_v42, %v10208_v56 }
 0x377   :  { %v12243_v29 = vcombine.high %v10293_v18, %v10296_v26  ;;  %v1852_v47 = vcombine.low %v1828_v12, %v1844_v0  ;;  %v1853_v46 = vcombine.high %v1828_v12, %v1844_v0  ;;  %v1868_v10 = vcombine.low %v1835_v33, %v1851_v15 }
 0x378   :  { %v971_v9 = vrot.slane %v12242_v55, %v10110_v52  ;;  %v1869_v19 = vcombine.high %v1835_v33, %v1851_v15  ;;  %v1160_v16 = vcombine.low %v10421_v32, %v10424_v34  ;;  %v1774_v50 = vpack.c.bf16 %v1634_v24, %v1566_v53 }
 0x379   :  { %v1023_v36 = vrot.slane %v12243_v29, %v10110_v52  ;;  %v1775_v59 = vpack.c.bf16 %v1635_v61, %v1567_v40  ;;  %v12244_v42 = vcombine.high %v10301_v4, %v10304_v48  ;;  %v1860_v7 = vrot.slane %v1852_v47, %v10110_v52  ;;  %v1799_v29 = vpop.permute.xlu1 %1798 }
 0x37a   :  { %v1867_v18 = vrot.slane %v1853_v46, %v10110_v52  ;;  %v10479_v26 = vrot.slane %v1868_v10, %v10110_v52  ;;  %v10482_v0 = vrot.slane %v1869_v19, %v10110_v52  ;;  %v1161_v15 = vcombine.high %v10421_v32, %v10424_v34 }
 0x37b   :  { %v1039_v56 = vrot.slane %v12244_v42, %v10110_v52  ;;  %v2471_v57 = vsel %vm2372_vm2, %v1774_v50, 0  ;;  %v2518_v37 = vsel %vm2372_vm2, %v1775_v59, 0  ;;  %v974_v11 = vcombine.low %v955_v35, %v971_v9 }
 0x37c   :  { %9011 = vmatpush3.bf16.xpose.msra.mxu1 %v2471_v57  ;;  %9017 = vmatpush3.bf16.xpose.msra.mxu0 %v2518_v37  ;;  %v2092_v4 = vcombine.low %v1860_v7, %v1867_v18  ;;  %v8622_v48 = vcombine.high %v1860_v7, %v1867_v18  ;;  %v2108_v39 = vcombine.low %v10479_v26, %v10482_v0 }
 0x37d   :  { %v1042_v38 = vcombine.low %v1023_v36, %v1039_v56  ;;  %9022 = vmatprep.subr.bf16.mxu1 %v12238_v3  ;;  %9028 = vmatprep.subr.bf16.mxu0 %v12238_v3  ;;  %v975_v53 = vcombine.high %v955_v35, %v971_v9  ;;  %v1043_v40 = vcombine.high %v1023_v36, %v1039_v56 }
 0x37e   :  { %v10493_v12 = vrot.slane %v2092_v4, %v10105_v45  ;;  %v12245_v61 = vcombine.low %v10223_v6, %v10226_v5  ;;  %v10502_v47 = vrot.slane %v8622_v48, %v10105_v45  ;;  %v12246_v35 = vcombine.high %v10223_v6, %v10226_v5 }
 0x37f   :  { %v1182_v24 = vpack.c.bf16 %v1042_v38, %v974_v11  ;;  %v1183_v46 = vpack.c.bf16 %v1043_v40, %v975_v53  ;;  %v12247_v36 = vcombine.low %v10241_v43, %v10244_v13  ;;  %v12248_v19 = vcombine.high %v10241_v43, %v10244_v13 }
 0x380   :  { %v1643_v55 = vrot.slane %v12245_v61, %v10105_v45  ;;  %v1651_v9 = vrot.slane %v12246_v35, %v10105_v45  ;;  %v12249_v59 = vcombine.low %v10271_v49, %v10274_v60  ;;  %v12250_v6 = vcombine.high %v10271_v49, %v10274_v60 }
 0x381   :  { %v1659_v10 = vrot.slane %v12247_v36, %v10105_v45  ;;  %v1667_v50 = vrot.slane %v12248_v19, %v10105_v45  ;;  %v12251_v56 = vcombine.low %v10285_v62, %v10288_v51  ;;  %v12252_v43 = vcombine.high %v10285_v62, %v10288_v51 }
 0x382   :  { %v1711_v42 = vrot.slane %v12249_v59, %v10105_v45  ;;  %v1719_v5 = vrot.slane %v12250_v6, %v10105_v45  ;;  %v1668_v18 = vcombine.low %v1643_v55, %v1651_v9  ;;  %v1888_v57 = vcombine.low %v10090_v27, %v1799_v29 }
 0x383   :  { %v1727_v7 = vrot.slane %v12251_v56, %v10105_v45  ;;  %v1735_v13 = vrot.slane %v12252_v43, %v10105_v45  ;;  %v1889_v37 = vcombine.high %v10090_v27, %v1799_v29  ;;  %v1684_v38 = vcombine.low %v1659_v10, %v1667_v50  ;;  %9013 = vmatmul.mubr.msk.bf16.vlgmr.msra.gmra.mrb[12].mxu1 %vm2372_vm2, %v1182_v24  ;;  %v1811_v43 = vpop.permute.xlu1 %1810 }
 0x384   :  { %v1736_v4 = vcombine.low %v1711_v42, %v1719_v5  ;;  %v12253_v49 = vcombine.low %v10358_v8, %v10361_v17  ;;  %v1100_v48 = vrot.slane %v1092_v63, %v10110_v52  ;;  %9019 = vmatmul.mubr.msk.bf16.vlgmr.msra.gmra.mrb[16].mxu0 %vm2372_vm2, %v1183_v46  ;;  %v1676_v62 = vrot.slane %v1668_v18, %v10110_v52 }
 0x385   :  { %v1752_v51 = vcombine.low %v1727_v7, %v1735_v13  ;;  %v1896_v27 = vrot.slane %v1888_v57, %v10105_v45  ;;  %v1692_v11 = vrot.slane %v1684_v38, %v10110_v52  ;;  %v1903_v40 = vrot.slane %v1889_v37, %v10105_v45  ;;  %9024 = vmatprep.mubr.msk.bf16.mxu1 %vm9727_vm1, %v12238_v3 }
 0x386   :  { %v1084_v60 = vrot.slane %v12253_v49, %v10110_v52  ;;  %v1744_v53 = vrot.slane %v1736_v4, %v10110_v52  ;;  %9030 = vmatprep.mubr.msk.bf16.mxu0 %vm9727_vm1, %v12238_v3  ;;  %v1152_v61 = vrot.slane %v1144_v21, %v10110_v52  ;;  %v1168_v29 = vrot.slane %v1160_v16, %v10110_v52 }
 0x387   :  { %v1760_v63 = vrot.slane %v1752_v51, %v10110_v52  ;;  %v1700_v46 = vcombine.low %v1676_v62, %v1692_v11  ;;  %v1701_v35 = vcombine.high %v1676_v62, %v1692_v11  ;;  %v1669_v19 = vcombine.high %v1643_v55, %v1651_v9 }
 0x388   :  { %v1108_v24 = vcombine.low %v1084_v60, %v1100_v48  ;;  %v1109_v36 = vcombine.high %v1084_v60, %v1100_v48  ;;  %v1176_v56 = vcombine.low %v1152_v61, %v1168_v29  ;;  %v1177_v18 = vcombine.high %v1152_v61, %v1168_v29 }
 0x389   :  { %v1768_v59 = vcombine.low %v1744_v53, %v1760_v63  ;;  %v1769_v6 = vcombine.high %v1744_v53, %v1760_v63  ;;  %v1683_v57 = vrot.slane %v1669_v19, %v10110_v52  ;;  %v1685_v37 = vcombine.high %v1659_v10, %v1667_v50 }
 0x38a   :  { %v1737_v38 = vcombine.high %v1711_v42, %v1719_v5  ;;  %v1753_v4 = vcombine.high %v1727_v7, %v1735_v13  ;;  %v1184_v33 = vpack.c.bf16 %v1176_v56, %v1108_v24  ;;  %v1185_v21 = vpack.c.bf16 %v1177_v18, %v1109_v36 }
 0x38b   :  { %v1776_v49 = vpack.c.bf16 %v1768_v59, %v1700_v46  ;;  %v1777_v51 = vpack.c.bf16 %v1769_v6, %v1701_v35  ;;  %v1699_v16 = vrot.slane %v1685_v37, %v10110_v52  ;;  %v1904_v9 = vcombine.low %v10468_v20, %v1811_v43 }
 0x38c   :  { %v1751_v62 = vrot.slane %v1737_v38, %v10110_v52  ;;  %v1767_v55 = vrot.slane %v1753_v4, %v10110_v52  ;;  %v1905_v10 = vcombine.high %v10468_v20, %v1811_v43  ;;  %v12254_v50 = vcombine.high %v10358_v8, %v10361_v17 }
 0x38d   :  { %v2565_v60 = vsel %vm2372_vm2, %v1776_v49, 0  ;;  %v2612_v48 = vsel %vm2372_vm2, %v1777_v51, 0  ;;  %v1702_v5 = vcombine.low %v1683_v57, %v1699_v16  ;;  %v1703_v13 = vcombine.high %v1683_v57, %v1699_v16 }
 0x38e   :  { %v1091_v42 = vrot.slane %v12254_v50, %v10110_v52  ;;  %9023 = vmatpush3.bf16.xpose.msra.mxu1 %v2565_v60  ;;  %9029 = vmatpush3.bf16.xpose.msra.mxu0 %v2612_v48  ;;  %v1770_v7 = vcombine.low %v1751_v62, %v1767_v55  ;;  %v1771_v11 = vcombine.high %v1751_v62, %v1767_v55 }
 0x38f   :  { %9034 = vmatprep.subr.bf16.mxu1 %v12238_v3  ;;  %9040 = vmatprep.subr.bf16.mxu0 %v12238_v3  ;;  %v1912_v53 = vrot.slane %v1904_v9, %v10105_v45  ;;  %v1919_v63 = vrot.slane %v1905_v10, %v10105_v45  ;;  %v1107_v8 = vrot.slane %v1093_v14, %v10110_v52 }
 0x390   :  { %v1778_v20 = vpack.c.bf16 %v1770_v7, %v1702_v5  ;;  %v12255_v17 = vcombine.high %v10413_v2, %v10416_v44  ;;  %v1175_v61 = vrot.slane %v1161_v15, %v10110_v52  ;;  %v1779_v29 = vpack.c.bf16 %v1771_v11, %v1703_v13 }
 0x391   :  { %v1920_v46 = vcombine.low %v1896_v27, %v1912_v53  ;;  %v1921_v35 = vcombine.high %v1896_v27, %v1912_v53  ;;  %v1936_v36 = vcombine.low %v1903_v40, %v1919_v63  ;;  %v2115_v30 = vrot.slane %v2108_v39, %v10105_v45 }
 0x392   :  { %v1159_v24 = vrot.slane %v12255_v17, %v10110_v52  ;;  %v1937_v58 = vcombine.high %v1903_v40, %v1919_v63  ;;  %v1110_v14 = vcombine.low %v1091_v42, %v1107_v8  ;;  %v12256_v2 = vcombine.high %v10479_v26, %v10482_v0 }
 0x393   :  { %v1928_v32 = vrot.slane %v1920_v46, %v10110_v52  ;;  %v1935_v34 = vrot.slane %v1921_v35, %v10110_v52  ;;  %v1944_v15 = vrot.slane %v1936_v36, %v10110_v52  ;;  %v2659_v27 = vsel %vm2372_vm2, %v1778_v20, 0 }
 0x394   :  { %v1178_v19 = vcombine.low %v1159_v24, %v1175_v61  ;;  %v2123_v44 = vrot.slane %v12256_v2, %v10105_v45  ;;  %v1951_v59 = vrot.slane %v1937_v58, %v10110_v52  ;;  %v1111_v39 = vcombine.high %v1091_v42, %v1107_v8 }
 0x395   :  { %9025 = vmatmul.mubr.msk.bf16.vlgmr.msra.gmra.mrb[16].mxu1 %vm2372_vm2, %v1184_v33  ;;  %9031 = vmatmul.mubr.msk.bf16.vlgmr.msra.gmra.mrb[20].mxu0 %vm2372_vm2, %v1185_v21  ;;  %v2706_v40 = vsel %vm2372_vm2, %v1779_v29, 0  ;;  %v2160_v26 = vcombine.low %v1928_v32, %v1935_v34  ;;  %v8624_v0 = vcombine.high %v1928_v32, %v1935_v34  ;;  %v2124_v56 = vcombine.low %v10493_v12, %v10502_v47 }
 0x396   :  { %v1186_v6 = vpack.c.bf16 %v1178_v19, %v1110_v14  ;;  %9035 = vmatpush3.bf16.xpose.msra.mxu1 %v2659_v27  ;;  %9041 = vmatpush3.bf16.xpose.msra.mxu0 %v2706_v40  ;;  %v2176_v18 = vcombine.low %v1944_v15, %v1951_v59  ;;  %v8625_v43 = vcombine.high %v1944_v15, %v1951_v59 }
 0x397   :  { %v1179_v57 = vcombine.high %v1159_v24, %v1175_v61  ;;  %v2167_v37 = vrot.slane %v2160_v26, %v10105_v45  ;;  %v2175_v38 = vrot.slane %v8624_v0, %v10105_v45  ;;  %9036 = vmatprep.mubr.msk.bf16.mxu1 %vm9727_vm1, %v12238_v3  ;;  %9042 = vmatprep.mubr.msk.bf16.mxu0 %vm9727_vm1, %v12238_v3 }
 0x398   :  { %v2132_v33 = vrot.slane %v2124_v56, %v10110_v52  ;;  %v2183_v4 = vrot.slane %v2176_v18, %v10105_v45  ;;  %v2191_v49 = vrot.slane %v8625_v43, %v10105_v45  ;;  %9046 = vmatprep.subr.bf16.mxu1 %v12238_v3  ;;  %9052 = vmatprep.subr.bf16.mxu0 %v12238_v3 }
 0x399   :  { %v2140_v51 = vcombine.low %v2115_v30, %v2123_v44  ;;  %v2192_v21 = vcombine.low %v2167_v37, %v2175_v38  ;;  %v2125_v16 = vcombine.high %v10493_v12, %v10502_v47  ;;  %v2141_v62 = vcombine.high %v2115_v30, %v2123_v44 }
 0x39a   :  { %v2193_v55 = vcombine.high %v2167_v37, %v2175_v38  ;;  %v1187_v9 = vpack.c.bf16 %v1179_v57, %v1111_v39  ;;  %v2208_v48 = vcombine.low %v2183_v4, %v2191_v49  ;;  %v2209_v10 = vcombine.high %v2183_v4, %v2191_v49 }
 0x39b   :  { %v2148_v60 = vrot.slane %v2140_v51, %v10110_v52  ;;  %v2200_v50 = vrot.slane %v2192_v21, %v10110_v52  ;;  %v2139_v42 = vrot.slane %v2125_v16, %v10110_v52  ;;  %v2155_v5 = vrot.slane %v2141_v62, %v10110_v52 }
 0x39c   :  { %v2207_v7 = vrot.slane %v2193_v55, %v10110_v52  ;;  %v2216_v11 = vrot.slane %v2208_v48, %v10110_v52  ;;  %v2223_v12 = vrot.slane %v2209_v10, %v10110_v52 }
 0x39d   :  { %v2156_v13 = vcombine.low %v2132_v33, %v2148_v60  ;;  %9037 = vmatmul.mubr.msk.bf16.vlgmr.msra.gmra.mrb[20].mxu1 %vm2372_vm2, %v1186_v6  ;;  %9043 = vmatmul.mubr.msk.bf16.vlgmr.msra.gmra.mrb[24].mxu0 %vm2372_vm2, %v1187_v9  ;;  %v2157_v47 = vcombine.high %v2132_v33, %v2148_v60  ;;  %v2158_v53 = vcombine.low %v2139_v42, %v2155_v5 }
 0x39e   :  { %v2159_v63 = vcombine.high %v2139_v42, %v2155_v5  ;;  %v2224_v20 = vcombine.low %v2200_v50, %v2216_v11  ;;  %v2225_v8 = vcombine.high %v2200_v50, %v2216_v11  ;;  %9048 = vmatprep.mubr.msk.bf16.mxu1 %vm9727_vm1, %v12238_v3  ;;  %v2226_v17 = vcombine.low %v2207_v7, %v2223_v12 }
 0x39f   :  { %9054 = vmatprep.mubr.msk.bf16.mxu0 %vm9727_vm1, %v12238_v3  ;;  %v2227_v24 = vcombine.high %v2207_v7, %v2223_v12 }
 0x3a0   :  { %v2364_v61 = vpack.c.bf16 %v2224_v20, %v2156_v13  ;;  %v2365_v29 = vpack.c.bf16 %v2225_v8, %v2157_v47  ;;  %v10631_v46 = vpack.c.bf16 %v2226_v17, %v2158_v53 }
 0x3a1   :  { %v10633_v35 = vpack.c.bf16 %v2227_v24, %v2159_v63 }
 0x3a2   :  { %9047 = vmatpush3.bf16.msra.mxu1 %v2364_v61  ;;  %9053 = vmatpush3.bf16.msra.mxu0 %v2365_v29 }
 0x3a3   :  { %9058 = vmatprep.subr.bf16.mxu1 %v12238_v3  ;;  %9064 = vmatprep.subr.bf16.mxu0 %v12238_v3 }
 0x447   :  { %v2413_v36 = vpop.f32.mrb[8].mxu1  ;;  %v2460_v30 = vpop.f32.mrb[12].mxu0 }
 0x448   :  { %v10637_v58 = vmul.f32 0.25, %v2413_v36  ;;  %v9002_v14 = vpop.f32.mrb[9].mxu1  ;;  %v9008_v19 = vpop.f32.mrb[13].mxu0  ;;  %v10639_v32 = vmul.f32 0.25, %v2460_v30 }
 0x449   :  { %v2416_v2 = vpop.f32.mrb[10].mxu1  ;;  %v2463_v44 = vpop.f32.mrb[14].mxu0 }
 0x44a   :  { %v10641_v34 = vmul.f32 0.25, %v2416_v2  ;;  %v9003_v15 = vpop.f32.mrb[11].mxu1  ;;  %v9009_v27 = vpop.f32.mrb[15].mxu0  ;;  %v2765_v59 = vsel %vm2372_vm2, %v10637_v58, -inf  ;;  %v10647_v39 = vmul.f32 0.25, %v2463_v44  ;;  %v2771_v40 = vsel %vm2372_vm2, %v10639_v32, -inf }
 0x44b   :  { %2766 = vmax.xlane.f32.xlu0 %v2765_v59 }
 0x44c   :  { %v2768_v6 = vsel %vm2372_vm2, %v10641_v34, -inf  ;;  %v2774_v26 = vsel %vm2372_vm2, %v10647_v39, -inf }
 0x44d   :  { %2769 = vmax.xlane.f32.xlu1 %v2768_v6 }
 0x44f   :  { %2772 = vmax.xlane.f32.xlu0 %v2771_v40 }
 0x453   :  { %2775 = vmax.xlane.f32.xlu0 %v2774_v26 }
 0x456   :  { %v2507_v56 = vpop.f32.mrb[12].mxu1 }
 0x457   :  { %v2554_v0 = vpop.f32.mrb[16].mxu0  ;;  %v10653_v18 = vmul.f32 0.25, %v2507_v56  ;;  %v9014_v43 = vpop.f32.mrb[13].mxu1 }
 0x458   :  { %v9020_v57 = vpop.f32.mrb[17].mxu0  ;;  %v2510_v37 = vpop.f32.mrb[14].mxu1  ;;  %v10655_v33 = vmul.f32 0.25, %v2554_v0 }
 0x459   :  { %v2557_v38 = vpop.f32.mrb[18].mxu0  ;;  %v10657_v4 = vmul.f32 0.25, %v2510_v37  ;;  %v9015_v49 = vpop.f32.mrb[15].mxu1  ;;  %v2777_v21 = vsel %vm2372_vm2, %v10653_v18, -inf }
 0x45a   :  { %v9021_v51 = vpop.f32.mrb[19].mxu0  ;;  %2778 = vmax.xlane.f32.xlu0 %v2777_v21  ;;  %v10661_v16 = vmul.f32 0.25, %v2557_v38  ;;  %v2783_v55 = vsel %vm2372_vm2, %v10655_v33, -inf }
 0x45b   :  { %v2780_v62 = vsel %vm2372_vm2, %v10657_v4, -inf }
 0x45c   :  { %2781 = vmax.xlane.f32.xlu1 %v2780_v62  ;;  %v2786_v9 = vsel %vm2372_vm2, %v10661_v16, -inf }
 0x45e   :  { %2784 = vmax.xlane.f32.xlu0 %v2783_v55 }
 0x460   :  { %2787 = vmax.xlane.f32.xlu1 %v2786_v9 }
 0x468   :  { %v2601_v60 = vpop.f32.mrb[16].mxu1  ;;  %v2648_v48 = vpop.f32.mrb[20].mxu0 }
 0x469   :  { %v10669_v10 = vmul.f32 0.25, %v2601_v60  ;;  %v9026_v50 = vpop.f32.mrb[17].mxu1  ;;  %v9032_v42 = vpop.f32.mrb[21].mxu0  ;;  %v10671_v13 = vmul.f32 0.25, %v2648_v48 }
 0x46a   :  { %v2604_v5 = vpop.f32.mrb[18].mxu1  ;;  %v2651_v7 = vpop.f32.mrb[22].mxu0 }
 0x46b   :  { %v10673_v11 = vmul.f32 0.25, %v2604_v5  ;;  %v9027_v12 = vpop.f32.mrb[19].mxu1  ;;  %v9033_v47 = vpop.f32.mrb[23].mxu0  ;;  %v2789_v53 = vsel %vm2372_vm2, %v10669_v10, -inf  ;;  %v10677_v63 = vmul.f32 0.25, %v2651_v7  ;;  %v2795_v8 = vsel %vm2372_vm2, %v10671_v13, -inf }
 0x46c   :  { %2790 = vmax.xlane.f32.xlu0 %v2789_v53 }
 0x46d   :  { %v2792_v20 = vsel %vm2372_vm2, %v10673_v11, -inf  ;;  %v2798_v30 = vsel %vm2372_vm2, %v10677_v63, -inf }
 0x46e   :  { %2793 = vmax.xlane.f32.xlu1 %v2792_v20 }
 0x470   :  { %v2742_v17 = vpop.f32.mrb[24].mxu0  ;;  %v2695_v24 = vpop.f32.mrb[20].mxu1  ;;  %2796 = vmax.xlane.f32.xlu0 %v2795_v8 }
 0x471   :  { %v10683_v61 = vmul.f32 0.25, %v2695_v24  ;;  %v9038_v29 = vpop.f32.mrb[21].mxu1  ;;  %v9044_v36 = vpop.f32.mrb[25].mxu0  ;;  %v10687_v2 = vmul.f32 0.25, %v2742_v17 }
 0x472   :  { %v2745_v14 = vpop.f32.mrb[26].mxu0  ;;  %2799 = vmax.xlane.f32.xlu1 %v2798_v30  ;;  %v2698_v19 = vpop.f32.mrb[22].mxu1 }
 0x473   :  { %v10689_v44 = vmul.f32 0.25, %v2698_v19  ;;  %v9039_v15 = vpop.f32.mrb[23].mxu1  ;;  %v9045_v27 = vpop.f32.mrb[27].mxu0  ;;  %v2801_v59 = vsel %vm2372_vm2, %v10683_v61, -inf  ;;  %v10693_v6 = vmul.f32 0.25, %v2745_v14  ;;  %v2807_v26 = vsel %vm2372_vm2, %v10687_v2, -inf }
 0x474   :  { %2802 = vmax.xlane.f32.xlu0 %v2801_v59 }
 0x475   :  { %v2804_v40 = vsel %vm2372_vm2, %v10689_v44, -inf  ;;  %v2810_v0 = vsel %vm2372_vm2, %v10693_v6, -inf }
 0x476   :  { %2805 = vmax.xlane.f32.xlu1 %v2804_v40 }
 0x478   :  { %2808 = vmax.xlane.f32.xlu0 %v2807_v26 }
 0x47a   :  { %2811 = vmax.xlane.f32.xlu1 %v2810_v0 }
 0x48b   :  { %1802 = vrot.lane.b32.xlu1 %v10082_v25, %s9724_s30 }
 0x48e   :  { %1812 = vrot.lane.b32.xlu0 %v10064_v23, %s9725_s1 }
 0x4d8   :  { %v2767_v56 = vpop.xlane.xlu0 %2766 }
 0x4d9   :  { %v2813_v43 = vsub.f32 %v10637_v58, %v2767_v56 }
 0x4da   :  { %v2770_v57 = vpop.xlane.xlu1 %2769 }
 0x4db   :  { %v2829_v37 = vmul.f32 1.442695, %v2813_v43  ;;  %v2814_v38 = vsub.f32 %v10641_v34, %v2770_v57 }
 0x4dc   :  { %v2773_v49 = vpop.xlane.xlu0 %2772 }
 0x4dd   :  { %9468 = vpow2.f32 %v2829_v37  ;;  %v2831_v51 = vmul.f32 1.442695, %v2814_v38  ;;  %v2815_v21 = vsub.f32 %v10639_v32, %v2773_v49 }
 0x4df   :  { %9470 = vpow2.f32 %v2831_v51  ;;  %v2833_v62 = vmul.f32 1.442695, %v2815_v21 }
 0x4e0   :  { %v2776_v55 = vpop.xlane.xlu0 %2775 }
 0x4e1   :  { %9472 = vpow2.f32 %v2833_v62  ;;  %v2816_v9 = vsub.f32 %v10647_v39, %v2776_v55 }
 0x4e3   :  { %v2835_v60 = vmul.f32 1.442695, %v2816_v9 }
 0x4e5   :  { %9474 = vpow2.f32 %v2835_v60 }
 0x4e7   :  { %v2779_v48 = vpop.xlane.xlu0 %2778  ;;  %v10709_v50 = vpop.eup %9468 }
 0x4e8   :  { %v2817_v58 = vsub.f32 %v10653_v18, %v2779_v48  ;;  %v2861_v34 = vsel %vm2372_vm2, %v10709_v50, 0.0 }
 0x4e9   :  { %v2782_v42 = vpop.xlane.xlu1 %2781  ;;  %v10714_v5 = vpop.eup %9470  ;;  %2862 = vadd.xlane.f32.xlu0 %v2861_v34 }
 0x4ea   :  { %v2818_v32 = vsub.f32 %v10657_v4, %v2782_v42  ;;  %v2837_v7 = vmul.f32 1.442695, %v2817_v58  ;;  %v2864_v39 = vsel %vm2372_vm2, %v10714_v5, 0.0 }
 0x4eb   :  { %v2785_v12 = vpop.xlane.xlu0 %2784  ;;  %v10719_v47 = vpop.eup %9472  ;;  %2865 = vadd.xlane.f32.xlu1 %v2864_v39 }
 0x4ec   :  { %v2839_v53 = vmul.f32 1.442695, %v2818_v32  ;;  %9476 = vpow2.f32 %v2837_v7  ;;  %v2819_v18 = vsub.f32 %v10655_v33, %v2785_v12  ;;  %v2867_v8 = vsel %vm2372_vm2, %v10719_v47, 0.0 }
 0x4ed   :  { %v2788_v20 = vpop.xlane.xlu1 %2787  ;;  %2868 = vadd.xlane.f32.xlu0 %v2867_v8 }
 0x4ee   :  { %9478 = vpow2.f32 %v2839_v53  ;;  %v2820_v4 = vsub.f32 %v10661_v16, %v2788_v20  ;;  %v2841_v17 = vmul.f32 1.442695, %v2819_v18 }
 0x4ef   :  { %v10725_v24 = vpop.eup %9474 }
 0x4f0   :  { %v2843_v29 = vmul.f32 1.442695, %v2820_v4  ;;  %9480 = vpow2.f32 %v2841_v17  ;;  %v2870_v36 = vsel %vm2372_vm2, %v10725_v24, 0.0 }
 0x4f1   :  { %2871 = vadd.xlane.f32.xlu1 %v2870_v36 }
 0x4f2   :  { %9482 = vpow2.f32 %v2843_v29 }
 0x4f6   :  { %v10729_v33 = vpop.eup %9476 }
 0x4f7   :  { %v2873_v14 = vsel %vm2372_vm2, %v10729_v33, 0.0 }
 0x4f8   :  { %v10733_v19 = vpop.eup %9478  ;;  %2874 = vadd.xlane.f32.xlu0 %v2873_v14 }
 0x4f9   :  { %v2791_v30 = vpop.xlane.xlu0 %2790  ;;  %v2876_v27 = vsel %vm2372_vm2, %v10733_v19, 0.0 }
 0x4fa   :  { %v2821_v16 = vsub.f32 %v10669_v10, %v2791_v30  ;;  %v10738_v59 = vpop.eup %9480  ;;  %2877 = vadd.xlane.f32.xlu1 %v2876_v27 }
 0x4fb   :  { %v2794_v15 = vpop.xlane.xlu1 %2793  ;;  %v2879_v56 = vsel %vm2372_vm2, %v10738_v59, 0.0 }
 0x4fc   :  { %v2822_v40 = vsub.f32 %v10673_v11, %v2794_v15  ;;  %v2845_v26 = vmul.f32 1.442695, %v2821_v16  ;;  %v10743_v43 = vpop.eup %9482  ;;  %2880 = vadd.xlane.f32.xlu0 %v2879_v56 }
 0x4fd   :  { %v2797_v0 = vpop.xlane.xlu0 %2796  ;;  %v2882_v11 = vsel %vm2372_vm2, %v10743_v43, 0.0 }
 0x4fe   :  { %v2847_v57 = vmul.f32 1.442695, %v2822_v40  ;;  %9484 = vpow2.f32 %v2845_v26  ;;  %v2823_v10 = vsub.f32 %v10671_v13, %v2797_v0 }
 0x4ff   :  { %v2800_v37 = vpop.xlane.xlu1 %2799 }
 0x500   :  { %9486 = vpow2.f32 %v2847_v57  ;;  %v2824_v38 = vsub.f32 %v10677_v63, %v2800_v37  ;;  %v2849_v49 = vmul.f32 1.442695, %v2823_v10  ;;  %2883 = vadd.xlane.f32.xlu0 %v2882_v11 }
 0x501   :  { %v2803_v51 = vpop.xlane.xlu0 %2802 }
 0x502   :  { %v2851_v21 = vmul.f32 1.442695, %v2824_v38  ;;  %9488 = vpow2.f32 %v2849_v49  ;;  %v2825_v62 = vsub.f32 %v10683_v61, %v2803_v51 }
 0x503   :  { %v2806_v55 = vpop.xlane.xlu1 %2805 }
 0x504   :  { %9490 = vpow2.f32 %v2851_v21  ;;  %v2853_v9 = vmul.f32 1.442695, %v2825_v62  ;;  %v2826_v29 = vsub.f32 %v10689_v44, %v2806_v55 }
 0x505   :  { %v2809_v60 = vpop.xlane.xlu0 %2808 }
 0x506   :  { %9492 = vpow2.f32 %v2853_v9  ;;  %v2827_v13 = vsub.f32 %v10687_v2, %v2809_v60  ;;  %v2855_v36 = vmul.f32 1.442695, %v2826_v29 }
 0x507   :  { %v2812_v48 = vpop.xlane.xlu1 %2811 }
 0x508   :  { %v10751_v58 = vpop.eup %9484  ;;  %v2828_v63 = vsub.f32 %v10693_v6, %v2812_v48  ;;  %v2857_v42 = vmul.f32 1.442695, %v2827_v13  ;;  %v1956_v13 = vcombine.low %v10064_v23, %v10379_v22 }
 0x509   :  { %v2885_v34 = vsel %vm2372_vm2, %v10751_v58, 0.0  ;;  %v1813_v16 = vpop.permute.xlu0 %1812 }
 0x50a   :  { %v10756_v32 = vpop.eup %9486  ;;  %v2859_v61 = vmul.f32 1.442695, %v2828_v63  ;;  %9494 = vpow2.f32 %v2857_v42  ;;  %2886 = vadd.xlane.f32.xlu0 %v2885_v34  ;;  %v1972_v9 = vcombine.low %v10290_v54, %v1813_v16  ;;  %v1973_v60 = vcombine.high %v10290_v54, %v1813_v16 }
 0x50b   :  { %v2888_v7 = vsel %vm2372_vm2, %v10756_v32, 0.0  ;;  %v10787_v15 = vpop.permute.xlu1 %1802  ;;  %v1964_v34 = vrot.slane %v1956_v13, %v10105_v45 }
 0x50c   :  { %v10760_v12 = vpop.eup %9488  ;;  %9496 = vpow2.f32 %v2859_v61  ;;  %2889 = vadd.xlane.f32.xlu1 %v2888_v7  ;;  %v1980_v54 = vrot.slane %v1972_v9, %v10105_v45  ;;  %v1987_v63 = vrot.slane %v1973_v60, %v10105_v45 }
 0x50d   :  { %v2891_v2 = vsel %vm2372_vm2, %v10760_v12, 0.0  ;;  %9498 = vpow2.f32 %v2855_v36 }
 0x50e   :  { %v10764_v6 = vpop.eup %9490  ;;  %2892 = vadd.xlane.f32.xlu0 %v2891_v2 }
 0x50f   :  { %v2894_v39 = vsel %vm2372_vm2, %v10764_v6, 0.0 }
 0x510   :  { %v10768_v53 = vpop.eup %9492  ;;  %2895 = vadd.xlane.f32.xlu1 %v2894_v39  ;;  %v1988_v39 = vcombine.low %v1964_v34, %v1980_v54 }
 0x511   :  { %v2897_v18 = vsel %vm2372_vm2, %v10768_v53, 0.0 }
 0x512   :  { %2898 = vadd.xlane.f32.xlu0 %v2897_v18  ;;  %v1996_v36 = vrot.slane %v1988_v39, %v10110_v52 }
 0x514   :  { %v10772_v20 = vpop.eup %9494 }
 0x515   :  { %v2903_v8 = vsel %vm2372_vm2, %v10772_v20, 0.0 }
 0x516   :  { %v10776_v4 = vpop.eup %9496  ;;  %2904 = vadd.xlane.f32.xlu0 %v2903_v8 }
 0x517   :  { %v2906_v17 = vsel %vm2372_vm2, %v10776_v4, 0.0  ;;  %v10783_v30 = vpop.eup %9498 }
 0x518   :  { %v2900_v14 = vsel %vm2372_vm2, %v10783_v30, 0.0 }
 0x51a   :  { %2907 = vadd.xlane.f32.xlu0 %v2906_v17 }
 0x521   :  { %1814 = vrot.lane.b32.xlu1 %v10082_v25, %s9725_s1 }
 0x545   :  { %2901 = vadd.xlane.f32.xlu1 %v2900_v14 }
 0x576   :  { %v2863_v27 = vpop.xlane.xlu0 %2862 }
 0x577   :  { %9500 = vrcp.f32 %v2863_v27 }
 0x578   :  { %v2866_v40 = vpop.xlane.xlu1 %2865 }
 0x579   :  { %9502 = vrcp.f32 %v2866_v40 }
 0x57a   :  { %v2869_v26 = vpop.xlane.xlu0 %2868 }
 0x57b   :  { %9504 = vrcp.f32 %v2869_v26 }
 0x57e   :  { %v2872_v0 = vpop.xlane.xlu1 %2871 }
 0x57f   :  { %9506 = vrcp.f32 %v2872_v0  ;;  %v2024_v0 = vcombine.low %v10082_v25, %v10787_v15 }
 0x581   :  { %v9501_v44 = vpop.eup %9500 }
 0x582   :  { %v2910_v57 = vmul.f32 %v9501_v44, %v10709_v50  ;;  %v2025_v44 = vcombine.high %v10082_v25, %v10787_v15 }
 0x583   :  { %v9503_v56 = vpop.eup %9502 }
 0x584   :  { %v2912_v10 = vmul.f32 %v9503_v56, %v10714_v5  ;;  %v2039_v25 = vrot.slane %v2025_v44, %v10105_v45 }
 0x585   :  { %v2875_v37 = vpop.xlane.xlu0 %2874  ;;  %v9505_v51 = vpop.eup %9504 }
 0x586   :  { %9508 = vrcp.f32 %v2875_v37  ;;  %v2941_v49 = vpack.c.bf16 %v2912_v10, %v2910_v57  ;;  %v2914_v62 = vmul.f32 %v9505_v51, %v10719_v47  ;;  %v1957_v47 = vcombine.high %v10064_v23, %v10379_v22 }
 0x587   :  { %v2878_v38 = vpop.xlane.xlu1 %2877  ;;  %v1989_v23 = vcombine.high %v1964_v34, %v1980_v54  ;;  %v2032_v51 = vrot.slane %v2024_v0, %v10105_v45 }
 0x588   :  { %9510 = vrcp.f32 %v2878_v38  ;;  %9049 = vmatmul.mubr.msk.bf16.vlgmr.msra.gmra.mrb[24].mxu1 %vm2372_vm2, %v2941_v49 }
 0x589   :  { %v2881_v11 = vpop.xlane.xlu0 %2880  ;;  %v9507_v21 = vpop.eup %9506  ;;  %9059 = vmatpush3.bf16.msra.mxu1 %v10631_v46  ;;  %9060 = vmatprep.mubr.msk.bf16.mxu1 %vm9727_vm1, %v12238_v3  ;;  %v2003_v14 = vrot.slane %v1989_v23, %v10110_v52 }
 0x58a   :  { %v2916_v50 = vmul.f32 %v9507_v21, %v10725_v24  ;;  %9070 = vmatprep.subr.bf16.mxu1 %v12238_v3  ;;  %9512 = vrcp.f32 %v2881_v11 }
 0x58b   :  { %v8626_v56 = vcombine.high %v1996_v36, %v2003_v14 }
 0x58c   :  { %v2942_v55 = vpack.c.bf16 %v2916_v50, %v2914_v62 }
 0x58d   :  { %v2884_v5 = vpop.xlane.xlu0 %2883  ;;  %v2243_v50 = vrot.slane %v8626_v56, %v10105_v45 }
 0x58e   :  { %9514 = vrcp.f32 %v2884_v5  ;;  %9055 = vmatmul.mubr.msk.bf16.vlgmr.msra.gmra.mrb[28].mxu0 %vm2372_vm2, %v2942_v55 }
 0x58f   :  { %9065 = vmatpush3.bf16.msra.mxu0 %v10633_v35  ;;  %9066 = vmatprep.mubr.msk.bf16.mxu0 %vm9727_vm1, %v12238_v3  ;;  %v1971_v35 = vrot.slane %v1957_v47, %v10105_v45 }
 0x590   :  { %v9509_v46 = vpop.eup %9508  ;;  %9076 = vmatprep.subr.bf16.mxu0 %v12238_v3 }
 0x591   :  { %v2918_v24 = vmul.f32 %v9509_v46, %v10729_v33  ;;  %v2004_v22 = vcombine.low %v1971_v35, %v1987_v63  ;;  %v2005_v33 = vcombine.high %v1971_v35, %v1987_v63 }
 0x592   :  { %v9511_v48 = vpop.eup %9510 }
 0x593   :  { %v2920_v42 = vmul.f32 %v9511_v48, %v10733_v19  ;;  %v2012_v16 = vrot.slane %v2004_v22, %v10110_v52  ;;  %v2019_v27 = vrot.slane %v2005_v33, %v10110_v52 }
 0x594   :  { %v9513_v2 = vpop.eup %9512 }
 0x595   :  { %v2943_v7 = vpack.c.bf16 %v2920_v42, %v2918_v24  ;;  %v2922_v19 = vmul.f32 %v9513_v2, %v10738_v59  ;;  %v2244_v57 = vcombine.low %v2012_v16, %v2019_v27  ;;  %v8627_v10 = vcombine.high %v2012_v16, %v2019_v27 }
 0x597   :  { %v2887_v61 = vpop.xlane.xlu0 %2886  ;;  %9061 = vmatmul.mubr.msk.bf16.vlgmr.msra.gmra.mrb[28].mxu1 %vm2372_vm2, %v2943_v7  ;;  %v2251_v5 = vrot.slane %v2244_v57, %v10105_v45  ;;  %v2259_v55 = vrot.slane %v8627_v10, %v10105_v45 }
 0x598   :  { %v9515_v8 = vpop.eup %9514  ;;  %9072 = vmatprep.mubr.msk.bf16.mxu1 %vm9727_vm1, %v12238_v3  ;;  %9516 = vrcp.f32 %v2887_v61 }
 0x599   :  { %v2890_v18 = vpop.xlane.xlu1 %2889  ;;  %v2924_v17 = vmul.f32 %v9515_v8, %v10743_v43  ;;  %v2228_v43 = vcombine.low %v1996_v36, %v2003_v14  ;;  %v2276_v63 = vcombine.low %v2251_v5, %v2259_v55 }
 0x59a   :  { %9518 = vrcp.f32 %v2890_v18 }
 0x59b   :  { %v2893_v29 = vpop.xlane.xlu0 %2892  ;;  %v2944_v26 = vpack.c.bf16 %v2924_v17, %v2922_v19  ;;  %v2235_v15 = vrot.slane %v2228_v43, %v10105_v45  ;;  %v2284_v19 = vrot.slane %v2276_v63, %v10110_v52  ;;  %v2277_v17 = vcombine.high %v2251_v5, %v2259_v55 }
 0x59c   :  { %9520 = vrcp.f32 %v2893_v29 }
 0x59d   :  { %v2896_v40 = vpop.xlane.xlu1 %2895  ;;  %9067 = vmatmul.mubr.msk.bf16.vlgmr.msra.gmra.mrb[32].mxu0 %vm2372_vm2, %v2944_v26  ;;  %v2260_v54 = vcombine.low %v2235_v15, %v2243_v50  ;;  %v2261_v2 = vcombine.high %v2235_v15, %v2243_v50  ;;  %v2291_v10 = vrot.slane %v2277_v17, %v10110_v52 }
 0x59e   :  { %9078 = vmatprep.mubr.msk.bf16.mxu0 %vm9727_vm1, %v12238_v3  ;;  %9522 = vrcp.f32 %v2896_v40 }
 0x59f   :  { %v10828_v59 = vpop.xlane.xlu0 %2898  ;;  %v2268_v8 = vrot.slane %v2260_v54, %v10110_v52  ;;  %v2275_v57 = vrot.slane %v2261_v2, %v10110_v52 }
 0x5a1   :  { %v1815_v37 = vpop.permute.xlu1 %1814 }
 0x5a2   :  { %v2040_v38 = vcombine.low %v10436_v1, %v1815_v37  ;;  %v2041_v49 = vcombine.high %v10436_v1, %v1815_v37  ;;  %v9517_v18 = vpop.eup %9516  ;;  %v2292_v37 = vcombine.low %v2268_v8, %v2284_v19 }
 0x5a3   :  { %v2905_v62 = vpop.xlane.xlu0 %2904 }
 0x5a4   :  { %v2048_v11 = vrot.slane %v2040_v38, %v10105_v45  ;;  %v2055_v21 = vrot.slane %v2041_v49, %v10105_v45  ;;  %v9519_v29 = vpop.eup %9518  ;;  %v2293_v49 = vcombine.high %v2268_v8, %v2284_v19 }
 0x5a5   :  { %v2928_v5 = vmul.f32 %v9519_v29, %v10756_v32 }
 0x5a6   :  { %v2056_v1 = vcombine.low %v2032_v51, %v2048_v11  ;;  %v2057_v9 = vcombine.high %v2032_v51, %v2048_v11  ;;  %v2072_v60 = vcombine.low %v2039_v25, %v2055_v21  ;;  %v2073_v46 = vcombine.high %v2039_v25, %v2055_v21  ;;  %v9521_v40 = vpop.eup %9520 }
 0x5a7   :  { %v2908_v7 = vpop.xlane.xlu0 %2907  ;;  %v2926_v25 = vmul.f32 %v9517_v18, %v10751_v58  ;;  %v2930_v15 = vmul.f32 %v9521_v40, %v10760_v12 }
 0x5a8   :  { %v2064_v13 = vrot.slane %v2056_v1, %v10110_v52  ;;  %v2071_v47 = vrot.slane %v2057_v9, %v10110_v52  ;;  %v2080_v24 = vrot.slane %v2072_v60, %v10110_v52  ;;  %v2087_v48 = vrot.slane %v2073_v46, %v10110_v52  ;;  %v9523_v56 = vpop.eup %9522 }
 0x5a9   :  { %9524 = vrcp.f32 %v2908_v7  ;;  %v2932_v55 = vmul.f32 %v9523_v56, %v10764_v6  ;;  %v2294_v1 = vcombine.low %v2275_v57, %v2291_v10  ;;  %v2295_v9 = vcombine.high %v2275_v57, %v2291_v10 }
 0x5aa   :  { %v2296_v42 = vcombine.low %v2064_v13, %v2071_v47  ;;  %v8628_v34 = vcombine.high %v2064_v13, %v2071_v47  ;;  %v2312_v35 = vcombine.low %v2080_v24, %v2087_v48  ;;  %v8629_v61 = vcombine.high %v2080_v24, %v2087_v48 }
 0x5ab   :  { %9526 = vrcp.f32 %v2905_v62  ;;  %v2945_v46 = vpack.c.bf16 %v2928_v5, %v2926_v25  ;;  %v2946_v13 = vpack.c.bf16 %v2932_v55, %v2930_v15 }
 0x5ac   :  { %v2303_v39 = vrot.slane %v2296_v42, %v10105_v45  ;;  %v2311_v23 = vrot.slane %v8628_v34, %v10105_v45  ;;  %v2319_v22 = vrot.slane %v2312_v35, %v10105_v45  ;;  %v2327_v33 = vrot.slane %v8629_v61, %v10105_v45 }
 0x5ad   :  { %9528 = vrcp.f32 %v10828_v59 }
 0x5ae   :  { %v2328_v36 = vcombine.low %v2303_v39, %v2311_v23  ;;  %v2344_v14 = vcombine.low %v2319_v22, %v2327_v33  ;;  %v2329_v16 = vcombine.high %v2303_v39, %v2311_v23  ;;  %v2345_v27 = vcombine.high %v2319_v22, %v2327_v33 }
 0x5b0   :  { %v2336_v26 = vrot.slane %v2328_v36, %v10110_v52  ;;  %v2352_v0 = vrot.slane %v2344_v14, %v10110_v52  ;;  %v2343_v44 = vrot.slane %v2329_v16, %v10110_v52  ;;  %v2359_v43 = vrot.slane %v2345_v27, %v10110_v52 }
 0x5b2   :  { %v2360_v38 = vcombine.low %v2336_v26, %v2352_v0  ;;  %v2361_v51 = vcombine.high %v2336_v26, %v2352_v0  ;;  %v2362_v62 = vcombine.low %v2343_v44, %v2359_v43  ;;  %v2363_v50 = vcombine.high %v2343_v44, %v2359_v43 }
 0x5b3   :  { %v9525_v60 = vpop.eup %9524 }
 0x5b4   :  { %v2368_v11 = vpack.c.bf16 %v2360_v38, %v2292_v37  ;;  %v2369_v21 = vpack.c.bf16 %v2361_v51, %v2293_v49  ;;  %v2370_v58 = vpack.c.bf16 %v2362_v62, %v2294_v1  ;;  %v2371_v12 = vpack.c.bf16 %v2363_v50, %v2295_v9 }
 0x5b5   :  { %v9527_v47 = vpop.eup %9526  ;;  %v2940_v32 = vmul.f32 %v9525_v60, %v10776_v4 }
 0x5b6   :  { %9071 = vmatpush3.bf16.msra.mxu1 %v2368_v11  ;;  %9077 = vmatpush3.bf16.msra.mxu0 %v2369_v21  ;;  %v2938_v6 = vmul.f32 %v9527_v47, %v10772_v20 }
 0x5b7   :  { %9082 = vmatprep.subr.bf16.mxu1 %v12238_v3  ;;  %9088 = vmatprep.subr.bf16.mxu0 %v12238_v3  ;;  %v9529_v54 = vpop.eup %9528 }
 0x5b8   :  { %v2948_v24 = vpack.c.bf16 %v2940_v32, %v2938_v6  ;;  %v2934_v42 = vmul.f32 %v9529_v54, %v10768_v53 }
 0x5b9   :  { %9073 = vmatmul.mubr.msk.bf16.vlgmr.msra.gmra.mrb[32].mxu1 %vm2372_vm2, %v2945_v46  ;;  %9079 = vmatmul.mubr.msk.bf16.vlgmr.msra.gmra.mrb[36].mxu0 %vm2372_vm2, %v2946_v13 }
 0x5ba   :  { %9083 = vmatpush3.bf16.msra.mxu1 %v2370_v58  ;;  %9089 = vmatpush3.bf16.msra.mxu0 %v2371_v12 }
 0x5bb   :  { %9090 = vmatprep.mubr.msk.bf16.mxu0 %vm9727_vm1, %v12238_v3  ;;  %9084 = vmatprep.mubr.msk.bf16.mxu1 %vm9727_vm1, %v12238_v3 }
 0x5c1   :  { %9091 = vmatmul.mubr.msk.bf16.vlgmr.msra.gmra.mrb[40].mxu0 %vm2372_vm2, %v2948_v24 }
 0x5d2   :  { %v2902_v48 = vpop.xlane.xlu1 %2901 }
 0x5d3   :  { %9530 = vrcp.f32 %v2902_v48 }
 0x5dd   :  { %v9531_v63 = vpop.eup %9530 }
 0x5de   :  { %v2936_v4 = vmul.f32 %v9531_v63, %v10783_v30 }
 0x5e0   :  { %v2947_v34 = vpack.c.bf16 %v2936_v4, %v2934_v42 }
 0x5e2   :  { %9085 = vmatmul.mubr.msk.bf16.vlgmr.msra.gmra.mrb[36].mxu1 %vm2372_vm2, %v2947_v34 }
 0x65b   :  { %v2986_v35 = vpop.f32.mrb[24].mxu1 }
 0x65c   :  { %v9050_v61 = vpop.f32.mrb[25].mxu1 }
 0x65d   :  { %v2989_v7 = vpop.f32.mrb[26].mxu1 }
 0x65e   :  { %v9051_v20 = vpop.f32.mrb[27].mxu1 }
 0x661   :  { %v3030_v2 = vpop.f32.mrb[28].mxu0 }
 0x662   :  { %v9056_v39 = vpop.f32.mrb[29].mxu0 }
 0x663   :  { %v3033_v23 = vpop.f32.mrb[30].mxu0 }
 0x664   :  { %v9057_v22 = vpop.f32.mrb[31].mxu0 }
 0x66a   :  { %v3074_v59 = vpop.f32.mrb[28].mxu1 }
 0x66b   :  { %v3301_v33 = vcombine.low %v2986_v35, %v3074_v59  ;;  %v3302_v18 = vcombine.high %v2986_v35, %v3074_v59  ;;  %v9062_v8 = vpop.f32.mrb[29].mxu1 }
 0x66c   :  { %v3077_v19 = vpop.f32.mrb[30].mxu1 }
 0x66d   :  { %v3369_v17 = vcombine.low %v2989_v7, %v3077_v19  ;;  %v3370_v53 = vcombine.high %v2989_v7, %v3077_v19  ;;  %v9063_v29 = vpop.f32.mrb[31].mxu1  ;;  %v3309_v27 = vrot.slane %v3301_v33, %v10105_v45  ;;  %v3316_v40 = vrot.slane %v3302_v18, %v10105_v45 }
 0x66f   :  { %v3377_v51 = vrot.slane %v3369_v17, %v10105_v45  ;;  %v3384_v25 = vrot.slane %v3370_v53, %v10105_v45 }
 0x670   :  { %v3118_v30 = vpop.f32.mrb[32].mxu0 }
 0x671   :  { %v3317_v36 = vcombine.low %v3030_v2, %v3118_v30  ;;  %v3318_v14 = vcombine.high %v3030_v2, %v3118_v30  ;;  %v9068_v16 = vpop.f32.mrb[33].mxu0 }
 0x672   :  { %v3121_v26 = vpop.f32.mrb[34].mxu0 }
 0x673   :  { %v3325_v0 = vrot.slane %v3317_v36, %v10105_v45  ;;  %v3332_v44 = vrot.slane %v3318_v14, %v10105_v45  ;;  %v3385_v43 = vcombine.low %v3033_v23, %v3121_v26  ;;  %v3386_v56 = vcombine.high %v3033_v23, %v3121_v26  ;;  %v9069_v57 = vpop.f32.mrb[35].mxu0 }
 0x675   :  { %v3333_v10 = vcombine.low %v3309_v27, %v3325_v0  ;;  %v3334_v37 = vcombine.high %v3309_v27, %v3325_v0  ;;  %v3349_v38 = vcombine.low %v3316_v40, %v3332_v44  ;;  %v3350_v49 = vcombine.high %v3316_v40, %v3332_v44 }
 0x676   :  { %v3393_v15 = vrot.slane %v3385_v43, %v10105_v45  ;;  %v3400_v11 = vrot.slane %v3386_v56, %v10105_v45 }
 0x677   :  { %v3341_v21 = vrot.slane %v3333_v10, %v10110_v52  ;;  %v3348_v62 = vrot.slane %v3334_v37, %v10110_v52  ;;  %v3357_v50 = vrot.slane %v3349_v38, %v10110_v52  ;;  %v3364_v5 = vrot.slane %v3350_v49, %v10110_v52  ;;  %v9416_v38 = vld [vmem:[#allocation2] sm:$0xff]  }
 0x678   :  { %v3401_v55 = vcombine.low %v3377_v51, %v3393_v15  ;;  %v3402_v1 = vcombine.high %v3377_v51, %v3393_v15  ;;  %v3417_v9 = vcombine.low %v3384_v25, %v3400_v11  ;;  %v3418_v60 = vcombine.high %v3384_v25, %v3400_v11  ;;  %9094 = vmatprep.subr.bf16.mxu1 %v9416_v38 }
 0x679   :  { %v3573_v46 = vcombine.low %v3341_v21, %v3348_v62  ;;  %v8646_v13 = vcombine.high %v3341_v21, %v3348_v62  ;;  %v3589_v58 = vcombine.low %v3357_v50, %v3364_v5  ;;  %v8647_v12 = vcombine.high %v3357_v50, %v3364_v5  ;;  %9095 = vmatpush3.bf16.msra.mxu1 %v9416_v38 }
 0x67a   :  { %v3409_v47 = vrot.slane %v3401_v55, %v10110_v52  ;;  %v3416_v32 = vrot.slane %v3402_v1, %v10110_v52  ;;  %v3425_v6 = vrot.slane %v3417_v9, %v10110_v52  ;;  %v3432_v24 = vrot.slane %v3418_v60, %v10110_v52 }
 0x67b   :  { %v3580_v48 = vrot.slane %v3573_v46, %v10105_v45  ;;  %v3588_v54 = vrot.slane %v8646_v13, %v10105_v45  ;;  %v3596_v63 = vrot.slane %v3589_v58, %v10105_v45  ;;  %v3604_v42 = vrot.slane %v8647_v12, %v10105_v45 }
 0x67c   :  { %v3641_v4 = vcombine.low %v3409_v47, %v3416_v32  ;;  %v8648_v34 = vcombine.high %v3409_v47, %v3416_v32  ;;  %v3657_v35 = vcombine.low %v3425_v6, %v3432_v24  ;;  %v8649_v61 = vcombine.high %v3425_v6, %v3432_v24 }
 0x67d   :  { %v3606_v7 = vcombine.high %v3580_v48, %v3588_v54  ;;  %v3622_v20 = vcombine.high %v3596_v63, %v3604_v42  ;;  %v3605_v2 = vcombine.low %v3580_v48, %v3588_v54  ;;  %v3621_v39 = vcombine.low %v3596_v63, %v3604_v42 }
 0x67e   :  { %v3648_v23 = vrot.slane %v3641_v4, %v10105_v45  ;;  %v3656_v22 = vrot.slane %v8648_v34, %v10105_v45  ;;  %v3664_v59 = vrot.slane %v3657_v35, %v10105_v45  ;;  %v3672_v33 = vrot.slane %v8649_v61, %v10105_v45 }
 0x67f   :  { %v3620_v18 = vrot.slane %v3606_v7, %v10110_v52  ;;  %v3636_v8 = vrot.slane %v3622_v20, %v10110_v52  ;;  %v10905_v19 = vrot.slane %v3605_v2, %v10110_v52  ;;  %v10908_v17 = vrot.slane %v3621_v39, %v10110_v52 }
 0x680   :  { %v3674_v53 = vcombine.high %v3648_v23, %v3656_v22  ;;  %v3690_v29 = vcombine.high %v3664_v59, %v3672_v33  ;;  %v3673_v30 = vcombine.low %v3648_v23, %v3656_v22  ;;  %v3689_v36 = vcombine.low %v3664_v59, %v3672_v33 }
 0x681   :  { %v3639_v14 = vcombine.low %v3620_v18, %v3636_v8  ;;  %v3637_v16 = vcombine.low %v10905_v19, %v10908_v17  ;;  %v3638_v27 = vcombine.high %v10905_v19, %v10908_v17  ;;  %v3640_v40 = vcombine.high %v3620_v18, %v3636_v8 }
 0x682   :  { %v3688_v26 = vrot.slane %v3674_v53, %v10110_v52  ;;  %v3704_v0 = vrot.slane %v3690_v29, %v10110_v52  ;;  %v10917_v44 = vrot.slane %v3673_v30, %v10110_v52  ;;  %v10920_v43 = vrot.slane %v3689_v36, %v10110_v52 }
 0x684   :  { %v3707_v56 = vcombine.low %v3688_v26, %v3704_v0  ;;  %v3706_v57 = vcombine.high %v10917_v44, %v10920_v43  ;;  %v3705_v10 = vcombine.low %v10917_v44, %v10920_v43  ;;  %v3708_v37 = vcombine.high %v3688_v26, %v3704_v0 }
 0x686   :  { %v9337_v49 = vpack.i.bf16 %v3707_v56, %v3639_v14  ;;  %v9332_v51 = vpack.i.bf16 %v3706_v57, %v3638_v27  ;;  %v9342_v25 = vpack.i.bf16 %v3708_v37, %v3640_v40 }
 0x688   :  { %9338 = vrot.lane.b32.xlu1 %v9337_v49, %s9730_s16  ;;  %9333 = vrot.lane.b32.xlu0 %v9332_v51, %s9731_s17 }
 0x68c   :  { %v3162_v15 = vpop.f32.mrb[32].mxu1  ;;  %v3206_v11 = vpop.f32.mrb[36].mxu0  ;;  %9343 = vrot.lane.b32.xlu0 %v9342_v25, %s9732_s20 }
 0x68d   :  { %v9074_v21 = vpop.f32.mrb[33].mxu1  ;;  %v9080_v62 = vpop.f32.mrb[37].mxu0 }
 0x68e   :  { %v3165_v50 = vpop.f32.mrb[34].mxu1  ;;  %v3209_v5 = vpop.f32.mrb[38].mxu0 }
 0x68f   :  { %v9075_v55 = vpop.f32.mrb[35].mxu1  ;;  %v9081_v1 = vpop.f32.mrb[39].mxu0 }
 0x694   :  { %v3294_v9 = vpop.f32.mrb[40].mxu0 }
 0x695   :  { %v3453_v60 = vcombine.low %v3206_v11, %v3294_v9  ;;  %v3454_v46 = vcombine.high %v3206_v11, %v3294_v9  ;;  %v9092_v13 = vpop.f32.mrb[41].mxu0 }
 0x696   :  { %v3297_v58 = vpop.f32.mrb[42].mxu0 }
 0x697   :  { %v3521_v12 = vcombine.low %v3209_v5, %v3297_v58  ;;  %v3522_v47 = vcombine.high %v3209_v5, %v3297_v58  ;;  %v9093_v32 = vpop.f32.mrb[43].mxu0  ;;  %v3461_v63 = vrot.slane %v3453_v60, %v10105_v45  ;;  %v3468_v42 = vrot.slane %v3454_v46, %v10105_v45  ;;  %v9417_v58 = vld [vmem:[#allocation2 + $0x8] sm:$0xff]  }
 0x698   :  { %9096 = vmatprep.subr.bf16.mxu1 %v9417_v58 }
 0x699   :  { %v3529_v59 = vrot.slane %v3521_v12, %v10105_v45  ;;  %v3536_v33 = vrot.slane %v3522_v47, %v10105_v45  ;;  %9097 = vmatpush3.bf16.msra.mxu1 %v9417_v58 }
 0x6b5   :  { %v3250_v6 = vpop.f32.mrb[36].mxu1 }
 0x6b6   :  { %v3437_v24 = vcombine.low %v3162_v15, %v3250_v6  ;;  %v3438_v48 = vcombine.high %v3162_v15, %v3250_v6  ;;  %v9086_v54 = vpop.f32.mrb[37].mxu1 }
 0x6b7   :  { %v3253_v4 = vpop.f32.mrb[38].mxu1 }
 0x6b8   :  { %v3445_v34 = vrot.slane %v3437_v24, %v10105_v45  ;;  %v3452_v35 = vrot.slane %v3438_v48, %v10105_v45  ;;  %v3505_v61 = vcombine.low %v3165_v50, %v3253_v4  ;;  %v3506_v7 = vcombine.high %v3165_v50, %v3253_v4  ;;  %v9087_v20 = vpop.f32.mrb[39].mxu1 }
 0x6ba   :  { %v3469_v2 = vcombine.low %v3445_v34, %v3461_v63  ;;  %v3470_v39 = vcombine.high %v3445_v34, %v3461_v63  ;;  %v3485_v23 = vcombine.low %v3452_v35, %v3468_v42  ;;  %v3486_v22 = vcombine.high %v3452_v35, %v3468_v42 }
 0x6bb   :  { %v3513_v18 = vrot.slane %v3505_v61, %v10105_v45  ;;  %v3520_v8 = vrot.slane %v3506_v7, %v10105_v45 }
 0x6bc   :  { %v3477_v53 = vrot.slane %v3469_v2, %v10110_v52  ;;  %v3484_v29 = vrot.slane %v3470_v39, %v10110_v52  ;;  %v3493_v30 = vrot.slane %v3485_v23, %v10110_v52  ;;  %v3500_v36 = vrot.slane %v3486_v22, %v10110_v52  ;;  %v9418_v39 = vld [vmem:[#allocation2 + $0x10] sm:$0xff]  }
 0x6bd   :  { %v3537_v14 = vcombine.low %v3513_v18, %v3529_v59  ;;  %v3538_v27 = vcombine.high %v3513_v18, %v3529_v59  ;;  %v3553_v40 = vcombine.low %v3520_v8, %v3536_v33  ;;  %v3554_v26 = vcombine.high %v3520_v8, %v3536_v33  ;;  %9098 = vmatprep.subr.bf16.mxu1 %v9418_v39 }
 0x6be   :  { %v3709_v0 = vcombine.low %v3477_v53, %v3484_v29  ;;  %v8650_v56 = vcombine.high %v3477_v53, %v3484_v29  ;;  %v3725_v57 = vcombine.low %v3493_v30, %v3500_v36  ;;  %v8651_v37 = vcombine.high %v3493_v30, %v3500_v36  ;;  %9099 = vmatpush3.bf16.msra.mxu1 %v9418_v39  ;;  %v12257_v39 = vld [vmem:[#allocation11_spill] sm:$0xff] }
 0x6bf   :  { %v3545_v38 = vrot.slane %v3537_v14, %v10110_v52  ;;  %v3552_v49 = vrot.slane %v3538_v27, %v10110_v52  ;;  %v3561_v51 = vrot.slane %v3553_v40, %v10110_v52  ;;  %v3568_v25 = vrot.slane %v3554_v26, %v10110_v52  ;;  %v9419_v27 = vld [vmem:[#allocation2 + $0x18] sm:$0xff]  }
 0x6c0   :  { %v3716_v15 = vrot.slane %v3709_v0, %v10105_v45  ;;  %v3724_v11 = vrot.slane %v8650_v56, %v10105_v45  ;;  %v3732_v21 = vrot.slane %v3725_v57, %v10105_v45  ;;  %v3740_v62 = vrot.slane %v8651_v37, %v10105_v45  ;;  %9100 = vmatprep.subr.bf16.mxu1 %v9419_v27 }
 0x6c1   :  { %v3777_v50 = vcombine.low %v3545_v38, %v3552_v49  ;;  %v8652_v5 = vcombine.high %v3545_v38, %v3552_v49  ;;  %v3793_v55 = vcombine.low %v3561_v51, %v3568_v25  ;;  %v8653_v1 = vcombine.high %v3561_v51, %v3568_v25 }
 0x6c2   :  { %v3741_v9 = vcombine.low %v3716_v15, %v3724_v11  ;;  %v3757_v60 = vcombine.low %v3732_v21, %v3740_v62  ;;  %v3742_v46 = vcombine.high %v3716_v15, %v3724_v11  ;;  %v3758_v13 = vcombine.high %v3732_v21, %v3740_v62  ;;  %9101 = vmatpush3.bf16.msra.mxu1 %v9419_v27  ;;  %v9422_v27 = vld [vmem:[#allocation5 + $0x10] sm:$0xff]  }
 0x6c3   :  { %v3784_v12 = vrot.slane %v3777_v50, %v10105_v45  ;;  %v3792_v47 = vrot.slane %v8652_v5, %v10105_v45  ;;  %v3800_v32 = vrot.slane %v3793_v55, %v10105_v45  ;;  %v3808_v6 = vrot.slane %v8653_v1, %v10105_v45 }
 0x6c4   :  { %v3749_v24 = vrot.slane %v3741_v9, %v10110_v52  ;;  %v3765_v48 = vrot.slane %v3757_v60, %v10110_v52  ;;  %v3756_v54 = vrot.slane %v3742_v46, %v10110_v52  ;;  %v3772_v63 = vrot.slane %v3758_v13, %v10110_v52 }
 0x6c5   :  { %v3809_v42 = vcombine.low %v3784_v12, %v3792_v47  ;;  %v3825_v4 = vcombine.low %v3800_v32, %v3808_v6  ;;  %v3810_v34 = vcombine.high %v3784_v12, %v3792_v47  ;;  %v3826_v35 = vcombine.high %v3800_v32, %v3808_v6  ;;  %v8654_v6 = vld [vmem:[%s12220_s7] ss:$0 sm:$0xff] }
 0x6c6   :  { %v3773_v61 = vcombine.low %v3749_v24, %v3765_v48  ;;  %v3774_v7 = vcombine.high %v3749_v24, %v3765_v48  ;;  %v3775_v20 = vcombine.low %v3756_v54, %v3772_v63  ;;  %v3776_v2 = vcombine.high %v3756_v54, %v3772_v63 }
 0x6c7   :  { %v3817_v23 = vrot.slane %v3809_v42, %v10110_v52  ;;  %v3833_v22 = vrot.slane %v3825_v4, %v10110_v52  ;;  %v3824_v59 = vrot.slane %v3810_v34, %v10110_v52  ;;  %v3840_v33 = vrot.slane %v3826_v35, %v10110_v52 }
 0x6c9   :  { %v3842_v18 = vcombine.high %v3817_v23, %v3833_v22  ;;  %v3841_v8 = vcombine.low %v3817_v23, %v3833_v22  ;;  %v3843_v53 = vcombine.low %v3824_v59, %v3840_v33  ;;  %v3844_v29 = vcombine.high %v3824_v59, %v3840_v33 }
 0x6cb   :  { %v9347_v30 = vpack.i.bf16 %v3842_v18, %v3774_v7  ;;  %v9352_v36 = vpack.i.bf16 %v3843_v53, %v3775_v20  ;;  %v9357_v14 = vpack.i.bf16 %v3844_v29, %v3776_v2 }
 0x6cd   :  { %9348 = vrot.lane.b32.xlu1 %v9347_v30, %s9731_s17 }
 0x6d1   :  { %9353 = vrot.lane.b32.xlu1 %v9352_v36, %s9730_s16  ;;  %v9420_v36 = vld [vmem:[#allocation5] sm:$0xff]  }
 0x6d2   :  { %9106 = vmatprep.subr.bf16.mxu0 %v9420_v36 }
 0x6d3   :  { %9107 = vmatpush3.bf16.msra.mxu0 %v9420_v36 }
 0x6d5   :  { %9358 = vrot.lane.b32.xlu1 %v9357_v14, %s9732_s20  ;;  %v9421_v14 = vld [vmem:[#allocation5 + $0x8] sm:$0xff]  }
 0x6d6   :  { %9108 = vmatprep.subr.bf16.mxu0 %v9421_v14 }
 0x6d7   :  { %9109 = vmatpush3.bf16.msra.mxu0 %v9421_v14 }
 0x6d8   :  { %9110 = vmatprep.subr.bf16.mxu0 %v9422_v27 }
 0x6db   :  { %9111 = vmatpush3.bf16.msra.mxu0 %v9422_v27 }
 0x6fa   :  { %v9339_v40 = vpop.permute.xlu1 %9338  ;;  %v9334_v26 = vpop.permute.xlu0 %9333 }
 0x6fb   :  { %v9336_v0 = vunpack.i.h.bf16 %v9334_v26  ;;  %v9335_v56 = vunpack.i.l.bf16 %v9334_v26  ;;  %v9341_v57 = vunpack.i.h.bf16 %v9339_v40  ;;  %v9340_v37 = vunpack.i.l.bf16 %v9339_v40  ;;  %v9423_v40 = vld [vmem:[#allocation5 + $0x18] sm:$0xff]  }
 0x6fc   :  { %9112 = vmatprep.subr.bf16.mxu0 %v9423_v40 }
 0x6fd   :  { %v3894_v38 = vsel %vm2372_vm2, %v3705_v10, %v9336_v0  ;;  %v3893_v49 = vsel %vm2372_vm2, %v3637_v16, %v9335_v56  ;;  %9113 = vmatpush3.bf16.msra.mxu0 %v9423_v40  ;;  %v9424_v40 = vld [vmem:[%s12223_s10] sm:$0xff]  }
 0x6fe   :  { %v9344_v51 = vpop.permute.xlu0 %9343  ;;  %v3898_v11 = vsel %vm3897_vm3, %v3893_v49, %v9340_v37  ;;  %v3899_v21 = vsel %vm3897_vm3, %v3894_v38, %v9341_v57  ;;  %9118 = vmatprep.subr.bf16.mxu1 %v9424_v40 }
 0x6ff   :  { %v9346_v25 = vunpack.i.h.bf16 %v9344_v51  ;;  %v9345_v15 = vunpack.i.l.bf16 %v9344_v51 }
 0x701   :  { %v3903_v62 = vsel %vm3902_vm4, %v3898_v11, %v9345_v15  ;;  %v3904_v44 = vsel %vm3902_vm4, %v3899_v21, %v9346_v25 }
 0x702   :  { %v3915_v43 = vpack.c.bf16 %v3904_v44, %v3903_v62 }
 0x704   :  { %9102 = vmatprep.mubr.msk.bf16.mxu1 %vm186_vm0, %v3915_v43 }
 0x73f   :  { %v9349_v10 = vpop.permute.xlu1 %9348 }
 0x740   :  { %v9351_v17 = vunpack.i.h.bf16 %v9349_v10  ;;  %v9350_v16 = vunpack.i.l.bf16 %v9349_v10 }
 0x742   :  { %v3895_v1 = vsel %vm2372_vm2, %v3773_v61, %v9350_v16  ;;  %v3896_v9 = vsel %vm2372_vm2, %v3841_v8, %v9351_v17 }
 0x743   :  { %v9354_v19 = vpop.permute.xlu1 %9353 }
 0x744   :  { %v9356_v50 = vunpack.i.h.bf16 %v9354_v19  ;;  %v9355_v5 = vunpack.i.l.bf16 %v9354_v19 }
 0x746   :  { %v3900_v13 = vsel %vm3897_vm3, %v3895_v1, %v9355_v5  ;;  %v3901_v58 = vsel %vm3897_vm3, %v3896_v9, %v9356_v50 }
 0x747   :  { %v9359_v55 = vpop.permute.xlu1 %9358 }
 0x748   :  { %v9361_v60 = vunpack.i.h.bf16 %v9359_v55  ;;  %v9360_v46 = vunpack.i.l.bf16 %v9359_v55 }
 0x74a   :  { %v3905_v12 = vsel %vm3902_vm4, %v3900_v13, %v9360_v46  ;;  %v3906_v47 = vsel %vm3902_vm4, %v3901_v58, %v9361_v60 }
 0x74b   :  { %v3916_v32 = vpack.c.bf16 %v3906_v47, %v3905_v12  ;;  %v12258_v12 = vld [vmem:[#allocation12_spill] sm:$0xff] }
 0x74c   :  { %v12235_v47 = vsub.s32 2, %v12258_v12 }
 0x74d   :  { %9103 = vmatmul.mubr.msk.bf16.vlgmr.msra.gmra.mrb[40].mxu1 %vm186_vm0, %v3916_v32 }
 0x74e   :  { %9119 = vmatpush3.bf16.msra.mxu1 %v9424_v40 }
 0x820   :  { %v9104_v24 = vpop.f32.mrb[40].mxu1 }
 0x821   :  { %v3997_v48 = vadd.f32 %v9104_v24, %v8654_v6  ;;  %v3988_v54 = vpop.f32.mrb[41].mxu1 }
 0x822   :  { %v3989_v63 = vadd.f32 %v8654_v6, %v3988_v54  ;;  %v9105_v42 = vpop.f32.mrb[42].mxu1 }
 0x823   :  { %v10988_v4 = vadd.f32 %v3997_v48, %v9917_v41  ;;  %v3991_v34 = vpop.f32.mrb[43].mxu1  ;;  %v4000_v35 = vadd.f32 %v9105_v42, %v8654_v6  ;;  %v9644_v48 = vld [vmem:[%s12216_s3] sm:$0xf] }
 0x824   :  { %v3992_v61 = vadd.f32 %v8654_v6, %v3991_v34  ;;  %v10991_v7 = vadd.f32 %v3989_v63, %v9898_v28  ;;  %v4070_v54 = vrot.slane %v9644_v48, %v12235_v47  ;;  %v12234_v63 = vsub.s32 3, %v12258_v12 }
 0x825   :  { %v4013_v20 = vsel %vm186_vm0, %v10988_v4, 0.0  ;;  %v10999_v23 = vadd.f32 %v4000_v35, %v12257_v39  ;;  %v4025_v29 = vmul.f32 %v10988_v4, %v10988_v4 }
 0x826   :  { %v10996_v2 = vadd.f32 %v3992_v61, %v9900_v31  ;;  %4014 = vadd.xlane.f32.xlu0 %v4013_v20  ;;  %v4007_v28 = vsel %vm186_vm0, %v10991_v7, 0.0  ;;  %v4023_v18 = vmul.f32 %v10991_v7, %v10991_v7 }
 0x827   :  { %v4026_v31 = vmul.f32 %v10999_v23, %v10999_v23  ;;  %v4016_v33 = vsel %vm186_vm0, %v10999_v23, 0.0  ;;  %v4033_v30 = vsel %vm186_vm0, %v4025_v29, 0.0 }
 0x828   :  { %v4010_v41 = vsel %vm186_vm0, %v10996_v2, 0.0  ;;  %v4024_v22 = vmul.f32 %v10996_v2, %v10996_v2  ;;  %v4027_v53 = vsel %vm186_vm0, %v4023_v18, 0.0 }
 0x829   :  { %4011 = vadd.xlane.f32.xlu1 %v4010_v41  ;;  %v4036_v8 = vsel %vm186_vm0, %v4026_v31, 0.0 }
 0x82a   :  { %4008 = vadd.xlane.f32.xlu0 %v4007_v28  ;;  %v4030_v59 = vsel %vm186_vm0, %v4024_v22, 0.0  ;;  %v4078_v22 = vrot.slane %v9644_v48, %v12234_v63 }
 0x82d   :  { %4031 = vadd.xlane.f32.xlu1 %v4030_v59 }
 0x82e   :  { %4017 = vadd.xlane.f32.xlu0 %v4016_v33 }
 0x831   :  { %4037 = vadd.xlane.f32.xlu1 %v4036_v8 }
 0x832   :  { %4028 = vadd.xlane.f32.xlu0 %v4027_v53 }
 0x836   :  { %4034 = vadd.xlane.f32.xlu0 %v4033_v30 }
 0x8b3   :  { %v4015_v26 = vpop.xlane.xlu0 %4014 }
 0x8b4   :  { %v4021_v19 = vmul.f32 0.015625, %v4015_v26  ;;  %v9425_v26 = vld [vmem:[%s12223_s10 + $0x8] sm:$0xff]  }
 0x8b5   :  { %9120 = vmatprep.subr.bf16.mxu1 %v9425_v26 }
 0x8b6   :  { %v4012_v0 = vpop.xlane.xlu1 %4011  ;;  %v4045_v9 = vmul.f32 %v4021_v19, %v4021_v19  ;;  %v4053_v28 = vsub.f32 %v10988_v4, %v4021_v19  ;;  %9121 = vmatpush3.bf16.msra.mxu1 %v9425_v26 }
 0x8b7   :  { %v4020_v56 = vmul.f32 0.015625, %v4012_v0  ;;  %v4009_v57 = vpop.xlane.xlu0 %4008  ;;  %v9426_v0 = vld [vmem:[%s12223_s10 + $0x10] sm:$0xff]  }
 0x8b8   :  { %v4019_v25 = vmul.f32 0.015625, %v4009_v57  ;;  %9122 = vmatprep.subr.bf16.mxu1 %v9426_v0  ;;  %v9428_v57 = vld [vmem:[%s12223_s10 + $0x20] sm:$0xff]  }
 0x8b9   :  { %v4044_v38 = vmul.f32 %v4020_v56, %v4020_v56  ;;  %v4052_v6 = vsub.f32 %v10996_v2, %v4020_v56  ;;  %v9427_v56 = vld [vmem:[%s12223_s10 + $0x18] sm:$0xff]  }
 0x8ba   :  { %v4032_v37 = vpop.xlane.xlu1 %4031  ;;  %v4043_v17 = vmul.f32 %v4019_v25, %v4019_v25  ;;  %v4051_v34 = vsub.f32 %v10991_v7, %v4019_v25  ;;  %9123 = vmatpush3.bf16.msra.mxu1 %v9426_v0  ;;  %v8676_v0 = vld [vmem:[%s12224_s11] ss:$0 sm:$0xff] }
 0x8bb   :  { %v4040_v49 = vmul.f32 0.015625, %v4032_v37  ;;  %v4018_v51 = vpop.xlane.xlu0 %4017  ;;  %9124 = vmatprep.subr.bf16.mxu1 %v9427_v56  ;;  %v9429_v37 = vld [vmem:[%s12223_s10 + $0x28] sm:$0xff]  }
 0x8bc   :  { %v4022_v15 = vmul.f32 0.015625, %v4018_v51  ;;  %v8661_v51 = vld [vmem:[%s12222_s9] ss:$0 sm:$0xff] }
 0x8bd   :  { %v4048_v11 = vsub.f32 %v4040_v49, %v4044_v38  ;;  %v9430_v38 = vld [vmem:[%s12223_s10 + $0x30] sm:$0xff]   ;;  %v9431_v49 = vld [vmem:[%s12223_s10 + $0x38] sm:$0xff]  }
 0x8be   :  { %v4046_v21 = vmul.f32 %v4022_v15, %v4022_v15  ;;  %v4038_v62 = vpop.xlane.xlu1 %4037  ;;  %v4054_v35 = vsub.f32 %v10999_v23, %v4022_v15  ;;  %9125 = vmatpush3.bf16.msra.mxu1 %v9427_v56 }
 0x8bf   :  { %v4056_v44 = vadd.f32 1e-06, %v4048_v11  ;;  %v4042_v43 = vmul.f32 0.015625, %v4038_v62  ;;  %v4029_v10 = vpop.xlane.xlu0 %4028  ;;  %9126 = vmatprep.subr.bf16.mxu1 %v9428_v57 }
 0x8c0   :  { %v4039_v16 = vmul.f32 0.015625, %v4029_v10 }
 0x8c1   :  { %9532 = vrsqrt.f32 %v4056_v44  ;;  %v4050_v50 = vsub.f32 %v4042_v43, %v4046_v21 }
 0x8c2   :  { %v4047_v5 = vsub.f32 %v4039_v16, %v4043_v17  ;;  %9127 = vmatpush3.bf16.msra.mxu1 %v9428_v57 }
 0x8c3   :  { %v4058_v55 = vadd.f32 1e-06, %v4050_v50  ;;  %v4035_v1 = vpop.xlane.xlu0 %4034  ;;  %9128 = vmatprep.subr.bf16.mxu1 %v9429_v37 }
 0x8c4   :  { %v4055_v60 = vadd.f32 1e-06, %v4047_v5  ;;  %v4041_v46 = vmul.f32 0.015625, %v4035_v1 }
 0x8c5   :  { %9534 = vrsqrt.f32 %v4058_v55 }
 0x8c6   :  { %9536 = vrsqrt.f32 %v4055_v60  ;;  %v4049_v13 = vsub.f32 %v4041_v46, %v4045_v9  ;;  %9129 = vmatpush3.bf16.msra.mxu1 %v9429_v37 }
 0x8c7   :  { %9130 = vmatprep.subr.bf16.mxu1 %v9430_v38 }
 0x8c8   :  { %v4057_v58 = vadd.f32 1e-06, %v4049_v13 }
 0x8ca   :  { %9538 = vrsqrt.f32 %v4057_v58  ;;  %9131 = vmatpush3.bf16.msra.mxu1 %v9430_v38 }
 0x8cb   :  { %v9533_v32 = vpop.eup %9532  ;;  %9132 = vmatprep.subr.bf16.mxu1 %v9431_v49 }
 0x8cc   :  { %v4064_v24 = vmul.f32 %v9533_v32, %v4052_v6 }
 0x8ce   :  { %v4072_v41 = vmul.f32 %v4070_v54, %v4064_v24  ;;  %9133 = vmatpush3.bf16.msra.mxu1 %v9431_v49 }
 0x8cf   :  { %v9535_v42 = vpop.eup %9534 }
 0x8d0   :  { %v9537_v61 = vpop.eup %9536  ;;  %v4066_v20 = vmul.f32 %v9535_v42, %v4054_v35  ;;  %v4080_v8 = vadd.f32 %v4078_v22, %v4072_v41 }
 0x8d1   :  { %v4063_v39 = vmul.f32 %v9537_v61, %v4051_v34 }
 0x8d2   :  { %v4074_v53 = vmul.f32 %v4070_v54, %v4066_v20 }
 0x8d3   :  { %v4071_v59 = vmul.f32 %v4070_v54, %v4063_v39 }
 0x8d4   :  { %v9539_v31 = vpop.eup %9538  ;;  %v4082_v14 = vadd.f32 %v4078_v22, %v4074_v53 }
 0x8d5   :  { %v4065_v33 = vmul.f32 %v9539_v31, %v4053_v28  ;;  %v4079_v18 = vadd.f32 %v4078_v22, %v4071_v59 }
 0x8d7   :  { %v4091_v29 = vpack.c.bf16 %v4080_v8, %v4079_v18  ;;  %v4073_v30 = vmul.f32 %v4070_v54, %v4065_v33 }
 0x8d9   :  { %9114 = vmatprep.mubr.msk.bf16.mxu0 %vm186_vm0, %v4091_v29  ;;  %v4081_v36 = vadd.f32 %v4078_v22, %v4073_v30 }
 0x8db   :  { %v4092_v27 = vpack.c.bf16 %v4082_v14, %v4081_v36 }
 0x8dd   :  { %9115 = vmatmul.mubr.msk.bf16.vlgmr.msra.gmra.mrb[44].mxu0 %vm186_vm0, %v4092_v27 }
 0x9b0   :  { %v9116_v25 = vpop.f32.mrb[44].mxu0 }
 0x9b1   :  { %v4173_v15 = vadd.f32 %v9116_v25, %v8661_v51  ;;  %v4164_v11 = vpop.f32.mrb[45].mxu0 }
 0x9b2   :  { %v4165_v21 = vadd.f32 %v8661_v51, %v4164_v11  ;;  %v9117_v62 = vpop.f32.mrb[46].mxu0 }
 0x9b3   :  { %v4185_v44 = vmul.f32 0.044715, %v4173_v15  ;;  %v4176_v43 = vadd.f32 %v9117_v62, %v8661_v51  ;;  %v4167_v10 = vpop.f32.mrb[47].mxu0  ;;  %v4181_v59 = vmul.f32 0.5, %v4173_v15 }
 0x9b4   :  { %v4183_v19 = vmul.f32 0.044715, %v4165_v21  ;;  %v4168_v17 = vadd.f32 %v8661_v51, %v4167_v10  ;;  %v4179_v18 = vmul.f32 0.5, %v4165_v21 }
 0x9b5   :  { %v4189_v16 = vmul.f32 %v4185_v44, %v4173_v15  ;;  %v4186_v50 = vmul.f32 0.044715, %v4176_v43  ;;  %v4182_v31 = vmul.f32 0.5, %v4176_v43 }
 0x9b6   :  { %v4187_v5 = vmul.f32 %v4183_v19, %v4165_v21  ;;  %v4184_v55 = vmul.f32 0.044715, %v4168_v17  ;;  %v4180_v8 = vmul.f32 0.5, %v4168_v17 }
 0x9b7   :  { %v4193_v1 = vmul.f32 %v4189_v16, %v4173_v15  ;;  %v4190_v9 = vmul.f32 %v4186_v50, %v4176_v43 }
 0x9b8   :  { %v4191_v60 = vmul.f32 %v4187_v5, %v4165_v21  ;;  %v4188_v46 = vmul.f32 %v4184_v55, %v4168_v17  ;;  %v9432_v55 = vld [vmem:[%s12217_s4 + $0x60] sm:$0xff]  }
 0x9b9   :  { %v4197_v13 = vadd.f32 %v4193_v1, %v4173_v15  ;;  %v4194_v58 = vmul.f32 %v4190_v9, %v4176_v43  ;;  %v9433_v1 = vld [vmem:[%s12217_s4 + $0xa0] sm:$0xff]   ;;  %v9434_v9 = vld [vmem:[%s12217_s4 + $0x68] sm:$0xff]   ;;  %9138 = vmatprep.subr.bf16.mxu0 %v9432_v55 }
 0x9ba   :  { %v4192_v32 = vmul.f32 %v4188_v46, %v4168_v17  ;;  %v4195_v6 = vadd.f32 %v4191_v60, %v4165_v21  ;;  %v9435_v60 = vld [vmem:[%s12217_s4 + $0xa8] sm:$0xff]   ;;  %9162 = vmatprep.subr.bf16.mxu1 %v9433_v1  ;;  %9139 = vmatpush3.bf16.msra.mxu0 %v9432_v55  ;;  %v9436_v46 = vld [vmem:[%s12217_s4 + $0x70] sm:$0xff]  }
 0x9bb   :  { %v4201_v24 = vmul.f32 0.7978846, %v4197_v13  ;;  %v4198_v48 = vadd.f32 %v4194_v58, %v4176_v43  ;;  %9140 = vmatprep.subr.bf16.mxu0 %v9434_v9  ;;  %v9437_v13 = vld [vmem:[%s12217_s4 + $0xb0] sm:$0xff]   ;;  %v9438_v58 = vld [vmem:[%s12217_s4 + $0x78] sm:$0xff]  }
 0x9bc   :  { %v4196_v54 = vadd.f32 %v4192_v32, %v4168_v17  ;;  %v4199_v42 = vmul.f32 0.7978846, %v4195_v6  ;;  %v9439_v32 = vld [vmem:[%s12217_s4 + $0xb8] sm:$0xff]   ;;  %v11123_v6 = vld [vmem:[%s12217_s4 + $0x80] sm:$0xff]  }
 0x9bd   :  { %9540 = vtanh.f32 %v4201_v24  ;;  %v4202_v34 = vmul.f32 0.7978846, %v4198_v48 }
 0x9be   :  { %v4200_v35 = vmul.f32 0.7978846, %v4196_v54  ;;  %9542 = vtanh.f32 %v4199_v42  ;;  %9141 = vmatpush3.bf16.msra.mxu0 %v9434_v9 }
 0x9bf   :  { %9544 = vtanh.f32 %v4202_v34  ;;  %9142 = vmatprep.subr.bf16.mxu0 %v9436_v46 }
 0x9c0   :  { %9546 = vtanh.f32 %v4200_v35 }
 0x9c2   :  { %9143 = vmatpush3.bf16.msra.mxu0 %v9436_v46 }
 0x9c3   :  { %9144 = vmatprep.subr.bf16.mxu0 %v9438_v58 }
 0x9c6   :  { %9145 = vmatpush3.bf16.msra.mxu0 %v9438_v58 }
 0x9c7   :  { %v9541_v61 = vpop.eup %9540  ;;  %9150 = vmatprep.subr.bf16.mxu0 %v11123_v6 }
 0x9c8   :  { %v9543_v20 = vpop.eup %9542  ;;  %v4209_v39 = vadd.f32 1.0, %v9541_v61 }
 0x9c9   :  { %v9545_v41 = vpop.eup %9544  ;;  %v4207_v22 = vadd.f32 1.0, %v9543_v20 }
 0x9ca   :  { %v9547_v28 = vpop.eup %9546  ;;  %v4210_v33 = vadd.f32 1.0, %v9545_v41  ;;  %v4213_v29 = vmul.f32 %v4209_v39, %v4181_v59 }
 0x9cb   :  { %v4208_v53 = vadd.f32 1.0, %v9547_v28  ;;  %v4211_v36 = vmul.f32 %v4207_v22, %v4179_v18 }
 0x9cc   :  { %v4214_v30 = vmul.f32 %v4210_v33, %v4182_v31 }
 0x9cd   :  { %v4212_v14 = vmul.f32 %v4208_v53, %v4180_v8 }
 0x9ce   :  { %v4232_v27 = vpack.c.bf16 %v4214_v30, %v4213_v29 }
 0x9cf   :  { %v4231_v40 = vpack.c.bf16 %v4212_v14, %v4211_v36 }
 0x9d1   :  { %9134 = vmatprep.mubr.bf16.mxu1 %v4231_v40 }
 0x9d2   :  { %9135 = vmatmul.mubr.bf16.vlgmr.msra.gmra.mrb[44].mxu1 %v4232_v27 }
 0x9d3   :  { %9163 = vmatpush3.bf16.msra.mxu1 %v9433_v1 }
 0x9d4   :  { %9164 = vmatprep.subr.bf16.mxu1 %v9435_v60 }
 0x9d7   :  { %9165 = vmatpush3.bf16.msra.mxu1 %v9435_v60 }
 0x9d8   :  { %9166 = vmatprep.subr.bf16.mxu1 %v9437_v13 }
 0x9db   :  { %9167 = vmatpush3.bf16.msra.mxu1 %v9437_v13 }
 0x9dc   :  { %9168 = vmatprep.subr.bf16.mxu1 %v9439_v32 }
 0x9df   :  { %9169 = vmatpush3.bf16.msra.mxu1 %v9439_v32 }
 0x9e0   :  { %9186 = vmatprep.subr.bf16.mxu1 %v12238_v3 }
 0xaa5   :  { %v9136_v26 = vpop.f32.mrb[44].mxu1 }
 0xaa6   :  { %v4332_v56 = vadd.f32 %v9136_v26, %v10988_v4  ;;  %v4315_v57 = vpop.f32.mrb[45].mxu1 }
 0xaa7   :  { %v4330_v37 = vadd.f32 %v4315_v57, %v10991_v7  ;;  %v9137_v38 = vpop.f32.mrb[46].mxu1 }
 0xaa8   :  { %v11066_v49 = vadd.f32 %v8676_v0, %v4332_v56  ;;  %v4333_v51 = vadd.f32 %v9137_v38, %v10999_v23  ;;  %v4318_v25 = vpop.f32.mrb[47].mxu1 }
 0xaa9   :  { %v4331_v15 = vadd.f32 %v4318_v25, %v10996_v2  ;;  %v11070_v11 = vadd.f32 %v8676_v0, %v4330_v37  ;;  %v8677_v37 = vld [vmem:[%s12216_s3 + $0x4] sm:$0xf] }
 0xaaa   :  { %v11072_v21 = vadd.f32 %v8676_v0, %v4333_v51  ;;  %v4353_v62 = vsel %vm186_vm0, %v11066_v49, 0.0  ;;  %v4365_v19 = vmul.f32 %v11066_v49, %v11066_v49  ;;  %v12259_v51 = vsub.s32 0, %v12258_v12 }
 0xaab   :  { %4354 = vadd.xlane.f32.xlu0 %v4353_v62  ;;  %v11076_v4 = vadd.f32 %v8676_v0, %v4331_v15  ;;  %v4347_v23 = vsel %vm186_vm0, %v11070_v11, 0.0  ;;  %v4363_v2 = vmul.f32 %v11070_v11, %v11070_v11 }
 0xaac   :  { %v4356_v7 = vsel %vm186_vm0, %v11072_v21, 0.0  ;;  %v4366_v16 = vmul.f32 %v11072_v21, %v11072_v21  ;;  %v4373_v50 = vsel %vm186_vm0, %v4365_v19, 0.0  ;;  %v4410_v25 = vrot.slane %v8677_v37, %v12259_v51 }
 0xaad   :  { %4357 = vadd.xlane.f32.xlu1 %v4356_v7  ;;  %v4350_v44 = vsel %vm186_vm0, %v11076_v4, 0.0  ;;  %v4364_v43 = vmul.f32 %v11076_v4, %v11076_v4  ;;  %v4367_v10 = vsel %vm186_vm0, %v4363_v2, 0.0 }
 0xaae   :  { %v4376_v5 = vsel %vm186_vm0, %v4366_v16, 0.0 }
 0xaaf   :  { %4348 = vadd.xlane.f32.xlu0 %v4347_v23  ;;  %v4370_v17 = vsel %vm186_vm0, %v4364_v43, 0.0 }
 0xab1   :  { %4351 = vadd.xlane.f32.xlu1 %v4350_v44 }
 0xab3   :  { %4368 = vadd.xlane.f32.xlu0 %v4367_v10  ;;  %v12260_v10 = vsub.s32 1, %v12258_v12 }
 0xab5   :  { %4371 = vadd.xlane.f32.xlu1 %v4370_v17  ;;  %v4418_v19 = vrot.slane %v8677_v37, %v12260_v10 }
 0xab7   :  { %4374 = vadd.xlane.f32.xlu0 %v4373_v50 }
 0xab9   :  { %4377 = vadd.xlane.f32.xlu1 %v4376_v5 }
 0xb38   :  { %v4355_v24 = vpop.xlane.xlu0 %4354 }
 0xb39   :  { %v4361_v20 = vmul.f32 0.015625, %v4355_v24 }
 0xb3a   :  { %v4358_v48 = vpop.xlane.xlu1 %4357 }
 0xb3b   :  { %v4362_v22 = vmul.f32 0.015625, %v4358_v48  ;;  %v4385_v8 = vmul.f32 %v4361_v20, %v4361_v20  ;;  %v4393_v2 = vsub.f32 %v11066_v49, %v4361_v20 }
 0xb3c   :  { %v4349_v54 = vpop.xlane.xlu0 %4348 }
 0xb3d   :  { %v4359_v42 = vmul.f32 0.015625, %v4349_v54  ;;  %v4386_v36 = vmul.f32 %v4362_v22, %v4362_v22  ;;  %v4394_v16 = vsub.f32 %v11072_v21, %v4362_v22  ;;  %v9441_v54 = vld [vmem:[%s12217_s4 + $0x88] sm:$0xff]  }
 0xb3e   :  { %v4352_v34 = vpop.xlane.xlu1 %4351 }
 0xb3f   :  { %v4360_v35 = vmul.f32 0.015625, %v4352_v34  ;;  %v4383_v39 = vmul.f32 %v4359_v42, %v4359_v42  ;;  %v4391_v38 = vsub.f32 %v11070_v11, %v4359_v42  ;;  %v9442_v42 = vld [vmem:[%s12217_s4 + $0x90] sm:$0xff]   ;;  %v9443_v34 = vld [vmem:[%s12217_s4 + $0x98] sm:$0xff]  }
 0xb40   :  { %v4369_v61 = vpop.xlane.xlu0 %4368 }
 0xb41   :  { %v4379_v41 = vmul.f32 0.015625, %v4369_v61  ;;  %v4384_v59 = vmul.f32 %v4360_v35, %v4360_v35  ;;  %v4392_v62 = vsub.f32 %v11076_v4, %v4360_v35  ;;  %v8687_v35 = vld [vmem:[%s12218_s5 + $0x3] ss:$0 sm:$0xff] }
 0xb42   :  { %v4372_v28 = vpop.xlane.xlu1 %4371 }
 0xb43   :  { %v4387_v31 = vsub.f32 %v4379_v41, %v4383_v39  ;;  %v4380_v33 = vmul.f32 0.015625, %v4372_v28 }
 0xb44   :  { %v4375_v18 = vpop.xlane.xlu0 %4374 }
 0xb45   :  { %v4395_v53 = vadd.f32 1e-06, %v4387_v31  ;;  %v4388_v29 = vsub.f32 %v4380_v33, %v4384_v59  ;;  %v4381_v30 = vmul.f32 0.015625, %v4375_v18 }
 0xb46   :  { %v4378_v14 = vpop.xlane.xlu1 %4377 }
 0xb47   :  { %9548 = vrsqrt.f32 %v4395_v53  ;;  %v4396_v27 = vadd.f32 1e-06, %v4388_v29  ;;  %v4389_v40 = vsub.f32 %v4381_v30, %v4385_v8  ;;  %v4382_v26 = vmul.f32 0.015625, %v4378_v14  ;;  %v8703_v29 = vld [vmem:[%s12218_s5 + $0x4] ss:$0 sm:$0xff] }
 0xb49   :  { %9550 = vrsqrt.f32 %v4396_v27  ;;  %v4397_v0 = vadd.f32 1e-06, %v4389_v40  ;;  %v4390_v56 = vsub.f32 %v4382_v26, %v4386_v36 }
 0xb4b   :  { %9552 = vrsqrt.f32 %v4397_v0  ;;  %v4398_v57 = vadd.f32 1e-06, %v4390_v56 }
 0xb4d   :  { %9554 = vrsqrt.f32 %v4398_v57 }
 0xb51   :  { %v9549_v15 = vpop.eup %9548 }
 0xb52   :  { %v4403_v7 = vmul.f32 %v9549_v15, %v4391_v38 }
 0xb53   :  { %v9551_v23 = vpop.eup %9550 }
 0xb54   :  { %v4404_v44 = vmul.f32 %v9551_v23, %v4392_v62  ;;  %v4411_v43 = vmul.f32 %v4410_v25, %v4403_v7 }
 0xb55   :  { %v9553_v17 = vpop.eup %9552 }
 0xb56   :  { %v4405_v50 = vmul.f32 %v9553_v17, %v4393_v2  ;;  %v4412_v5 = vmul.f32 %v4410_v25, %v4404_v44  ;;  %v4419_v9 = vadd.f32 %v4418_v19, %v4411_v43 }
 0xb57   :  { %v9555_v55 = vpop.eup %9554 }
 0xb58   :  { %v4406_v1 = vmul.f32 %v9555_v55, %v4394_v16  ;;  %v4420_v60 = vadd.f32 %v4418_v19, %v4412_v5  ;;  %v4413_v46 = vmul.f32 %v4410_v25, %v4405_v50 }
 0xb5a   :  { %v4423_v13 = vpack.c.bf16 %v4420_v60, %v4419_v9  ;;  %v4414_v58 = vmul.f32 %v4410_v25, %v4406_v1  ;;  %v4421_v32 = vadd.f32 %v4418_v19, %v4413_v46 }
 0xb5c   :  { %9146 = vmatprep.mubr.msk.bf16.mxu0 %vm186_vm0, %v4423_v13  ;;  %9170 = vmatprep.mubr.msk.bf16.mxu1 %vm186_vm0, %v4423_v13  ;;  %v4422_v24 = vadd.f32 %v4418_v19, %v4414_v58 }
 0xb5e   :  { %v4424_v48 = vpack.c.bf16 %v4422_v24, %v4421_v32 }
 0xb60   :  { %9147 = vmatmul.mubr.msk.bf16.vlgmr.msra.gmra.mrb[48].mxu0 %vm186_vm0, %v4424_v48  ;;  %9171 = vmatmul.mubr.msk.bf16.vlgmr.msra.gmra.mrb[48].mxu1 %vm186_vm0, %v4424_v48 }
 0xb61   :  { %9151 = vmatpush3.bf16.msra.mxu0 %v11123_v6  ;;  %9158 = vmatprep.mubr.msk.bf16.mxu0 %vm186_vm0, %v4423_v13  ;;  %v8719_v6 = vld [vmem:[%s12218_s5 + $0x5] ss:$0 sm:$0xff]  ;;  %s8540_s5 = sshll.u32 %s9733_s2, 4  ;;  %s8541_s5 = int_to_ptr.vmem [resolvable:$true] %s8540_s5 }
 0xb62   :  { %9152 = vmatprep.subr.bf16.mxu0 %v9441_v54  ;;  %9188 = vmatprep.mubr.msk.bf16.mxu1 %vm9727_vm1, %v12238_v3  ;;  %p9695_p3 = scmp.lt.s32.totalorder %s8541_s5, %s8541_s5 }
 0xb65   :  { %9153 = vmatpush3.bf16.msra.mxu0 %v9441_v54 }
 0xb66   :  { %9154 = vmatprep.subr.bf16.mxu0 %v9442_v42 }
 0xb69   :  { %9155 = vmatpush3.bf16.msra.mxu0 %v9442_v42 }
 0xb6a   :  { %9156 = vmatprep.subr.bf16.mxu0 %v9443_v34 }
 0xb6d   :  { %9157 = vmatpush3.bf16.msra.mxu0 %v9443_v34 }
 0xb6e   :  { %9174 = vmatprep.subr.bf16.mxu0 %v12238_v3 }
 0xb70   :  { %9159 = vmatmul.mubr.msk.bf16.vlgmr.msra.gmra.mrb[52].mxu0 %vm186_vm0, %v4424_v48 }
 0xb71   :  { %9176 = vmatprep.mubr.msk.bf16.mxu0 %vm9727_vm1, %v12238_v3 }
 0xc33   :  { %v9148_v61 = vpop.f32.mrb[48].mxu0  ;;  %v9172_v20 = vpop.f32.mrb[48].mxu1 }
 0xc34   :  { %v11165_v39 = vadd.f32 %v9172_v20, %v8719_v6  ;;  %v4506_v41 = vpop.f32.mrb[49].mxu0  ;;  %v4686_v22 = vpop.f32.mrb[49].mxu1  ;;  %v11211_v57 = vadd.f32 %v9148_v61, %v8687_v35 }
 0xc35   :  { %v11167_v28 = vadd.f32 %v8687_v35, %v4506_v41  ;;  %v9149_v59 = vpop.f32.mrb[50].mxu0  ;;  %v9173_v31 = vpop.f32.mrb[50].mxu1  ;;  %v11227_v38 = vadd.f32 %v8719_v6, %v4686_v22 }
 0xc36   :  { %v11169_v33 = vadd.f32 %v9173_v31, %v8719_v6  ;;  %v4509_v18 = vpop.f32.mrb[51].mxu0  ;;  %v4689_v8 = vpop.f32.mrb[51].mxu1  ;;  %v11221_v37 = vadd.f32 %v9149_v59, %v8687_v35 }
 0xc37   :  { %v11171_v53 = vadd.f32 %v8687_v35, %v4509_v18  ;;  %4705 = vrot.lane.b32.xlu0 %v11167_v28, %s9723_s29  ;;  %v11237_v51 = vadd.f32 %v8719_v6, %v4689_v8 }
 0xc39   :  { %4707 = vrot.lane.b32.xlu1 %v11171_v53, %s9723_s29 }
 0xc43   :  { %v9160_v30 = vpop.f32.mrb[52].mxu0 }
 0xc44   :  { %v4596_v36 = vpop.f32.mrb[53].mxu0  ;;  %v11195_v0 = vadd.f32 %v9160_v30, %v8703_v29 }
 0xc45   :  { %v4597_v14 = vadd.f32 %v8703_v29, %v4596_v36  ;;  %v9161_v27 = vpop.f32.mrb[54].mxu0 }
 0xc46   :  { %v4599_v40 = vpop.f32.mrb[55].mxu0  ;;  %v11205_v56 = vadd.f32 %v9161_v27, %v8703_v29 }
 0xc47   :  { %5309 = vrot.lane.b32.xlu1 %v4597_v14, %s9724_s30  ;;  %5297 = vrot.lane.b32.xlu0 %v4597_v14, %s9723_s29  ;;  %v11182_v26 = vadd.f32 %v8703_v29, %v4599_v40 }
 0xc4b   :  { %5299 = vrot.lane.b32.xlu1 %v11182_v26, %s9723_s29  ;;  %5321 = vrot.lane.b32.xlu0 %v4597_v14, %s9725_s1 }
 0xc4f   :  { %5311 = vrot.lane.b32.xlu1 %v11182_v26, %s9724_s30  ;;  %4717 = vrot.lane.b32.xlu0 %v11167_v28, %s9724_s30 }
 0xc53   :  { %5323 = vrot.lane.b32.xlu1 %v11182_v26, %s9725_s1  ;;  %4729 = vrot.lane.b32.xlu0 %v11167_v28, %s9725_s1 }
 0xc57   :  { %4719 = vrot.lane.b32.xlu1 %v11171_v53, %s9724_s30  ;;  %5301 = vrot.lane.b32.xlu0 %v11195_v0, %s9723_s29 }
 0xc5b   :  { %4731 = vrot.lane.b32.xlu1 %v11171_v53, %s9725_s1  ;;  %5313 = vrot.lane.b32.xlu0 %v11195_v0, %s9724_s30 }
 0xc5f   :  { %5303 = vrot.lane.b32.xlu1 %v11205_v56, %s9723_s29  ;;  %5325 = vrot.lane.b32.xlu0 %v11195_v0, %s9725_s1 }
 0xc63   :  { %5315 = vrot.lane.b32.xlu1 %v11205_v56, %s9724_s30  ;;  %4709 = vrot.lane.b32.xlu0 %v11211_v57, %s9723_s29 }
 0xc67   :  { %5327 = vrot.lane.b32.xlu1 %v11205_v56, %s9725_s1  ;;  %4721 = vrot.lane.b32.xlu0 %v11211_v57, %s9724_s30 }
 0xc6b   :  { %4711 = vrot.lane.b32.xlu1 %v11221_v37, %s9723_s29  ;;  %4733 = vrot.lane.b32.xlu0 %v11211_v57, %s9725_s1 }
 0xc6f   :  { %4723 = vrot.lane.b32.xlu1 %v11221_v37, %s9724_s30  ;;  %5889 = vrot.lane.b32.xlu0 %v11227_v38, %s9723_s29 }
 0xc73   :  { %4735 = vrot.lane.b32.xlu1 %v11221_v37, %s9725_s1  ;;  %5913 = vrot.lane.b32.xlu0 %v11227_v38, %s9725_s1 }
 0xc77   :  { %5891 = vrot.lane.b32.xlu1 %v11237_v51, %s9723_s29 }
 0xc7b   :  { %5901 = vrot.lane.b32.xlu1 %v11227_v38, %s9724_s30 }
 0xc7f   :  { %5903 = vrot.lane.b32.xlu1 %v11237_v51, %s9724_s30 }
 0xc83   :  { %5915 = vrot.lane.b32.xlu1 %v11237_v51, %s9725_s1 }
 0xca9   :  { %v4706_v25 = vpop.permute.xlu0 %4705 }
 0xcab   :  { %v11247_v15 = vpop.permute.xlu1 %4707 }
 0xcb9   :  { %v5310_v62 = vpop.permute.xlu1 %5309  ;;  %v5298_v7 = vpop.permute.xlu0 %5297 }
 0xcba   :  { %v5333_v23 = vcombine.low %v4597_v14, %v5310_v62  ;;  %v5334_v2 = vcombine.high %v4597_v14, %v5310_v62 }
 0xcbc   :  { %v5341_v17 = vrot.slane %v5333_v23, %v10105_v45  ;;  %v5348_v16 = vrot.slane %v5334_v2, %v10105_v45 }
 0xcbd   :  { %v5300_v44 = vpop.permute.xlu1 %5299  ;;  %v5322_v43 = vpop.permute.xlu0 %5321 }
 0xcbe   :  { %v5349_v10 = vcombine.low %v5298_v7, %v5322_v43  ;;  %v5350_v19 = vcombine.high %v5298_v7, %v5322_v43 }
 0xcc0   :  { %v5357_v50 = vrot.slane %v5349_v10, %v10105_v45  ;;  %v5364_v5 = vrot.slane %v5350_v19, %v10105_v45 }
 0xcc1   :  { %v5312_v55 = vpop.permute.xlu1 %5311  ;;  %v4718_v1 = vpop.permute.xlu0 %4717 }
 0xcc2   :  { %v5365_v9 = vcombine.low %v5341_v17, %v5357_v50  ;;  %v5366_v60 = vcombine.high %v5341_v17, %v5357_v50  ;;  %v5381_v46 = vcombine.low %v5348_v16, %v5364_v5  ;;  %v5382_v13 = vcombine.high %v5348_v16, %v5364_v5 }
 0xcc3   :  { %v5401_v58 = vcombine.low %v11182_v26, %v5312_v55  ;;  %v5402_v32 = vcombine.high %v11182_v26, %v5312_v55  ;;  %v4741_v24 = vcombine.low %v11167_v28, %v4718_v1  ;;  %v4742_v48 = vcombine.high %v11167_v28, %v4718_v1 }
 0xcc4   :  { %v5373_v54 = vrot.slane %v5365_v9, %v10110_v52  ;;  %v5380_v42 = vrot.slane %v5366_v60, %v10110_v52  ;;  %v5389_v34 = vrot.slane %v5381_v46, %v10110_v52  ;;  %v5396_v6 = vrot.slane %v5382_v13, %v10110_v52 }
 0xcc5   :  { %v5324_v35 = vpop.permute.xlu1 %5323  ;;  %v4730_v61 = vpop.permute.xlu0 %4729  ;;  %v5409_v28 = vrot.slane %v5401_v58, %v10105_v45  ;;  %v5416_v30 = vrot.slane %v5402_v32, %v10105_v45  ;;  %v4749_v36 = vrot.slane %v4741_v24, %v10105_v45  ;;  %v4756_v14 = vrot.slane %v4742_v48, %v10105_v45 }
 0xcc6   :  { %v5605_v20 = vcombine.low %v5373_v54, %v5380_v42  ;;  %v8734_v41 = vcombine.high %v5373_v54, %v5380_v42  ;;  %v5621_v22 = vcombine.low %v5389_v34, %v5396_v6  ;;  %v8735_v59 = vcombine.high %v5389_v34, %v5396_v6 }
 0xcc7   :  { %v5417_v31 = vcombine.low %v5300_v44, %v5324_v35  ;;  %v5418_v18 = vcombine.high %v5300_v44, %v5324_v35  ;;  %v4757_v8 = vcombine.low %v4706_v25, %v4730_v61  ;;  %v4758_v29 = vcombine.high %v4706_v25, %v4730_v61 }
 0xcc8   :  { %v11272_v25 = vrot.slane %v5605_v20, %v10105_v45  ;;  %v11275_v2 = vrot.slane %v8734_v41, %v10105_v45  ;;  %v11278_v44 = vrot.slane %v5621_v22, %v10105_v45  ;;  %v11281_v43 = vrot.slane %v8735_v59, %v10105_v45 }
 0xcc9   :  { %v5425_v27 = vrot.slane %v5417_v31, %v10105_v45  ;;  %v5432_v40 = vrot.slane %v5418_v18, %v10105_v45  ;;  %v4765_v26 = vrot.slane %v4757_v8, %v10105_v45  ;;  %v4772_v62 = vrot.slane %v4758_v29, %v10105_v45  ;;  %v4720_v7 = vpop.permute.xlu1 %4719  ;;  %v11269_v23 = vpop.permute.xlu0 %5301 }
 0xcca   :  { %v4809_v31 = vcombine.low %v11171_v53, %v4720_v7  ;;  %v4810_v18 = vcombine.high %v11171_v53, %v4720_v7 }
 0xccb   :  { %v5433_v10 = vcombine.low %v5409_v28, %v5425_v27  ;;  %v5434_v19 = vcombine.high %v5409_v28, %v5425_v27  ;;  %v5449_v17 = vcombine.low %v5416_v30, %v5432_v40  ;;  %v5450_v16 = vcombine.high %v5416_v30, %v5432_v40 }
 0xccc   :  { %v4773_v50 = vcombine.low %v4749_v36, %v4765_v26  ;;  %v4774_v5 = vcombine.high %v4749_v36, %v4765_v26  ;;  %v4789_v55 = vcombine.low %v4756_v14, %v4772_v62  ;;  %v4790_v1 = vcombine.high %v4756_v14, %v4772_v62 }
 0xccd   :  { %v5441_v9 = vrot.slane %v5433_v10, %v10110_v52  ;;  %v5448_v60 = vrot.slane %v5434_v19, %v10110_v52  ;;  %v5457_v46 = vrot.slane %v5449_v17, %v10110_v52  ;;  %v5464_v13 = vrot.slane %v5450_v16, %v10110_v52  ;;  %v4732_v58 = vpop.permute.xlu1 %4731  ;;  %v5314_v61 = vpop.permute.xlu0 %5313 }
 0xcce   :  { %v4781_v32 = vrot.slane %v4773_v50, %v10110_v52  ;;  %v4788_v24 = vrot.slane %v4774_v5, %v10110_v52  ;;  %v4797_v48 = vrot.slane %v4789_v55, %v10110_v52  ;;  %v4804_v54 = vrot.slane %v4790_v1, %v10110_v52 }
 0xccf   :  { %v5673_v42 = vcombine.low %v5441_v9, %v5448_v60  ;;  %v8736_v34 = vcombine.high %v5441_v9, %v5448_v60  ;;  %v5689_v6 = vcombine.low %v5457_v46, %v5464_v13  ;;  %v8737_v35 = vcombine.high %v5457_v46, %v5464_v13 }
 0xcd0   :  { %v5013_v20 = vcombine.low %v4781_v32, %v4788_v24  ;;  %v8726_v41 = vcombine.high %v4781_v32, %v4788_v24  ;;  %v5029_v22 = vcombine.low %v4797_v48, %v4804_v54  ;;  %v8727_v59 = vcombine.high %v4797_v48, %v4804_v54 }
 0xcd1   :  { %v5637_v28 = vcombine.low %v11272_v25, %v11275_v2  ;;  %v5653_v30 = vcombine.low %v11278_v44, %v11281_v43  ;;  %v11302_v36 = vrot.slane %v5673_v42, %v10105_v45  ;;  %v11305_v14 = vrot.slane %v8736_v34, %v10105_v45  ;;  %v11309_v40 = vpop.permute.xlu1 %5303  ;;  %v5326_v50 = vpop.permute.xlu0 %5325 }
 0xcd2   :  { %v11294_v8 = vrot.slane %v5013_v20, %v10105_v45  ;;  %v5028_v29 = vrot.slane %v8726_v41, %v10105_v45  ;;  %v4825_v27 = vcombine.low %v11247_v15, %v4732_v58  ;;  %v4826_v53 = vcombine.high %v11247_v15, %v4732_v58 }
 0xcd3   :  { %v11312_v26 = vrot.slane %v5689_v6, %v10105_v45  ;;  %v11315_v62 = vrot.slane %v8737_v35, %v10105_v45  ;;  %v5036_v7 = vrot.slane %v5029_v22, %v10105_v45  ;;  %v5044_v10 = vrot.slane %v8727_v59, %v10105_v45 }
 0xcd4   :  { %v4817_v19 = vrot.slane %v4809_v31, %v10105_v45  ;;  %v4824_v17 = vrot.slane %v4810_v18, %v10105_v45  ;;  %v4833_v16 = vrot.slane %v4825_v27, %v10105_v45  ;;  %v4840_v15 = vrot.slane %v4826_v53, %v10105_v45 }
 0xcd5   :  { %v5045_v5 = vcombine.low %v11294_v8, %v5028_v29  ;;  %v5046_v55 = vcombine.high %v11294_v8, %v5028_v29  ;;  %v5469_v1 = vcombine.low %v11195_v0, %v5314_v61  ;;  %v5470_v9 = vcombine.high %v11195_v0, %v5314_v61  ;;  %v5316_v20 = vpop.permute.xlu1 %5315 }
 0xcd6   :  { %v4841_v60 = vcombine.low %v4817_v19, %v4833_v16  ;;  %v4842_v46 = vcombine.high %v4817_v19, %v4833_v16  ;;  %v4857_v13 = vcombine.low %v4824_v17, %v4840_v15  ;;  %v4858_v58 = vcombine.high %v4824_v17, %v4840_v15  ;;  %v11341_v16 = vpop.permute.xlu0 %4709 }
 0xcd7   :  { %v5061_v32 = vcombine.low %v5036_v7, %v5044_v10  ;;  %v5062_v24 = vcombine.high %v5036_v7, %v5044_v10  ;;  %v5485_v48 = vcombine.low %v11269_v23, %v5326_v50  ;;  %v5486_v54 = vcombine.high %v11269_v23, %v5326_v50 }
 0xcd8   :  { %v4849_v42 = vrot.slane %v4841_v60, %v10110_v52  ;;  %v4856_v34 = vrot.slane %v4842_v46, %v10110_v52  ;;  %v4865_v6 = vrot.slane %v4857_v13, %v10110_v52  ;;  %v4872_v35 = vrot.slane %v4858_v58, %v10110_v52 }
 0xcd9   :  { %v5477_v0 = vrot.slane %v5469_v1, %v10105_v45  ;;  %v5484_v61 = vrot.slane %v5470_v9, %v10105_v45  ;;  %v5493_v41 = vrot.slane %v5485_v48, %v10105_v45  ;;  %v5500_v22 = vrot.slane %v5486_v54, %v10105_v45  ;;  %v5328_v48 = vpop.permute.xlu1 %5327 }
 0xcda   :  { %v5081_v59 = vcombine.low %v4849_v42, %v4856_v34  ;;  %v8728_v31 = vcombine.high %v4849_v42, %v4856_v34  ;;  %v5097_v23 = vcombine.low %v4865_v6, %v4872_v35  ;;  %v8729_v18 = vcombine.high %v4865_v6, %v4872_v35 }
 0xcdb   :  { %v5501_v8 = vcombine.low %v5477_v0, %v5493_v41  ;;  %v5502_v29 = vcombine.high %v5477_v0, %v5493_v41  ;;  %v5517_v27 = vcombine.low %v5484_v61, %v5500_v22  ;;  %v5518_v53 = vcombine.high %v5484_v61, %v5500_v22 }
 0xcdc   :  { %v5088_v7 = vrot.slane %v5081_v59, %v10105_v45  ;;  %v5096_v10 = vrot.slane %v8728_v31, %v10105_v45  ;;  %v5104_v19 = vrot.slane %v5097_v23, %v10105_v45  ;;  %v5112_v17 = vrot.slane %v8729_v18, %v10105_v45 }
 0xcdd   :  { %v5509_v15 = vrot.slane %v5501_v8, %v10110_v52  ;;  %v5516_v50 = vrot.slane %v5502_v29, %v10110_v52  ;;  %v5525_v1 = vrot.slane %v5517_v27, %v10110_v52  ;;  %v5532_v9 = vrot.slane %v5518_v53, %v10110_v52 }
 0xcde   :  { %v5113_v60 = vcombine.low %v5088_v7, %v5096_v10  ;;  %v5114_v46 = vcombine.high %v5088_v7, %v5096_v10  ;;  %v5129_v13 = vcombine.low %v5104_v19, %v5112_v17  ;;  %v5130_v58 = vcombine.high %v5104_v19, %v5112_v17  ;;  %v11395_v10 = vpop.permute.xlu1 %4711 }
 0xcdf   :  { %v11348_v54 = vrot.slane %v5045_v5, %v10110_v52  ;;  %v11351_v42 = vrot.slane %v5046_v55, %v10110_v52  ;;  %v5537_v34 = vcombine.low %v11205_v56, %v5316_v20  ;;  %v5538_v6 = vcombine.high %v11205_v56, %v5316_v20  ;;  %v4722_v20 = vpop.permute.xlu0 %4721 }
 0xce0   :  { %v11356_v35 = vrot.slane %v5061_v32, %v10110_v52  ;;  %v11359_v0 = vrot.slane %v5062_v24, %v10110_v52  ;;  %v5741_v61 = vcombine.low %v5509_v15, %v5516_v50  ;;  %v8738_v41 = vcombine.high %v5509_v15, %v5516_v50 }
 0xce1   :  { %v11362_v22 = vrot.slane %v5113_v60, %v10110_v52  ;;  %v11365_v5 = vrot.slane %v5114_v46, %v10110_v52  ;;  %v5757_v55 = vcombine.low %v5525_v1, %v5532_v9  ;;  %v8739_v59 = vcombine.high %v5525_v1, %v5532_v9 }
 0xce2   :  { %v11368_v31 = vrot.slane %v5129_v13, %v10110_v52  ;;  %v11371_v56 = vrot.slane %v5130_v58, %v10110_v52  ;;  %v5553_v32 = vcombine.low %v11309_v40, %v5328_v48  ;;  %v5554_v24 = vcombine.high %v11309_v40, %v5328_v48 }
 0xce3   :  { %v5545_v23 = vrot.slane %v5537_v34, %v10105_v45  ;;  %v5552_v18 = vrot.slane %v5538_v6, %v10105_v45  ;;  %v11381_v8 = vrot.slane %v5637_v28, %v10110_v52  ;;  %v11387_v29 = vrot.slane %v5653_v30, %v10110_v52 }
 0xce4   :  { %v5561_v27 = vrot.slane %v5553_v32, %v10105_v45  ;;  %v5568_v40 = vrot.slane %v5554_v24, %v10105_v45  ;;  %v5705_v53 = vcombine.low %v11302_v36, %v11305_v14  ;;  %v5721_v7 = vcombine.low %v11312_v26, %v11315_v62 }
 0xce5   :  { %v11398_v28 = vrot.slane %v5741_v61, %v10105_v45  ;;  %v11401_v19 = vrot.slane %v8738_v41, %v10105_v45  ;;  %v4877_v30 = vcombine.low %v11211_v57, %v4722_v20  ;;  %v5638_v17 = vcombine.high %v11272_v25, %v11275_v2 }
 0xce6   :  { %v5569_v15 = vcombine.low %v5545_v23, %v5561_v27  ;;  %v5570_v50 = vcombine.high %v5545_v23, %v5561_v27  ;;  %v5585_v1 = vcombine.low %v5552_v18, %v5568_v40  ;;  %v5586_v9 = vcombine.high %v5552_v18, %v5568_v40  ;;  %v4724_v23 = vpop.permute.xlu1 %4723 }
 0xce7   :  { %v4878_v60 = vcombine.high %v11211_v57, %v4722_v20  ;;  %v5713_v46 = vrot.slane %v5705_v53, %v10110_v52  ;;  %v5729_v13 = vrot.slane %v5721_v7, %v10110_v52  ;;  %v5654_v58 = vcombine.high %v11278_v44, %v11281_v43  ;;  %v4734_v20 = vpop.permute.xlu0 %4733 }
 0xce8   :  { %v11412_v48 = vrot.slane %v5569_v15, %v10110_v52  ;;  %v11415_v34 = vrot.slane %v5570_v50, %v10110_v52  ;;  %v5669_v25 = vcombine.low %v11381_v8, %v11387_v29  ;;  %v11420_v2 = vrot.slane %v5638_v17, %v10110_v52 }
 0xce9   :  { %v5737_v57 = vcombine.low %v5713_v46, %v5729_v13  ;;  %v11423_v6 = vrot.slane %v5654_v58, %v10110_v52  ;;  %v5706_v61 = vcombine.high %v11302_v36, %v11305_v14  ;;  %v5722_v44 = vcombine.high %v11312_v26, %v11315_v62 }
 0xcea   :  { %v11430_v43 = vrot.slane %v5757_v55, %v10105_v45  ;;  %v11433_v41 = vrot.slane %v8739_v59, %v10105_v45  ;;  %v11436_v32 = vrot.slane %v5585_v1, %v10110_v52  ;;  %v11439_v24 = vrot.slane %v5586_v9, %v10110_v52 }
 0xceb   :  { %v4885_v18 = vrot.slane %v4877_v30, %v10105_v45  ;;  %v5877_v36 = vpack.c.bf16 %v5737_v57, %v5669_v25  ;;  %v11443_v14 = vrot.slane %v5706_v61, %v10110_v52  ;;  %v11446_v26 = vrot.slane %v5722_v44, %v10110_v52 }
 0xcec   :  { %v5809_v62 = vcombine.low %v11412_v48, %v11415_v34  ;;  %v8740_v55 = vcombine.high %v11412_v48, %v11415_v34  ;;  %v4892_v59 = vrot.slane %v4878_v60, %v10105_v45  ;;  %v5671_v27 = vcombine.low %v11420_v2, %v11423_v6 }
 0xced   :  { %v6481_v40 = vsel %vm2372_vm2, %v5877_v36, 0  ;;  %v5739_v53 = vcombine.low %v11443_v14, %v11446_v26  ;;  %v4893_v7 = vcombine.low %v11341_v16, %v4734_v20  ;;  %v4894_v30 = vcombine.high %v11341_v16, %v4734_v20  ;;  %v4736_v20 = vpop.permute.xlu1 %4735 }
 0xcee   :  { %v5825_v17 = vcombine.low %v11436_v32, %v11439_v24  ;;  %9175 = vmatpush3.bf16.xpose.msra.mxu0 %v6481_v40  ;;  %v4945_v15 = vcombine.low %v11221_v37, %v4724_v23  ;;  %v5077_v50 = vcombine.low %v11348_v54, %v11356_v35  ;;  %v5145_v1 = vcombine.low %v11362_v22, %v11368_v31 }
 0xcef   :  { %v8741_v9 = vcombine.high %v11436_v32, %v11439_v24  ;;  %v5879_v60 = vpack.c.bf16 %v5739_v53, %v5671_v27  ;;  %v4901_v58 = vrot.slane %v4893_v7, %v10105_v45  ;;  %v4908_v16 = vrot.slane %v4894_v30, %v10105_v45  ;;  %9180 = vmatprep.subr.bf16.mxu0 %v12238_v3 }
 0xcf0   :  { %v4946_v25 = vcombine.high %v11221_v37, %v4724_v23  ;;  %v5285_v57 = vpack.c.bf16 %v5145_v1, %v5077_v50  ;;  %v5079_v61 = vcombine.low %v11351_v42, %v11359_v0  ;;  %v5147_v44 = vcombine.low %v11365_v5, %v11371_v56  ;;  %v5890_v1 = vpop.permute.xlu0 %5889 }
 0xcf1   :  { %v6575_v36 = vsel %vm2372_vm2, %v5879_v60, 0  ;;  %v4909_v32 = vcombine.low %v4885_v18, %v4901_v58  ;;  %v4910_v24 = vcombine.high %v4885_v18, %v4901_v58  ;;  %v4925_v27 = vcombine.low %v4892_v59, %v4908_v16 }
 0xcf2   :  { %9187 = vmatpush3.bf16.xpose.msra.mxu1 %v6575_v36  ;;  %v4926_v40 = vcombine.high %v4892_v59, %v4908_v16  ;;  %v4953_v53 = vrot.slane %v4945_v15, %v10105_v45  ;;  %v5670_v37 = vcombine.high %v11381_v8, %v11387_v29  ;;  %v5738_v23 = vcombine.high %v5713_v46, %v5729_v13 }
 0xcf3   :  { %v4917_v7 = vrot.slane %v4909_v32, %v10110_v52  ;;  %v4924_v30 = vrot.slane %v4910_v24, %v10110_v52  ;;  %v4933_v50 = vrot.slane %v4925_v27, %v10110_v52  ;;  %v4961_v60 = vcombine.low %v11395_v10, %v4736_v20  ;;  %9198 = vmatprep.subr.bf16.mxu1 %v12238_v3 }
 0xcf4   :  { %v4940_v18 = vrot.slane %v4926_v40, %v10110_v52  ;;  %v4960_v59 = vrot.slane %v4946_v25, %v10105_v45  ;;  %v5878_v15 = vpack.c.bf16 %v5738_v23, %v5670_v37  ;;  %v4962_v58 = vcombine.high %v11395_v10, %v4736_v20 }
 0xcf5   :  { %v5149_v8 = vcombine.low %v4917_v7, %v4924_v30  ;;  %v8730_v29 = vcombine.high %v4917_v7, %v4924_v30  ;;  %9177 = vmatmul.mubr.msk.bf16.vlgmr.msra.gmra.mrb[56].mxu0 %vm2372_vm2, %v5285_v57  ;;  %v5287_v46 = vpack.c.bf16 %v5147_v44, %v5079_v61  ;;  %v4969_v13 = vrot.slane %v4961_v60, %v10105_v45  ;;  %v11501_v44 = vpop.permute.xlu1 %5891 }
 0xcf6   :  { %v5165_v16 = vcombine.low %v4933_v50, %v4940_v18  ;;  %v8731_v36 = vcombine.high %v4933_v50, %v4940_v18  ;;  %v6528_v32 = vsel %vm2372_vm2, %v5878_v15, 0  ;;  %v4976_v24 = vrot.slane %v4962_v58, %v10105_v45  ;;  %9182 = vmatprep.mubr.msk.bf16.mxu0 %vm9727_vm1, %v12238_v3  ;;  %v5914_v50 = vpop.permute.xlu0 %5913 }
 0xcf7   :  { %v11496_v25 = vrot.slane %v5149_v8, %v10105_v45  ;;  %v11499_v10 = vrot.slane %v8730_v29, %v10105_v45  ;;  %9181 = vmatpush3.bf16.xpose.msra.mxu0 %v6528_v32  ;;  %v4977_v57 = vcombine.low %v4953_v53, %v4969_v13  ;;  %v4978_v61 = vcombine.high %v4953_v53, %v4969_v13 }
 0xcf8   :  { %v11504_v20 = vrot.slane %v5165_v16, %v10105_v45  ;;  %v11507_v27 = vrot.slane %v8731_v36, %v10105_v45  ;;  %v4993_v40 = vcombine.low %v4960_v59, %v4976_v24  ;;  %v4994_v37 = vcombine.high %v4960_v59, %v4976_v24  ;;  %9192 = vmatprep.subr.bf16.mxu0 %v12238_v3 }
 0xcf9   :  { %v11514_v23 = vrot.slane %v5809_v62, %v10105_v45  ;;  %v11520_v53 = vrot.slane %v8740_v55, %v10105_v45  ;;  %9189 = vmatmul.mubr.msk.bf16.vlgmr.msra.gmra.mrb[52].mxu1 %vm2372_vm2, %v5287_v46  ;;  %v4985_v7 = vrot.slane %v4977_v57, %v10110_v52  ;;  %v4992_v30 = vrot.slane %v4978_v61, %v10110_v52  ;;  %v5902_v36 = vpop.permute.xlu1 %5901 }
 0xcfa   :  { %v11526_v60 = vrot.slane %v5825_v17, %v10105_v45  ;;  %v11529_v18 = vrot.slane %v8741_v9, %v10105_v45  ;;  %v5001_v62 = vrot.slane %v4993_v40, %v10110_v52  ;;  %v5008_v59 = vrot.slane %v4994_v37, %v10110_v52  ;;  %9200 = vmatprep.mubr.msk.bf16.mxu1 %vm9727_vm1, %v12238_v3 }
 0xcfb   :  { %v5181_v48 = vcombine.low %v11496_v25, %v11499_v10  ;;  %v5197_v34 = vcombine.low %v11504_v20, %v11507_v27  ;;  %v5217_v55 = vcombine.low %v4985_v7, %v4992_v30  ;;  %v8732_v15 = vcombine.high %v4985_v7, %v4992_v30 }
 0xcfc   :  { %v5233_v17 = vcombine.low %v5001_v62, %v5008_v59  ;;  %v8733_v58 = vcombine.high %v5001_v62, %v5008_v59  ;;  %v5941_v8 = vcombine.low %v5890_v1, %v5914_v50  ;;  %v5942_v9 = vcombine.high %v5890_v1, %v5914_v50 }
 0xcfd   :  { %v5182_v29 = vcombine.high %v11496_v25, %v11499_v10  ;;  %v5198_v46 = vcombine.high %v11504_v20, %v11507_v27  ;;  %v11544_v13 = vrot.slane %v5217_v55, %v10105_v45  ;;  %v11547_v16 = vrot.slane %v8732_v15, %v10105_v45  ;;  %v5904_v15 = vpop.permute.xlu1 %5903 }
 0xcfe   :  { %v11550_v32 = vrot.slane %v5233_v17, %v10105_v45  ;;  %v11553_v24 = vrot.slane %v8733_v58, %v10105_v45  ;;  %v5078_v1 = vcombine.high %v11348_v54, %v11356_v35  ;;  %v5146_v57 = vcombine.high %v11362_v22, %v11368_v31 }
 0xcff   :  { %v11560_v61 = vrot.slane %v5181_v48, %v10110_v52  ;;  %v11563_v40 = vrot.slane %v5197_v34, %v10110_v52  ;;  %v5672_v37 = vcombine.high %v11420_v2, %v11423_v6  ;;  %v5740_v7 = vcombine.high %v11443_v14, %v11446_v26 }
 0xd00   :  { %v5949_v30 = vrot.slane %v5941_v8, %v10105_v45  ;;  %v5956_v50 = vrot.slane %v5942_v9, %v10105_v45  ;;  %v5286_v54 = vpack.c.bf16 %v5146_v57, %v5078_v1  ;;  %v5925_v35 = vcombine.low %v11227_v38, %v5902_v36 }
 0xd01   :  { %v5249_v22 = vcombine.low %v11544_v13, %v11547_v16  ;;  %v5250_v31 = vcombine.high %v11544_v13, %v11547_v16  ;;  %v5880_v62 = vpack.c.bf16 %v5740_v7, %v5672_v37  ;;  %v5926_v59 = vcombine.high %v11227_v38, %v5902_v36  ;;  %v5916_v63 = vpop.permute.xlu1 %5915 }
 0xd02   :  { %v5265_v2 = vcombine.low %v11550_v32, %v11553_v24  ;;  %v5266_v6 = vcombine.high %v11550_v32, %v11553_v24  ;;  %9183 = vmatmul.mubr.msk.bf16.vlgmr.msra.gmra.mrb[60].mxu0 %vm2372_vm2, %v5286_v54  ;;  %v5933_v14 = vrot.slane %v5925_v35, %v10105_v45  ;;  %v5773_v26 = vcombine.low %v11398_v28, %v11401_v19 }
 0xd03   :  { %v6622_v48 = vsel %vm2372_vm2, %v5880_v62, 0  ;;  %v5940_v34 = vrot.slane %v5926_v59, %v10105_v45  ;;  %v5789_v38 = vcombine.low %v11430_v43, %v11433_v41  ;;  %v5841_v55 = vcombine.low %v11514_v23, %v11520_v53  ;;  %9194 = vmatprep.mubr.msk.bf16.mxu0 %vm9727_vm1, %v12238_v3 }
 0xd04   :  { %9193 = vmatpush3.bf16.xpose.msra.mxu0 %v6622_v48  ;;  %v5957_v17 = vcombine.low %v5933_v14, %v5949_v30  ;;  %v5958_v58 = vcombine.high %v5933_v14, %v5949_v30  ;;  %v5781_v8 = vrot.slane %v5773_v26, %v10110_v52  ;;  %v5857_v9 = vcombine.low %v11526_v60, %v11529_v18 }
 0xd05   :  { %v5973_v36 = vcombine.low %v5940_v34, %v5956_v50  ;;  %v5974_v1 = vcombine.high %v5940_v34, %v5956_v50  ;;  %v5797_v57 = vrot.slane %v5789_v38, %v10110_v52  ;;  %v5849_v37 = vrot.slane %v5841_v55, %v10110_v52  ;;  %9204 = vmatprep.subr.bf16.mxu0 %v12238_v3 }
 0xd06   :  { %v5965_v7 = vrot.slane %v5957_v17, %v10110_v52  ;;  %v5972_v54 = vrot.slane %v5958_v58, %v10110_v52  ;;  %v5865_v35 = vrot.slane %v5857_v9, %v10110_v52  ;;  %v5993_v30 = vcombine.low %v11237_v51, %v5904_v15 }
 0xd07   :  { %v5257_v62 = vrot.slane %v5249_v22, %v10110_v52  ;;  %v5981_v59 = vrot.slane %v5973_v36, %v10110_v52  ;;  %v5988_v50 = vrot.slane %v5974_v1, %v10110_v52  ;;  %v5994_v14 = vcombine.high %v11237_v51, %v5904_v15 }
 0xd08   :  { %v6197_v26 = vcombine.low %v5965_v7, %v5972_v54  ;;  %v8742_v48 = vcombine.high %v5965_v7, %v5972_v54  ;;  %v5805_v34 = vcombine.low %v5781_v8, %v5797_v57  ;;  %v5873_v38 = vcombine.low %v5849_v37, %v5865_v35 }
 0xd09   :  { %v5273_v55 = vrot.slane %v5265_v2, %v10110_v52  ;;  %v6213_v17 = vcombine.low %v5981_v59, %v5988_v50  ;;  %v8743_v58 = vcombine.high %v5981_v59, %v5988_v50  ;;  %v6001_v9 = vrot.slane %v5993_v30, %v10105_v45 }
 0xd0a   :  { %v5881_v47 = vpack.c.bf16 %v5873_v38, %v5805_v34  ;;  %v6008_v22 = vrot.slane %v5994_v14, %v10105_v45  ;;  %v5080_v36 = vcombine.high %v11351_v42, %v11359_v0  ;;  %v5148_v51 = vcombine.high %v11365_v5, %v11371_v56 }
 0xd0b   :  { %v11615_v15 = vrot.slane %v6197_v26, %v10105_v45  ;;  %v11618_v1 = vrot.slane %v8742_v48, %v10105_v45  ;;  %v5806_v2 = vcombine.high %v5781_v8, %v5797_v57  ;;  %v5874_v7 = vcombine.high %v5849_v37, %v5865_v35 }
 0xd0c   :  { %v6669_v54 = vsel %vm2372_vm2, %v5881_v47, 0  ;;  %v5288_v30 = vpack.c.bf16 %v5148_v51, %v5080_v36  ;;  %v6009_v59 = vcombine.low %v11501_v44, %v5916_v63  ;;  %v6010_v50 = vcombine.high %v11501_v44, %v5916_v63 }
 0xd0d   :  { %9199 = vmatpush3.bf16.xpose.msra.mxu1 %v6669_v54  ;;  %v5882_v42 = vpack.c.bf16 %v5874_v7, %v5806_v2  ;;  %v5213_v0 = vcombine.low %v11560_v61, %v11563_v40  ;;  %v5281_v5 = vcombine.low %v5257_v62, %v5273_v55  ;;  %v5214_v56 = vcombine.high %v11560_v61, %v11563_v40 }
 0xd0e   :  { %9195 = vmatmul.mubr.msk.bf16.vlgmr.msra.gmra.mrb[64].mxu0 %vm2372_vm2, %v5288_v30  ;;  %v6017_v8 = vrot.slane %v6009_v59, %v10105_v45  ;;  %v6024_v47 = vrot.slane %v6010_v50, %v10105_v45  ;;  %9210 = vmatprep.subr.bf16.mxu1 %v12238_v3  ;;  %v5282_v57 = vcombine.high %v5257_v62, %v5273_v55 }
 0xd0f   :  { %v6716_v63 = vsel %vm2372_vm2, %v5882_v42, 0  ;;  %9206 = vmatprep.mubr.msk.bf16.mxu0 %vm9727_vm1, %v12238_v3  ;;  %v5289_v44 = vpack.c.bf16 %v5281_v5, %v5213_v0  ;;  %v5774_v37 = vcombine.high %v11398_v28, %v11401_v19  ;;  %v5790_v61 = vcombine.high %v11430_v43, %v11433_v41 }
 0xd10   :  { %9205 = vmatpush3.bf16.xpose.msra.mxu0 %v6716_v63  ;;  %v6025_v40 = vcombine.low %v6001_v9, %v6017_v8  ;;  %v6026_v35 = vcombine.high %v6001_v9, %v6017_v8  ;;  %v6041_v14 = vcombine.low %v6008_v22, %v6024_v47  ;;  %v6042_v26 = vcombine.high %v6008_v22, %v6024_v47 }
 0xd11   :  { %v6220_v48 = vrot.slane %v6213_v17, %v10105_v45  ;;  %v6228_v62 = vrot.slane %v8743_v58, %v10105_v45  ;;  %v5290_v34 = vpack.c.bf16 %v5282_v57, %v5214_v56  ;;  %v5842_v38 = vcombine.high %v11514_v23, %v11520_v53  ;;  %9216 = vmatprep.subr.bf16.mxu0 %v12238_v3 }
 0xd12   :  { %v6033_v28 = vrot.slane %v6025_v40, %v10110_v52  ;;  %v6040_v19 = vrot.slane %v6026_v35, %v10110_v52  ;;  %v6049_v43 = vrot.slane %v6041_v14, %v10110_v52  ;;  %v6056_v41 = vrot.slane %v6042_v26, %v10110_v52 }
 0xd13   :  { %v5788_v55 = vrot.slane %v5774_v37, %v10110_v52  ;;  %v5804_v17 = vrot.slane %v5790_v61, %v10110_v52  ;;  %v5856_v58 = vrot.slane %v5842_v38, %v10110_v52  ;;  %v5858_v9 = vcombine.high %v11526_v60, %v11529_v18 }
 0xd14   :  { %v6265_v23 = vcombine.low %v6033_v28, %v6040_v19  ;;  %v8744_v53 = vcombine.high %v6033_v28, %v6040_v19  ;;  %v6281_v22 = vcombine.low %v6049_v43, %v6056_v41  ;;  %v8745_v36 = vcombine.high %v6049_v43, %v6056_v41  ;;  %9201 = vmatmul.mubr.msk.bf16.vlgmr.msra.gmra.mrb[56].mxu1 %vm2372_vm2, %v5289_v44 }
 0xd15   :  { %v5196_v51 = vrot.slane %v5182_v29, %v10110_v52  ;;  %v5264_v2 = vrot.slane %v5250_v31, %v10110_v52  ;;  %v5280_v60 = vrot.slane %v5266_v6, %v10110_v52  ;;  %v5872_v18 = vrot.slane %v5858_v9, %v10110_v52  ;;  %9212 = vmatprep.mubr.msk.bf16.mxu1 %vm9727_vm1, %v12238_v3 }
 0xd16   :  { %v6272_v7 = vrot.slane %v6265_v23, %v10105_v45  ;;  %v6280_v25 = vrot.slane %v8744_v53, %v10105_v45  ;;  %v6288_v10 = vrot.slane %v6281_v22, %v10105_v45  ;;  %v6296_v29 = vrot.slane %v8745_v36, %v10105_v45 }
 0xd17   :  { %9207 = vmatmul.mubr.msk.bf16.vlgmr.msra.gmra.mrb[68].mxu0 %vm2372_vm2, %v5290_v34  ;;  %v5807_v13 = vcombine.low %v5788_v55, %v5804_v17  ;;  %v5875_v16 = vcombine.low %v5856_v58, %v5872_v18  ;;  %v5808_v31 = vcombine.high %v5788_v55, %v5804_v17  ;;  %v5876_v32 = vcombine.high %v5856_v58, %v5872_v18 }
 0xd18   :  { %9218 = vmatprep.mubr.msk.bf16.mxu0 %vm9727_vm1, %v12238_v3  ;;  %v6229_v24 = vcombine.low %v11615_v15, %v11618_v1  ;;  %v6245_v6 = vcombine.low %v6220_v48, %v6228_v62  ;;  %v6297_v54 = vcombine.low %v6272_v7, %v6280_v25  ;;  %v6313_v30 = vcombine.low %v6288_v10, %v6296_v29 }
 0xd19   :  { %v5212_v59 = vrot.slane %v5198_v46, %v10110_v52  ;;  %v5883_v50 = vpack.c.bf16 %v5875_v16, %v5807_v13  ;;  %v5884_v42 = vpack.c.bf16 %v5876_v32, %v5808_v31  ;;  %v6230_v0 = vcombine.high %v11615_v15, %v11618_v1 }
 0xd1a   :  { %v6237_v5 = vrot.slane %v6229_v24, %v10110_v52  ;;  %v6253_v56 = vrot.slane %v6245_v6, %v10110_v52  ;;  %v6305_v8 = vrot.slane %v6297_v54, %v10110_v52  ;;  %v6321_v47 = vrot.slane %v6313_v30, %v10110_v52 }
 0xd1b   :  { %v6763_v57 = vsel %vm2372_vm2, %v5883_v50, 0  ;;  %v6810_v63 = vsel %vm2372_vm2, %v5884_v42, 0  ;;  %v6244_v20 = vrot.slane %v6230_v0, %v10110_v52  ;;  %v6246_v27 = vcombine.high %v6220_v48, %v6228_v62 }
 0xd1c   :  { %9211 = vmatpush3.bf16.xpose.msra.mxu1 %v6763_v57  ;;  %9217 = vmatpush3.bf16.xpose.msra.mxu0 %v6810_v63  ;;  %v5283_v46 = vcombine.low %v5264_v2, %v5280_v60  ;;  %v5284_v44 = vcombine.high %v5264_v2, %v5280_v60  ;;  %v6329_v15 = vcombine.low %v6305_v8, %v6321_v47 }
 0xd1d   :  { %9222 = vmatprep.subr.bf16.mxu1 %v12238_v3  ;;  %9228 = vmatprep.subr.bf16.mxu0 %v12238_v3  ;;  %v6330_v1 = vcombine.high %v6305_v8, %v6321_v47  ;;  %v6260_v37 = vrot.slane %v6246_v27, %v10110_v52  ;;  %v6298_v61 = vcombine.high %v6272_v7, %v6280_v25 }
 0xd1e   :  { %v5215_v40 = vcombine.low %v5196_v51, %v5212_v59  ;;  %v6261_v35 = vcombine.low %v6237_v5, %v6253_v56  ;;  %v6262_v14 = vcombine.high %v6237_v5, %v6253_v56  ;;  %v6314_v26 = vcombine.high %v6288_v10, %v6296_v29 }
 0xd1f   :  { %v5216_v34 = vcombine.high %v5196_v51, %v5212_v59  ;;  %v6263_v38 = vcombine.low %v6244_v20, %v6260_v37  ;;  %v6312_v48 = vrot.slane %v6298_v61, %v10110_v52  ;;  %v6264_v62 = vcombine.high %v6244_v20, %v6260_v37 }
 0xd20   :  { %v6469_v28 = vpack.c.bf16 %v6329_v15, %v6261_v35  ;;  %v6470_v19 = vpack.c.bf16 %v6330_v1, %v6262_v14  ;;  %v6328_v43 = vrot.slane %v6314_v26, %v10110_v52  ;;  %v5291_v41 = vpack.c.bf16 %v5283_v46, %v5215_v40 }
 0xd21   :  { %v5292_v55 = vpack.c.bf16 %v5284_v44, %v5216_v34 }
 0xd22   :  { %v6331_v17 = vcombine.low %v6312_v48, %v6328_v43  ;;  %v6332_v58 = vcombine.high %v6312_v48, %v6328_v43 }
 0xd23   :  { %9213 = vmatmul.mubr.msk.bf16.vlgmr.msra.gmra.mrb[60].mxu1 %vm2372_vm2, %v5291_v41  ;;  %9219 = vmatmul.mubr.msk.bf16.vlgmr.msra.gmra.mrb[72].mxu0 %vm2372_vm2, %v5292_v55 }
 0xd24   :  { %9223 = vmatpush3.bf16.msra.mxu1 %v6469_v28  ;;  %9229 = vmatpush3.bf16.msra.mxu0 %v6470_v19  ;;  %v11697_v9 = vpack.c.bf16 %v6331_v17, %v6263_v38  ;;  %v11699_v23 = vpack.c.bf16 %v6332_v58, %v6264_v62 }
 0xd25   :  { %9224 = vmatprep.mubr.msk.bf16.mxu1 %vm9727_vm1, %v12238_v3  ;;  %9234 = vmatprep.subr.bf16.mxu1 %v12238_v3 }
 0xd26   :  { %9230 = vmatprep.mubr.msk.bf16.mxu0 %vm9727_vm1, %v12238_v3  ;;  %9240 = vmatprep.subr.bf16.mxu0 %v12238_v3 }
 0xdc8   :  { %v6517_v53 = vpop.f32.mrb[56].mxu0 }
 0xdc9   :  { %v11707_v22 = vmul.f32 0.25, %v6517_v53  ;;  %v9178_v36 = vpop.f32.mrb[57].mxu0 }
 0xdca   :  { %v6520_v51 = vpop.f32.mrb[58].mxu0 }
 0xdcb   :  { %v11709_v2 = vmul.f32 0.25, %v6520_v51  ;;  %v9179_v60 = vpop.f32.mrb[59].mxu0  ;;  %v6869_v18 = vsel %vm2372_vm2, %v11707_v22, -inf }
 0xdcc   :  { %v6611_v7 = vpop.f32.mrb[52].mxu1  ;;  %6870 = vmax.xlane.f32.xlu0 %v6869_v18 }
 0xdcd   :  { %v11713_v25 = vmul.f32 0.25, %v6611_v7  ;;  %v9190_v10 = vpop.f32.mrb[53].mxu1  ;;  %v6872_v29 = vsel %vm2372_vm2, %v11709_v2, -inf }
 0xdce   :  { %v6614_v13 = vpop.f32.mrb[54].mxu1  ;;  %6873 = vmax.xlane.f32.xlu1 %v6872_v29 }
 0xdcf   :  { %v11717_v16 = vmul.f32 0.25, %v6614_v13  ;;  %v9191_v31 = vpop.f32.mrb[55].mxu1  ;;  %v6881_v32 = vsel %vm2372_vm2, %v11713_v25, -inf }
 0xdd0   :  { %6882 = vmax.xlane.f32.xlu0 %v6881_v32 }
 0xdd1   :  { %v6884_v24 = vsel %vm2372_vm2, %v11717_v16, -inf }
 0xdd2   :  { %6885 = vmax.xlane.f32.xlu1 %v6884_v24 }
 0xdd5   :  { %v6564_v6 = vpop.f32.mrb[60].mxu0 }
 0xdd6   :  { %v11723_v54 = vmul.f32 0.25, %v6564_v6  ;;  %v9184_v30 = vpop.f32.mrb[61].mxu0 }
 0xdd7   :  { %v6567_v59 = vpop.f32.mrb[62].mxu0 }
 0xdd8   :  { %v9185_v50 = vpop.f32.mrb[63].mxu0  ;;  %v6875_v42 = vsel %vm2372_vm2, %v11723_v54, -inf  ;;  %v11729_v27 = vmul.f32 0.25, %v6567_v59 }
 0xdd9   :  { %6876 = vmax.xlane.f32.xlu0 %v6875_v42 }
 0xdda   :  { %v6878_v34 = vsel %vm2372_vm2, %v11729_v27, -inf }
 0xde1   :  { %v6658_v0 = vpop.f32.mrb[64].mxu0 }
 0xde2   :  { %v9196_v5 = vpop.f32.mrb[65].mxu0  ;;  %v11739_v26 = vmul.f32 0.25, %v6658_v0 }
 0xde3   :  { %v6661_v56 = vpop.f32.mrb[66].mxu0 }
 0xde4   :  { %v9197_v8 = vpop.f32.mrb[67].mxu0  ;;  %v11735_v61 = vmul.f32 0.25, %v6661_v56  ;;  %v6887_v48 = vsel %vm2372_vm2, %v11739_v26, -inf }
 0xde6   :  { %v6890_v38 = vsel %vm2372_vm2, %v11735_v61, -inf }
 0xde7   :  { %v6705_v47 = vpop.f32.mrb[56].mxu1 }
 0xde8   :  { %v11727_v57 = vmul.f32 0.25, %v6705_v47  ;;  %v9202_v63 = vpop.f32.mrb[57].mxu1 }
 0xde9   :  { %v6708_v20 = vpop.f32.mrb[58].mxu1 }
 0xdea   :  { %v6752_v46 = vpop.f32.mrb[68].mxu0  ;;  %v11731_v44 = vmul.f32 0.25, %v6708_v20  ;;  %v9203_v15 = vpop.f32.mrb[59].mxu1  ;;  %v6893_v1 = vsel %vm2372_vm2, %v11727_v57, -inf }
 0xdeb   :  { %v9208_v37 = vpop.f32.mrb[69].mxu0  ;;  %6894 = vmax.xlane.f32.xlu0 %v6893_v1  ;;  %v11749_v58 = vmul.f32 0.25, %v6752_v46 }
 0xdec   :  { %v6755_v40 = vpop.f32.mrb[70].mxu0  ;;  %v6896_v35 = vsel %vm2372_vm2, %v11731_v44, -inf }
 0xded   :  { %v9209_v14 = vpop.f32.mrb[71].mxu0  ;;  %6897 = vmax.xlane.f32.xlu1 %v6896_v35  ;;  %v6899_v7 = vsel %vm2372_vm2, %v11749_v58, -inf  ;;  %v11767_v29 = vmul.f32 0.25, %v6755_v40 }
 0xdef   :  { %6879 = vmax.xlane.f32.xlu0 %v6878_v34  ;;  %v6902_v32 = vsel %vm2372_vm2, %v11767_v29, -inf }
 0xdf1   :  { %6891 = vmax.xlane.f32.xlu1 %v6890_v38 }
 0xdf3   :  { %6888 = vmax.xlane.f32.xlu0 %v6887_v48 }
 0xdf6   :  { %v6846_v62 = vpop.f32.mrb[72].mxu0  ;;  %v6799_v28 = vpop.f32.mrb[60].mxu1 }
 0xdf7   :  { %v11747_v19 = vmul.f32 0.25, %v6799_v28  ;;  %v9214_v43 = vpop.f32.mrb[61].mxu1  ;;  %v9220_v41 = vpop.f32.mrb[73].mxu0  ;;  %v11765_v10 = vmul.f32 0.25, %v6846_v62 }
 0xdf8   :  { %v6849_v55 = vpop.f32.mrb[74].mxu0  ;;  %v6802_v17 = vpop.f32.mrb[62].mxu1 }
 0xdf9   :  { %v11751_v53 = vmul.f32 0.25, %v6802_v17  ;;  %v9215_v36 = vpop.f32.mrb[63].mxu1  ;;  %v9221_v51 = vpop.f32.mrb[75].mxu0  ;;  %v6905_v60 = vsel %vm2372_vm2, %v11747_v19, -inf  ;;  %v6911_v13 = vsel %vm2372_vm2, %v11765_v10, -inf  ;;  %v11771_v31 = vmul.f32 0.25, %v6849_v55 }
 0xdfa   :  { %6906 = vmax.xlane.f32.xlu0 %v6905_v60 }
 0xdfb   :  { %v6908_v18 = vsel %vm2372_vm2, %v11751_v53, -inf  ;;  %v6914_v24 = vsel %vm2372_vm2, %v11771_v31, -inf }
 0xdfc   :  { %6909 = vmax.xlane.f32.xlu1 %v6908_v18 }
 0xdfe   :  { %6900 = vmax.xlane.f32.xlu0 %v6899_v7 }
 0xe0d   :  { %5895 = vrot.lane.b32.xlu1 %v11169_v33, %s9723_s29 }
 0xe11   :  { %5905 = vrot.lane.b32.xlu1 %v11165_v39, %s9724_s30 }
 0xe14   :  { %5893 = vrot.lane.b32.xlu0 %v11165_v39, %s9723_s29 }
 0xe33   :  { %6912 = vmax.xlane.f32.xlu0 %v6911_v13 }
 0xe35   :  { %6903 = vmax.xlane.f32.xlu1 %v6902_v32 }
 0xe39   :  { %6915 = vmax.xlane.f32.xlu1 %v6914_v24 }
 0xe49   :  { %5917 = vrot.lane.b32.xlu0 %v11165_v39, %s9725_s1 }
 0xe4a   :  { %5907 = vrot.lane.b32.xlu1 %v11169_v33, %s9724_s30 }
 0xe59   :  { %v6871_v6 = vpop.xlane.xlu0 %6870 }
 0xe5a   :  { %v6917_v30 = vsub.f32 %v11707_v22, %v6871_v6 }
 0xe5b   :  { %v6874_v59 = vpop.xlane.xlu1 %6873 }
 0xe5c   :  { %v6933_v50 = vmul.f32 1.442695, %v6917_v30  ;;  %v6918_v42 = vsub.f32 %v11709_v2, %v6874_v59 }
 0xe5d   :  { %v6883_v0 = vpop.xlane.xlu0 %6882 }
 0xe5e   :  { %9556 = vpow2.f32 %v6933_v50  ;;  %v6935_v5 = vmul.f32 1.442695, %v6918_v42  ;;  %v6921_v56 = vsub.f32 %v11713_v25, %v6883_v0 }
 0xe5f   :  { %v6886_v8 = vpop.xlane.xlu1 %6885 }
 0xe60   :  { %9558 = vpow2.f32 %v6935_v5  ;;  %v6941_v47 = vmul.f32 1.442695, %v6921_v56  ;;  %v6922_v63 = vsub.f32 %v11717_v16, %v6886_v8 }
 0xe62   :  { %9560 = vpow2.f32 %v6941_v47  ;;  %v6943_v20 = vmul.f32 1.442695, %v6922_v63 }
 0xe64   :  { %9562 = vpow2.f32 %v6943_v20 }
 0xe66   :  { %v6877_v46 = vpop.xlane.xlu0 %6876 }
 0xe67   :  { %v6919_v22 = vsub.f32 %v11723_v54, %v6877_v46 }
 0xe68   :  { %v11786_v15 = vpop.eup %9556 }
 0xe69   :  { %v6937_v1 = vmul.f32 1.442695, %v6919_v22  ;;  %v6965_v2 = vsel %vm2372_vm2, %v11786_v15, 0.0 }
 0xe6a   :  { %v11790_v37 = vpop.eup %9558  ;;  %6966 = vadd.xlane.f32.xlu0 %v6965_v2 }
 0xe6b   :  { %9564 = vpow2.f32 %v6937_v1  ;;  %v6968_v25 = vsel %vm2372_vm2, %v11790_v37, 0.0 }
 0xe6c   :  { %v11794_v16 = vpop.eup %9560 }
 0xe6d   :  { %v6977_v40 = vsel %vm2372_vm2, %v11794_v16, 0.0 }
 0xe6e   :  { %v11798_v35 = vpop.eup %9562  ;;  %6969 = vadd.xlane.f32.xlu1 %v6968_v25  ;;  %6978 = vadd.xlane.f32.xlu0 %v6977_v40 }
 0xe6f   :  { %v6980_v54 = vsel %vm2372_vm2, %v11798_v35, 0.0 }
 0xe72   :  { %6981 = vadd.xlane.f32.xlu1 %v6980_v54 }
 0xe75   :  { %v11802_v14 = vpop.eup %9564 }
 0xe76   :  { %v6971_v34 = vsel %vm2372_vm2, %v11802_v14, 0.0 }
 0xe77   :  { %6972 = vadd.xlane.f32.xlu0 %v6971_v34 }
 0xe78   :  { %v6895_v38 = vpop.xlane.xlu0 %6894 }
 0xe79   :  { %v6925_v48 = vsub.f32 %v11727_v57, %v6895_v38 }
 0xe7a   :  { %v6898_v62 = vpop.xlane.xlu1 %6897 }
 0xe7b   :  { %v6949_v28 = vmul.f32 1.442695, %v6925_v48  ;;  %v6926_v43 = vsub.f32 %v11731_v44, %v6898_v62 }
 0xe7c   :  { %v6880_v41 = vpop.xlane.xlu0 %6879 }
 0xe7d   :  { %9566 = vpow2.f32 %v6949_v28  ;;  %v6920_v55 = vsub.f32 %v11729_v27, %v6880_v41  ;;  %v6951_v36 = vmul.f32 1.442695, %v6926_v43 }
 0xe7e   :  { %v6892_v17 = vpop.xlane.xlu1 %6891 }
 0xe7f   :  { %v6939_v51 = vmul.f32 1.442695, %v6920_v55  ;;  %v6924_v60 = vsub.f32 %v11735_v61, %v6892_v17 }
 0xe80   :  { %v6889_v18 = vpop.xlane.xlu0 %6888 }
 0xe81   :  { %9568 = vpow2.f32 %v6939_v51  ;;  %v6923_v7 = vsub.f32 %v11739_v26, %v6889_v18  ;;  %v6947_v13 = vmul.f32 1.442695, %v6924_v60 }
 0xe82   :  { %9570 = vpow2.f32 %v6951_v36 }
 0xe83   :  { %v6945_v57 = vmul.f32 1.442695, %v6923_v7 }
 0xe85   :  { %9572 = vpow2.f32 %v6945_v57 }
 0xe86   :  { %9574 = vpow2.f32 %v6947_v13 }
 0xe87   :  { %v11811_v32 = vpop.eup %9566  ;;  %v6907_v44 = vpop.xlane.xlu0 %6906 }
 0xe88   :  { %v6989_v27 = vsel %vm2372_vm2, %v11811_v32, 0.0  ;;  %v6929_v24 = vsub.f32 %v11747_v19, %v6907_v44 }
 0xe89   :  { %6990 = vadd.xlane.f32.xlu0 %v6989_v27  ;;  %v11841_v46 = vpop.xlane.xlu1 %6909 }
 0xe8a   :  { %v6957_v50 = vmul.f32 1.442695, %v6929_v24 }
 0xe8b   :  { %v11816_v6 = vpop.eup %9568  ;;  %v6901_v61 = vpop.xlane.xlu0 %6900 }
 0xe8c   :  { %v6927_v30 = vsub.f32 %v11749_v58, %v6901_v61  ;;  %v6974_v26 = vsel %vm2372_vm2, %v11816_v6, 0.0  ;;  %v11821_v59 = vpop.eup %9570 }
 0xe8d   :  { %6975 = vadd.xlane.f32.xlu1 %v6974_v26  ;;  %v6992_v5 = vsel %vm2372_vm2, %v11821_v59, 0.0  ;;  %v11843_v22 = vpop.permute.xlu1 %5895 }
 0xe8e   :  { %v6953_v42 = vmul.f32 1.442695, %v6927_v30 }
 0xe8f   :  { %v11823_v0 = vpop.eup %9572  ;;  %v5894_v1 = vpop.permute.xlu0 %5893 }
 0xe90   :  { %9576 = vpow2.f32 %v6953_v42  ;;  %v6983_v19 = vsel %vm2372_vm2, %v11823_v0, 0.0  ;;  %v11829_v56 = vpop.eup %9574 }
 0xe91   :  { %6993 = vadd.xlane.f32.xlu1 %v6992_v5  ;;  %6984 = vadd.xlane.f32.xlu0 %v6983_v19  ;;  %9578 = vpow2.f32 %v6957_v50  ;;  %v6986_v58 = vsel %vm2372_vm2, %v11829_v56, 0.0  ;;  %v5906_v2 = vpop.permute.xlu1 %5905 }
 0xe92   :  { %v6061_v54 = vcombine.low %v11165_v39, %v5906_v2  ;;  %v6062_v34 = vcombine.high %v11165_v39, %v5906_v2 }
 0xe94   :  { %v6069_v17 = vrot.slane %v6061_v54, %v10105_v45  ;;  %v6076_v36 = vrot.slane %v6062_v34, %v10105_v45 }
 0xe95   :  { %6987 = vadd.xlane.f32.xlu0 %v6986_v58 }
 0xe9a   :  { %v11833_v8 = vpop.eup %9576 }
 0xe9b   :  { %v6995_v47 = vsel %vm2372_vm2, %v11833_v8, 0.0  ;;  %v11837_v63 = vpop.eup %9578 }
 0xe9c   :  { %6996 = vadd.xlane.f32.xlu0 %v6995_v47  ;;  %v7001_v20 = vsel %vm2372_vm2, %v11837_v63, 0.0 }
 0xea0   :  { %7002 = vadd.xlane.f32.xlu0 %v7001_v20 }
 0xec0   :  { %v6913_v25 = vpop.xlane.xlu0 %6912 }
 0xec1   :  { %v6931_v40 = vsub.f32 %v11765_v10, %v6913_v25 }
 0xec2   :  { %v6904_v38 = vpop.xlane.xlu1 %6903 }
 0xec3   :  { %v6928_v48 = vsub.f32 %v11767_v29, %v6904_v38  ;;  %v6961_v62 = vmul.f32 1.442695, %v6931_v40 }
 0xec4   :  { %v5918_v28 = vpop.permute.xlu0 %5917 }
 0xec5   :  { %v6955_v43 = vmul.f32 1.442695, %v6928_v48  ;;  %9580 = vpow2.f32 %v6961_v62  ;;  %v6077_v41 = vcombine.low %v5894_v1, %v5918_v28  ;;  %v6078_v55 = vcombine.high %v5894_v1, %v5918_v28 }
 0xec6   :  { %v6916_v51 = vpop.xlane.xlu1 %6915 }
 0xec7   :  { %9582 = vpow2.f32 %v6955_v43  ;;  %v6932_v10 = vsub.f32 %v11771_v31, %v6916_v51  ;;  %v6085_v60 = vrot.slane %v6077_v41, %v10105_v45  ;;  %v6092_v39 = vrot.slane %v6078_v55, %v10105_v45 }
 0xec9   :  { %v6963_v18 = vmul.f32 1.442695, %v6932_v10  ;;  %v6093_v29 = vcombine.low %v6069_v17, %v6085_v60  ;;  %v6094_v7 = vcombine.high %v6069_v17, %v6085_v60  ;;  %v6109_v13 = vcombine.low %v6076_v36, %v6092_v39 }
 0xeca   :  { %v6110_v57 = vcombine.high %v6076_v36, %v6092_v39  ;;  %v6930_v10 = vsub.f32 %v11751_v53, %v11841_v46  ;;  %v11898_v39 = vpop.permute.xlu1 %5907 }
 0xecb   :  { %9584 = vpow2.f32 %v6963_v18  ;;  %v6101_v44 = vrot.slane %v6093_v29, %v10110_v52  ;;  %v6108_v27 = vrot.slane %v6094_v7, %v10110_v52  ;;  %v6117_v24 = vrot.slane %v6109_v13, %v10110_v52 }
 0xecc   :  { %v6124_v61 = vrot.slane %v6110_v57, %v10110_v52  ;;  %v6959_v60 = vmul.f32 1.442695, %v6930_v10 }
 0xecd   :  { %v6333_v30 = vcombine.low %v6101_v44, %v6108_v27  ;;  %v8746_v31 = vcombine.high %v6101_v44, %v6108_v27 }
 0xece   :  { %v6349_v26 = vcombine.low %v6117_v24, %v6124_v61  ;;  %v8747_v50 = vcombine.high %v6117_v24, %v6124_v61  ;;  %9586 = vpow2.f32 %v6959_v60  ;;  %v6130_v60 = vcombine.high %v11169_v33, %v11898_v39 }
 0xecf   :  { %v11858_v42 = vpop.eup %9580  ;;  %v6340_v5 = vrot.slane %v6333_v30, %v10105_v45  ;;  %v6348_v19 = vrot.slane %v8746_v31, %v10105_v45 }
 0xed0   :  { %v6356_v58 = vrot.slane %v6349_v26, %v10105_v45  ;;  %v6364_v47 = vrot.slane %v8747_v50, %v10105_v45  ;;  %v7007_v20 = vsel %vm2372_vm2, %v11858_v42, 0.0 }
 0xed1   :  { %v11866_v1 = vpop.eup %9582  ;;  %7008 = vadd.xlane.f32.xlu0 %v7007_v20  ;;  %v6365_v2 = vcombine.low %v6340_v5, %v6348_v19  ;;  %v6366_v25 = vcombine.high %v6340_v5, %v6348_v19 }
 0xed2   :  { %v6998_v40 = vsel %vm2372_vm2, %v11866_v1, 0.0  ;;  %v6381_v54 = vcombine.low %v6356_v58, %v6364_v47  ;;  %v6382_v34 = vcombine.high %v6356_v58, %v6364_v47 }
 0xed3   :  { %6999 = vadd.xlane.f32.xlu1 %v6998_v40  ;;  %v11871_v38 = vrot.slane %v6365_v2, %v10110_v52  ;;  %v11874_v48 = vrot.slane %v6366_v25, %v10110_v52 }
 0xed4   :  { %v11877_v62 = vrot.slane %v6381_v54, %v10110_v52  ;;  %v11880_v28 = vrot.slane %v6382_v34, %v10110_v52 }
 0xed5   :  { %v11882_v43 = vpop.eup %9584 }
 0xed6   :  { %v7010_v41 = vsel %vm2372_vm2, %v11882_v43, 0.0  ;;  %v6397_v55 = vcombine.low %v11871_v38, %v11877_v62  ;;  %v6398_v17 = vcombine.high %v11871_v38, %v11877_v62  ;;  %v6399_v36 = vcombine.low %v11874_v48, %v11880_v28 }
 0xed7   :  { %7011 = vadd.xlane.f32.xlu0 %v7010_v41  ;;  %v6400_v51 = vcombine.high %v11874_v48, %v11880_v28 }
 0xed8   :  { %v11900_v57 = vpop.eup %9586 }
 0xed9   :  { %v7004_v46 = vsel %vm2372_vm2, %v11900_v57, 0.0 }
 0xee4   :  { %5919 = vrot.lane.b32.xlu1 %v11169_v33, %s9725_s1 }
 0xef7   :  { %v6967_v18 = vpop.xlane.xlu0 %6966 }
 0xef8   :  { %9588 = vrcp.f32 %v6967_v18 }
 0xefb   :  { %v6970_v29 = vpop.xlane.xlu1 %6969  ;;  %v6979_v7 = vpop.xlane.xlu0 %6978 }
 0xefc   :  { %9590 = vrcp.f32 %v6970_v29 }
 0xeff   :  { %v6982_v13 = vpop.xlane.xlu1 %6981 }
 0xf00   :  { %9592 = vrcp.f32 %v6982_v13  ;;  %v6144_v13 = vrot.slane %v6130_v60, %v10105_v45 }
 0xf01   :  { %9594 = vrcp.f32 %v6979_v7 }
 0xf02   :  { %v9589_v44 = vpop.eup %9588 }
 0xf03   :  { %v7014_v24 = vmul.f32 %v9589_v44, %v11786_v15 }
 0xf04   :  { %v6973_v50 = vpop.xlane.xlu0 %6972 }
 0xf05   :  { %9596 = vrcp.f32 %v6973_v50 }
 0xf06   :  { %v9591_v27 = vpop.eup %9590 }
 0xf07   :  { %v7016_v53 = vmul.f32 %v9591_v27, %v11790_v37 }
 0xf08   :  { %7005 = vadd.xlane.f32.xlu1 %v7004_v46 }
 0xf09   :  { %v7045_v61 = vpack.c.bf16 %v7016_v53, %v7014_v24 }
 0xf0a   :  { %v9593_v30 = vpop.eup %9592 }
 0xf0b   :  { %9225 = vmatmul.mubr.msk.bf16.vlgmr.msra.gmra.mrb[64].mxu1 %vm2372_vm2, %v7045_v61  ;;  %v9595_v31 = vpop.eup %9594  ;;  %v7024_v26 = vmul.f32 %v9593_v30, %v11798_v35 }
 0xf0c   :  { %9235 = vmatpush3.bf16.msra.mxu1 %v11697_v9  ;;  %9236 = vmatprep.mubr.msk.bf16.mxu1 %vm9727_vm1, %v12238_v3  ;;  %v7022_v15 = vmul.f32 %v9595_v31, %v11794_v16 }
 0xf0d   :  { %9246 = vmatprep.subr.bf16.mxu1 %v12238_v3 }
 0xf0e   :  { %v7047_v37 = vpack.c.bf16 %v7024_v26, %v7022_v15 }
 0xf0f   :  { %v9597_v47 = vpop.eup %9596 }
 0xf10   :  { %v7018_v20 = vmul.f32 %v9597_v47, %v11802_v14 }
 0xf13   :  { %9237 = vmatmul.mubr.msk.bf16.vlgmr.msra.gmra.mrb[68].mxu1 %vm2372_vm2, %v7047_v37 }
 0xf14   :  { %9248 = vmatprep.mubr.msk.bf16.mxu1 %vm9727_vm1, %v12238_v3 }
 0xf16   :  { %v6991_v5 = vpop.xlane.xlu0 %6990 }
 0xf1a   :  { %v6976_v19 = vpop.xlane.xlu1 %6975 }
 0xf1b   :  { %9598 = vrcp.f32 %v6976_v19 }
 0xf1e   :  { %v6985_v9 = vpop.xlane.xlu0 %6984  ;;  %v6994_v14 = vpop.xlane.xlu1 %6993 }
 0xf1f   :  { %9600 = vrcp.f32 %v6985_v9 }
 0xf22   :  { %v6988_v58 = vpop.xlane.xlu0 %6987 }
 0xf23   :  { %9602 = vrcp.f32 %v6988_v58 }
 0xf24   :  { %9604 = vrcp.f32 %v6991_v5 }
 0xf25   :  { %v9599_v35 = vpop.eup %9598  ;;  %9606 = vrcp.f32 %v6994_v14 }
 0xf26   :  { %v7020_v16 = vmul.f32 %v9599_v35, %v11816_v6 }
 0xf28   :  { %v7046_v2 = vpack.c.bf16 %v7020_v16, %v7018_v20 }
 0xf29   :  { %v9601_v25 = vpop.eup %9600  ;;  %v6997_v6 = vpop.xlane.xlu0 %6996 }
 0xf2a   :  { %9231 = vmatmul.mubr.msk.bf16.vlgmr.msra.gmra.mrb[76].mxu0 %vm2372_vm2, %v7046_v2  ;;  %v7026_v54 = vmul.f32 %v9601_v25, %v11823_v0 }
 0xf2b   :  { %9241 = vmatpush3.bf16.msra.mxu0 %v11699_v23  ;;  %9242 = vmatprep.mubr.msk.bf16.mxu0 %vm9727_vm1, %v12238_v3  ;;  %v6129_v23 = vcombine.low %v11169_v33, %v11898_v39 }
 0xf2c   :  { %9252 = vmatprep.subr.bf16.mxu0 %v12238_v3 }
 0xf2d   :  { %v9603_v40 = vpop.eup %9602  ;;  %v11932_v18 = vpop.xlane.xlu0 %7002  ;;  %v6137_v7 = vrot.slane %v6129_v23, %v10105_v45 }
 0xf2e   :  { %v7028_v34 = vmul.f32 %v9603_v40, %v11829_v56  ;;  %v9605_v35 = vpop.eup %9604 }
 0xf2f   :  { %v9607_v20 = vpop.eup %9606 }
 0xf30   :  { %v7048_v41 = vpack.c.bf16 %v7028_v34, %v7026_v54 }
 0xf32   :  { %9243 = vmatmul.mubr.msk.bf16.vlgmr.msra.gmra.mrb[80].mxu0 %vm2372_vm2, %v7048_v41 }
 0xf33   :  { %9254 = vmatprep.mubr.msk.bf16.mxu0 %vm9727_vm1, %v12238_v3 }
 0xf5e   :  { %v7009_v44 = vpop.xlane.xlu0 %7008 }
 0xf60   :  { %v7000_v10 = vpop.xlane.xlu1 %6999 }
 0xf61   :  { %9608 = vrcp.f32 %v7000_v10 }
 0xf62   :  { %9610 = vrcp.f32 %v6997_v6 }
 0xf64   :  { %v5920_v0 = vpop.permute.xlu1 %5919  ;;  %v7012_v5 = vpop.xlane.xlu0 %7011 }
 0xf65   :  { %v6145_v56 = vcombine.low %v11843_v22, %v5920_v0  ;;  %v6146_v29 = vcombine.high %v11843_v22, %v5920_v0  ;;  %9612 = vrcp.f32 %v7012_v5 }
 0xf66   :  { %9614 = vrcp.f32 %v7009_v44 }
 0xf67   :  { %v6153_v27 = vrot.slane %v6145_v56, %v10105_v45  ;;  %v6160_v24 = vrot.slane %v6146_v29, %v10105_v45  ;;  %v7032_v29 = vmul.f32 %v9607_v20, %v11821_v59  ;;  %v7030_v59 = vmul.f32 %v9605_v35, %v11811_v32 }
 0xf68   :  { %9616 = vrcp.f32 %v11932_v18 }
 0xf69   :  { %v6161_v33 = vcombine.low %v6137_v7, %v6153_v27  ;;  %v6162_v39 = vcombine.high %v6137_v7, %v6153_v27  ;;  %v6177_v53 = vcombine.low %v6144_v13, %v6160_v24  ;;  %v6178_v46 = vcombine.high %v6144_v13, %v6160_v24 }
 0xf6b   :  { %v6169_v61 = vrot.slane %v6161_v33, %v10110_v52  ;;  %v6176_v22 = vrot.slane %v6162_v39, %v10110_v52  ;;  %v6185_v30 = vrot.slane %v6177_v53, %v10110_v52  ;;  %v6192_v31 = vrot.slane %v6178_v46, %v10110_v52  ;;  %v9609_v54 = vpop.eup %9608 }
 0xf6c   :  { %v9611_v10 = vpop.eup %9610  ;;  %v7036_v7 = vmul.f32 %v9609_v54, %v11866_v1 }
 0xf6d   :  { %v6401_v26 = vcombine.low %v6169_v61, %v6176_v22  ;;  %v8748_v15 = vcombine.high %v6169_v61, %v6176_v22  ;;  %v6417_v37 = vcombine.low %v6185_v30, %v6192_v31  ;;  %v8749_v50 = vcombine.high %v6185_v30, %v6192_v31 }
 0xf6e   :  { %v7034_v1 = vmul.f32 %v9611_v10, %v11833_v8 }
 0xf6f   :  { %v6408_v19 = vrot.slane %v6401_v26, %v10105_v45  ;;  %v6416_v9 = vrot.slane %v8748_v15, %v10105_v45  ;;  %v6424_v58 = vrot.slane %v6417_v37, %v10105_v45  ;;  %v6432_v47 = vrot.slane %v8749_v50, %v10105_v45  ;;  %v9613_v33 = vpop.eup %9612 }
 0xf70   :  { %v7050_v39 = vpack.c.bf16 %v7036_v7, %v7034_v1  ;;  %v9615_v38 = vpop.eup %9614  ;;  %v7044_v32 = vmul.f32 %v9613_v33, %v11882_v43 }
 0xf71   :  { %v6433_v16 = vcombine.low %v6408_v19, %v6416_v9  ;;  %v6449_v2 = vcombine.low %v6424_v58, %v6432_v47  ;;  %v6434_v25 = vcombine.high %v6408_v19, %v6416_v9  ;;  %v6450_v40 = vcombine.high %v6424_v58, %v6432_v47 }
 0xf72   :  { %v7042_v8 = vmul.f32 %v9615_v38, %v11858_v42  ;;  %v9617_v28 = vpop.eup %9616 }
 0xf73   :  { %v6441_v34 = vrot.slane %v6433_v16, %v10110_v52  ;;  %v6457_v41 = vrot.slane %v6449_v2, %v10110_v52  ;;  %v6448_v14 = vrot.slane %v6434_v25, %v10110_v52  ;;  %v6464_v6 = vrot.slane %v6450_v40, %v10110_v52 }
 0xf74   :  { %v7052_v48 = vpack.c.bf16 %v7044_v32, %v7042_v8 }
 0xf75   :  { %v6465_v23 = vcombine.low %v6441_v34, %v6457_v41  ;;  %v6466_v60 = vcombine.high %v6441_v34, %v6457_v41  ;;  %v6467_v0 = vcombine.low %v6448_v14, %v6464_v6  ;;  %v6468_v56 = vcombine.high %v6448_v14, %v6464_v6 }
 0xf77   :  { %v6473_v13 = vpack.c.bf16 %v6465_v23, %v6397_v55  ;;  %v6474_v44 = vpack.c.bf16 %v6466_v60, %v6398_v17  ;;  %v6475_v27 = vpack.c.bf16 %v6467_v0, %v6399_v36  ;;  %v6476_v24 = vpack.c.bf16 %v6468_v56, %v6400_v51 }
 0xf78   :  { %v7049_v55 = vpack.c.bf16 %v7032_v29, %v7030_v59  ;;  %v7038_v36 = vmul.f32 %v9617_v28, %v11837_v63 }
 0xf79   :  { %9247 = vmatpush3.bf16.msra.mxu1 %v6473_v13  ;;  %9253 = vmatpush3.bf16.msra.mxu0 %v6474_v44 }
 0xf7a   :  { %9258 = vmatprep.subr.bf16.mxu1 %v12238_v3  ;;  %9264 = vmatprep.subr.bf16.mxu0 %v12238_v3 }
 0xf7c   :  { %9249 = vmatmul.mubr.msk.bf16.vlgmr.msra.gmra.mrb[72].mxu1 %vm2372_vm2, %v7049_v55  ;;  %9255 = vmatmul.mubr.msk.bf16.vlgmr.msra.gmra.mrb[84].mxu0 %vm2372_vm2, %v7050_v39 }
 0xf7d   :  { %9259 = vmatpush3.bf16.msra.mxu1 %v6475_v27  ;;  %9265 = vmatpush3.bf16.msra.mxu0 %v6476_v24 }
 0xf7e   :  { %9266 = vmatprep.mubr.msk.bf16.mxu0 %vm9727_vm1, %v12238_v3  ;;  %9260 = vmatprep.mubr.msk.bf16.mxu1 %vm9727_vm1, %v12238_v3 }
 0xf84   :  { %9267 = vmatmul.mubr.msk.bf16.vlgmr.msra.gmra.mrb[88].mxu0 %vm2372_vm2, %v7052_v48 }
 0xf95   :  { %v7006_v62 = vpop.xlane.xlu1 %7005 }
 0xf96   :  { %9618 = vrcp.f32 %v7006_v62 }
 0xfa0   :  { %v9619_v17 = vpop.eup %9618 }
 0xfa1   :  { %v7040_v43 = vmul.f32 %v9619_v17, %v11900_v57 }
 0xfa3   :  { %v7051_v51 = vpack.c.bf16 %v7040_v43, %v7038_v36 }
 0xfa5   :  { %9261 = vmatmul.mubr.msk.bf16.vlgmr.msra.gmra.mrb[76].mxu1 %vm2372_vm2, %v7051_v51 }
 0xfde   :  { %v7090_v53 = vpop.f32.mrb[64].mxu1 }
 0xfdf   :  { %v9226_v3 = vpop.f32.mrb[65].mxu1 }
 0xfe0   :  { %v7093_v46 = vpop.f32.mrb[66].mxu1 }
 0xfe1   :  { %v9227_v42 = vpop.f32.mrb[67].mxu1 }
 0xfe6   :  { %v7178_v61 = vpop.f32.mrb[68].mxu1 }
 0xfe7   :  { %v7405_v22 = vcombine.low %v7090_v53, %v7178_v61  ;;  %v7406_v30 = vcombine.high %v7090_v53, %v7178_v61  ;;  %v9238_v31 = vpop.f32.mrb[69].mxu1 }
 0xfe8   :  { %v7181_v18 = vpop.f32.mrb[70].mxu1 }
 0xfe9   :  { %v7473_v26 = vcombine.low %v7093_v46, %v7181_v18  ;;  %v7474_v15 = vcombine.high %v7093_v46, %v7181_v18  ;;  %v9239_v37 = vpop.f32.mrb[71].mxu1  ;;  %v7413_v35 = vrot.slane %v7405_v22, %v10105_v45  ;;  %v7420_v20 = vrot.slane %v7406_v30, %v10105_v45 }
 0xfeb   :  { %v7481_v23 = vrot.slane %v7473_v26, %v10105_v45  ;;  %v7488_v60 = vrot.slane %v7474_v15, %v10105_v45 }
 0xffd   :  { %v7134_v50 = vpop.f32.mrb[76].mxu0 }
 0xffe   :  { %v9232_v5 = vpop.f32.mrb[77].mxu0 }
 0xfff   :  { %v7137_v63 = vpop.f32.mrb[78].mxu0 }
0x1000   :  { %v9233_v19 = vpop.f32.mrb[79].mxu0 }
0x1005   :  { %v7222_v57 = vpop.f32.mrb[80].mxu0 }
0x1006   :  { %v7421_v9 = vcombine.low %v7134_v50, %v7222_v57  ;;  %v7422_v58 = vcombine.high %v7134_v50, %v7222_v57  ;;  %v9244_v47 = vpop.f32.mrb[81].mxu0 }
0x1007   :  { %v7225_v16 = vpop.f32.mrb[82].mxu0 }
0x1008   :  { %v7429_v2 = vrot.slane %v7421_v9, %v10105_v45  ;;  %v7436_v25 = vrot.slane %v7422_v58, %v10105_v45  ;;  %v7489_v40 = vcombine.low %v7137_v63, %v7225_v16  ;;  %v7490_v54 = vcombine.high %v7137_v63, %v7225_v16  ;;  %v9245_v34 = vpop.f32.mrb[83].mxu0 }
0x100a   :  { %v7437_v41 = vcombine.low %v7413_v35, %v7429_v2  ;;  %v7438_v14 = vcombine.high %v7413_v35, %v7429_v2  ;;  %v7453_v6 = vcombine.low %v7420_v20, %v7436_v25  ;;  %v7454_v10 = vcombine.high %v7420_v20, %v7436_v25 }
0x100b   :  { %v7497_v0 = vrot.slane %v7489_v40, %v10105_v45  ;;  %v7504_v56 = vrot.slane %v7490_v54, %v10105_v45 }
0x100c   :  { %v7445_v29 = vrot.slane %v7437_v41, %v10110_v52  ;;  %v7452_v7 = vrot.slane %v7438_v14, %v10110_v52  ;;  %v7461_v13 = vrot.slane %v7453_v6, %v10110_v52  ;;  %v7468_v44 = vrot.slane %v7454_v10, %v10110_v52  ;;  %v9444_v10 = vld [vmem:[#allocation2 + $0x20] sm:$0xff]  }
0x100d   :  { %v7505_v27 = vcombine.low %v7481_v23, %v7497_v0  ;;  %v7506_v24 = vcombine.high %v7481_v23, %v7497_v0  ;;  %v7521_v59 = vcombine.low %v7488_v60, %v7504_v56  ;;  %v7522_v1 = vcombine.high %v7488_v60, %v7504_v56  ;;  %9270 = vmatprep.subr.bf16.mxu1 %v9444_v10 }
0x100e   :  { %v7677_v33 = vcombine.low %v7445_v29, %v7452_v7  ;;  %v8766_v55 = vcombine.high %v7445_v29, %v7452_v7  ;;  %v7693_v39 = vcombine.low %v7461_v13, %v7468_v44  ;;  %v8767_v38 = vcombine.high %v7461_v13, %v7468_v44  ;;  %9271 = vmatpush3.bf16.msra.mxu1 %v9444_v10 }
0x100f   :  { %v7513_v32 = vrot.slane %v7505_v27, %v10110_v52  ;;  %v7520_v8 = vrot.slane %v7506_v24, %v10110_v52  ;;  %v7529_v48 = vrot.slane %v7521_v59, %v10110_v52  ;;  %v7536_v62 = vrot.slane %v7522_v1, %v10110_v52 }
0x1010   :  { %v7684_v28 = vrot.slane %v7677_v33, %v10105_v45  ;;  %v7692_v17 = vrot.slane %v8766_v55, %v10105_v45  ;;  %v7700_v36 = vrot.slane %v7693_v39, %v10105_v45  ;;  %v7708_v43 = vrot.slane %v8767_v38, %v10105_v45 }
0x1011   :  { %v7745_v51 = vcombine.low %v7513_v32, %v7520_v8  ;;  %v8768_v53 = vcombine.high %v7513_v32, %v7520_v8  ;;  %v7761_v3 = vcombine.low %v7529_v48, %v7536_v62  ;;  %v8769_v46 = vcombine.high %v7529_v48, %v7536_v62 }
0x1012   :  { %v7710_v42 = vcombine.high %v7684_v28, %v7692_v17  ;;  %v7726_v61 = vcombine.high %v7700_v36, %v7708_v43  ;;  %v7709_v22 = vcombine.low %v7684_v28, %v7692_v17  ;;  %v7725_v30 = vcombine.low %v7700_v36, %v7708_v43 }
0x1013   :  { %v7752_v31 = vrot.slane %v7745_v51, %v10105_v45  ;;  %v7760_v18 = vrot.slane %v8768_v53, %v10105_v45  ;;  %v7768_v26 = vrot.slane %v7761_v3, %v10105_v45  ;;  %v7776_v15 = vrot.slane %v8769_v46, %v10105_v45 }
0x1014   :  { %v7724_v37 = vrot.slane %v7710_v42, %v10110_v52  ;;  %v7740_v50 = vrot.slane %v7726_v61, %v10110_v52  ;;  %v12010_v5 = vrot.slane %v7709_v22, %v10110_v52  ;;  %v12013_v63 = vrot.slane %v7725_v30, %v10110_v52 }
0x1015   :  { %v7778_v19 = vcombine.high %v7752_v31, %v7760_v18  ;;  %v7794_v57 = vcombine.high %v7768_v26, %v7776_v15  ;;  %v7777_v9 = vcombine.low %v7752_v31, %v7760_v18  ;;  %v7793_v58 = vcombine.low %v7768_v26, %v7776_v15 }
0x1016   :  { %v7743_v47 = vcombine.low %v7724_v37, %v7740_v50  ;;  %v7742_v35 = vcombine.high %v12010_v5, %v12013_v63  ;;  %v7744_v20 = vcombine.high %v7724_v37, %v7740_v50  ;;  %v7741_v16 = vcombine.low %v12010_v5, %v12013_v63 }
0x1017   :  { %v7792_v2 = vrot.slane %v7778_v19, %v10110_v52  ;;  %v7808_v25 = vrot.slane %v7794_v57, %v10110_v52  ;;  %v12022_v40 = vrot.slane %v7777_v9, %v10110_v52  ;;  %v12025_v54 = vrot.slane %v7793_v58, %v10110_v52 }
0x1019   :  { %v7811_v34 = vcombine.low %v7792_v2, %v7808_v25  ;;  %v7810_v41 = vcombine.high %v12022_v40, %v12025_v54  ;;  %v7812_v14 = vcombine.high %v7792_v2, %v7808_v25  ;;  %v7809_v6 = vcombine.low %v12022_v40, %v12025_v54 }
0x101b   :  { %v9367_v23 = vpack.i.bf16 %v7811_v34, %v7743_v47  ;;  %v9362_v60 = vpack.i.bf16 %v7810_v41, %v7742_v35  ;;  %v9372_v0 = vpack.i.bf16 %v7812_v14, %v7744_v20 }
0x101d   :  { %9368 = vrot.lane.b32.xlu1 %v9367_v23, %s9730_s16  ;;  %9363 = vrot.lane.b32.xlu0 %v9362_v60, %s9731_s17 }
0x1021   :  { %9373 = vrot.lane.b32.xlu0 %v9372_v0, %s9732_s20 }
0x104f   :  { %v7266_v56 = vpop.f32.mrb[72].mxu1  ;;  %v7310_v29 = vpop.f32.mrb[84].mxu0 }
0x1050   :  { %v9250_v7 = vpop.f32.mrb[73].mxu1  ;;  %v9256_v13 = vpop.f32.mrb[85].mxu0 }
0x1051   :  { %v7269_v44 = vpop.f32.mrb[74].mxu1  ;;  %v7313_v27 = vpop.f32.mrb[86].mxu0 }
0x1052   :  { %v9251_v24 = vpop.f32.mrb[75].mxu1  ;;  %v9257_v59 = vpop.f32.mrb[87].mxu0 }
0x1057   :  { %v7398_v1 = vpop.f32.mrb[88].mxu0 }
0x1058   :  { %v7557_v33 = vcombine.low %v7310_v29, %v7398_v1  ;;  %v7558_v55 = vcombine.high %v7310_v29, %v7398_v1  ;;  %v9268_v39 = vpop.f32.mrb[89].mxu0 }
0x1059   :  { %v7401_v38 = vpop.f32.mrb[90].mxu0 }
0x105a   :  { %v7625_v32 = vcombine.low %v7313_v27, %v7401_v38  ;;  %v7626_v8 = vcombine.high %v7313_v27, %v7401_v38  ;;  %v9269_v48 = vpop.f32.mrb[91].mxu0  ;;  %v7565_v43 = vrot.slane %v7557_v33, %v10105_v45  ;;  %v7572_v51 = vrot.slane %v7558_v55, %v10105_v45 }
0x105c   :  { %v7633_v15 = vrot.slane %v7625_v32, %v10105_v45  ;;  %v7640_v37 = vrot.slane %v7626_v8, %v10105_v45  ;;  %v9445_v32 = vld [vmem:[#allocation2 + $0x28] sm:$0xff]  }
0x105d   :  { %9272 = vmatprep.subr.bf16.mxu1 %v9445_v32 }
0x105e   :  { %9273 = vmatpush3.bf16.msra.mxu1 %v9445_v32 }
0x1078   :  { %v7354_v62 = vpop.f32.mrb[76].mxu1 }
0x1079   :  { %v7541_v28 = vcombine.low %v7266_v56, %v7354_v62  ;;  %v7542_v17 = vcombine.high %v7266_v56, %v7354_v62  ;;  %v9262_v36 = vpop.f32.mrb[77].mxu1 }
0x107a   :  { %v7357_v53 = vpop.f32.mrb[78].mxu1 }
0x107b   :  { %v7549_v3 = vrot.slane %v7541_v28, %v10105_v45  ;;  %v7556_v46 = vrot.slane %v7542_v17, %v10105_v45  ;;  %v7609_v42 = vcombine.low %v7269_v44, %v7357_v53  ;;  %v7610_v61 = vcombine.high %v7269_v44, %v7357_v53  ;;  %v9263_v22 = vpop.f32.mrb[79].mxu1 }
0x107d   :  { %v7573_v30 = vcombine.low %v7549_v3, %v7565_v43  ;;  %v7574_v31 = vcombine.high %v7549_v3, %v7565_v43  ;;  %v7589_v18 = vcombine.low %v7556_v46, %v7572_v51  ;;  %v7590_v26 = vcombine.high %v7556_v46, %v7572_v51 }
0x107e   :  { %v7617_v50 = vrot.slane %v7609_v42, %v10105_v45  ;;  %v7624_v19 = vrot.slane %v7610_v61, %v10105_v45 }
0x107f   :  { %v7581_v57 = vrot.slane %v7573_v30, %v10110_v52  ;;  %v7588_v9 = vrot.slane %v7574_v31, %v10110_v52  ;;  %v7597_v58 = vrot.slane %v7589_v18, %v10110_v52  ;;  %v7604_v47 = vrot.slane %v7590_v26, %v10110_v52  ;;  %v9446_v18 = vld [vmem:[#allocation2 + $0x30] sm:$0xff]  }
0x1080   :  { %v7641_v35 = vcombine.low %v7617_v50, %v7633_v15  ;;  %v7642_v20 = vcombine.high %v7617_v50, %v7633_v15  ;;  %v7657_v2 = vcombine.low %v7624_v19, %v7640_v37  ;;  %v7658_v25 = vcombine.high %v7624_v19, %v7640_v37  ;;  %9274 = vmatprep.subr.bf16.mxu1 %v9446_v18 }
0x1081   :  { %v7813_v34 = vcombine.low %v7581_v57, %v7588_v9  ;;  %v8770_v41 = vcombine.high %v7581_v57, %v7588_v9  ;;  %v7829_v14 = vcombine.low %v7597_v58, %v7604_v47  ;;  %v8771_v10 = vcombine.high %v7597_v58, %v7604_v47  ;;  %9275 = vmatpush3.bf16.msra.mxu1 %v9446_v18 }
0x1082   :  { %v7649_v23 = vrot.slane %v7641_v35, %v10110_v52  ;;  %v7656_v60 = vrot.slane %v7642_v20, %v10110_v52  ;;  %v7665_v0 = vrot.slane %v7657_v2, %v10110_v52  ;;  %v7672_v56 = vrot.slane %v7658_v25, %v10110_v52  ;;  %v9447_v20 = vld [vmem:[#allocation2 + $0x38] sm:$0xff]  }
0x1083   :  { %v7820_v29 = vrot.slane %v7813_v34, %v10105_v45  ;;  %v7828_v7 = vrot.slane %v8770_v41, %v10105_v45  ;;  %v7836_v13 = vrot.slane %v7829_v14, %v10105_v45  ;;  %v7844_v44 = vrot.slane %v8771_v10, %v10105_v45  ;;  %9276 = vmatprep.subr.bf16.mxu1 %v9447_v20 }
0x1084   :  { %v7881_v27 = vcombine.low %v7649_v23, %v7656_v60  ;;  %v8772_v24 = vcombine.high %v7649_v23, %v7656_v60  ;;  %v7897_v59 = vcombine.low %v7665_v0, %v7672_v56  ;;  %v8773_v1 = vcombine.high %v7665_v0, %v7672_v56 }
0x1085   :  { %v7845_v33 = vcombine.low %v7820_v29, %v7828_v7  ;;  %v7861_v55 = vcombine.low %v7836_v13, %v7844_v44  ;;  %v7846_v39 = vcombine.high %v7820_v29, %v7828_v7  ;;  %v7862_v38 = vcombine.high %v7836_v13, %v7844_v44  ;;  %9277 = vmatpush3.bf16.msra.mxu1 %v9447_v20 }
0x1086   :  { %v7888_v8 = vrot.slane %v7881_v27, %v10105_v45  ;;  %v7896_v48 = vrot.slane %v8772_v24, %v10105_v45  ;;  %v7904_v62 = vrot.slane %v7897_v59, %v10105_v45  ;;  %v7912_v28 = vrot.slane %v8773_v1, %v10105_v45 }
0x1087   :  { %v7853_v17 = vrot.slane %v7845_v33, %v10110_v52  ;;  %v7869_v36 = vrot.slane %v7861_v55, %v10110_v52  ;;  %v7860_v43 = vrot.slane %v7846_v39, %v10110_v52  ;;  %v7876_v51 = vrot.slane %v7862_v38, %v10110_v52 }
0x1088   :  { %v7913_v53 = vcombine.low %v7888_v8, %v7896_v48  ;;  %v7929_v3 = vcombine.low %v7904_v62, %v7912_v28  ;;  %v7914_v46 = vcombine.high %v7888_v8, %v7896_v48  ;;  %v7930_v42 = vcombine.high %v7904_v62, %v7912_v28  ;;  %v8775_v62 = vld [vmem:[%s12220_s7 + $0x1] ss:$0 sm:$0xff] }
0x1089   :  { %v7878_v61 = vcombine.high %v7853_v17, %v7869_v36  ;;  %v7879_v22 = vcombine.low %v7860_v43, %v7876_v51  ;;  %v7880_v30 = vcombine.high %v7860_v43, %v7876_v51  ;;  %v7877_v31 = vcombine.low %v7853_v17, %v7869_v36 }
0x108a   :  { %v7921_v45 = vrot.slane %v7913_v53, %v10110_v52  ;;  %v7937_v26 = vrot.slane %v7929_v3, %v10110_v52  ;;  %v7928_v15 = vrot.slane %v7914_v46, %v10110_v52  ;;  %v7944_v37 = vrot.slane %v7930_v42, %v10110_v52 }
0x108c   :  { %v7946_v50 = vcombine.high %v7921_v45, %v7937_v26  ;;  %v7947_v19 = vcombine.low %v7928_v15, %v7944_v37  ;;  %v7948_v57 = vcombine.high %v7928_v15, %v7944_v37  ;;  %v7945_v9 = vcombine.low %v7921_v45, %v7937_v26 }
0x108e   :  { %v9377_v58 = vpack.i.bf16 %v7946_v50, %v7878_v61  ;;  %v9382_v47 = vpack.i.bf16 %v7947_v19, %v7879_v22  ;;  %v9387_v35 = vpack.i.bf16 %v7948_v57, %v7880_v30  ;;  %v9448_v57 = vld [vmem:[#allocation5 + $0x20] sm:$0xff]  }
0x108f   :  { %v9369_v2 = vpop.permute.xlu1 %9368  ;;  %v9364_v25 = vpop.permute.xlu0 %9363  ;;  %9282 = vmatprep.subr.bf16.mxu0 %v9448_v57 }
0x1090   :  { %9378 = vrot.lane.b32.xlu1 %v9377_v58, %s9731_s17  ;;  %v9366_v34 = vunpack.i.h.bf16 %v9364_v25  ;;  %v9365_v41 = vunpack.i.l.bf16 %v9364_v25  ;;  %v9371_v14 = vunpack.i.h.bf16 %v9369_v2  ;;  %v9370_v10 = vunpack.i.l.bf16 %v9369_v2  ;;  %9283 = vmatpush3.bf16.msra.mxu0 %v9448_v57  ;;  %v9450_v58 = vld [vmem:[#allocation5 + $0x30] sm:$0xff]   ;;  %v9453_v57 = vld [vmem:[%s12223_s10 + $0x48] sm:$0xff]  }
0x1092   :  { %v7998_v52 = vsel %vm2372_vm2, %v7809_v6, %v9366_v34  ;;  %v7997_v23 = vsel %vm2372_vm2, %v7741_v16, %v9365_v41 }
0x1093   :  { %v9374_v60 = vpop.permute.xlu0 %9373  ;;  %v8001_v29 = vsel %vm3897_vm3, %v7997_v23, %v9370_v10  ;;  %v8002_v7 = vsel %vm3897_vm3, %v7998_v52, %v9371_v14 }
0x1094   :  { %9383 = vrot.lane.b32.xlu1 %v9382_v47, %s9730_s16  ;;  %v9376_v0 = vunpack.i.h.bf16 %v9374_v60  ;;  %v9375_v56 = vunpack.i.l.bf16 %v9374_v60  ;;  %v9451_v47 = vld [vmem:[#allocation5 + $0x38] sm:$0xff]  }
0x1096   :  { %v8005_v13 = vsel %vm3902_vm4, %v8001_v29, %v9375_v56  ;;  %v8006_v40 = vsel %vm3902_vm4, %v8002_v7, %v9376_v0 }
0x1097   :  { %v8018_v54 = vpack.c.bf16 %v8006_v40, %v8005_v13 }
0x1098   :  { %9388 = vrot.lane.b32.xlu1 %v9387_v35, %s9732_s20 }
0x1099   :  { %9278 = vmatprep.mubr.msk.bf16.mxu1 %vm186_vm0, %v8018_v54 }
0x1102   :  { %v9379_v5 = vpop.permute.xlu1 %9378 }
0x1103   :  { %v9381_v16 = vunpack.i.h.bf16 %v9379_v5  ;;  %v9380_v6 = vunpack.i.l.bf16 %v9379_v5 }
0x1105   :  { %v7999_v59 = vsel %vm2372_vm2, %v7877_v31, %v9380_v6  ;;  %v8000_v1 = vsel %vm2372_vm2, %v7945_v9, %v9381_v16  ;;  %v9449_v9 = vld [vmem:[#allocation5 + $0x28] sm:$0xff]  }
0x1106   :  { %v9384_v63 = vpop.permute.xlu1 %9383  ;;  %9284 = vmatprep.subr.bf16.mxu0 %v9449_v9 }
0x1107   :  { %v9386_v44 = vunpack.i.h.bf16 %v9384_v63  ;;  %v9385_v27 = vunpack.i.l.bf16 %v9384_v63  ;;  %9285 = vmatpush3.bf16.msra.mxu0 %v9449_v9  ;;  %v9454_v9 = vld [vmem:[%s12223_s10 + $0x50] sm:$0xff]  }
0x1108   :  { %9286 = vmatprep.subr.bf16.mxu0 %v9450_v58 }
0x1109   :  { %v8003_v39 = vsel %vm3897_vm3, %v7999_v59, %v9385_v27  ;;  %v8004_v38 = vsel %vm3897_vm3, %v8000_v1, %v9386_v44 }
0x110a   :  { %v9389_v24 = vpop.permute.xlu1 %9388 }
0x110b   :  { %v9391_v33 = vunpack.i.h.bf16 %v9389_v24  ;;  %v9390_v55 = vunpack.i.l.bf16 %v9389_v24  ;;  %9287 = vmatpush3.bf16.msra.mxu0 %v9450_v58  ;;  %v9455_v58 = vld [vmem:[%s12223_s10 + $0x58] sm:$0xff]  }
0x110c   :  { %9288 = vmatprep.subr.bf16.mxu0 %v9451_v47 }
0x110d   :  { %v8007_v32 = vsel %vm3902_vm4, %v8003_v39, %v9390_v55  ;;  %v8008_v8 = vsel %vm3902_vm4, %v8004_v38, %v9391_v33 }
0x110e   :  { %v8019_v48 = vpack.c.bf16 %v8008_v8, %v8007_v32  ;;  %v9645_v32 = vld [vmem:[%s12216_s3 + $0x4] sm:$0xf]  ;;  %v12261_v8 = vsub.s32 2, %v12258_v12 }
0x110f   :  { %9289 = vmatpush3.bf16.msra.mxu0 %v9451_v47  ;;  %v9456_v47 = vld [vmem:[%s12223_s10 + $0x60] sm:$0xff]  }
0x1110   :  { %9279 = vmatmul.mubr.msk.bf16.vlgmr.msra.gmra.mrb[80].mxu1 %vm186_vm0, %v8019_v48  ;;  %v8174_v48 = vrot.slane %v9645_v32, %v12261_v8 }
0x11e3   :  { %v9280_v28 = vpop.f32.mrb[80].mxu1 }
0x11e4   :  { %v8101_v17 = vadd.f32 %v9280_v28, %v8775_v62  ;;  %v8092_v36 = vpop.f32.mrb[81].mxu1 }
0x11e5   :  { %v8093_v43 = vadd.f32 %v8775_v62, %v8092_v36  ;;  %v9281_v51 = vpop.f32.mrb[82].mxu1 }
0x11e6   :  { %v12093_v53 = vadd.f32 %v8101_v17, %v11066_v49  ;;  %v8095_v3 = vpop.f32.mrb[83].mxu1  ;;  %v8104_v46 = vadd.f32 %v9281_v51, %v8775_v62 }
0x11e7   :  { %v8096_v42 = vadd.f32 %v8775_v62, %v8095_v3  ;;  %v12096_v61 = vadd.f32 %v8093_v43, %v11070_v11 }
0x11e8   :  { %v8117_v22 = vsel %vm186_vm0, %v12093_v53, 0.0  ;;  %v12104_v31 = vadd.f32 %v8104_v46, %v11072_v21  ;;  %v8129_v50 = vmul.f32 %v12093_v53, %v12093_v53  ;;  %v12262_v46 = vsub.s32 3, %v12258_v12  ;;  %v9452_v12 = vld [vmem:[%s12223_s10 + $0x40] sm:$0xff]  }
0x11e9   :  { %v12101_v30 = vadd.f32 %v8096_v42, %v11076_v4  ;;  %8118 = vadd.xlane.f32.xlu0 %v8117_v22  ;;  %v8111_v11 = vsel %vm186_vm0, %v12096_v61, 0.0  ;;  %v8127_v26 = vmul.f32 %v12096_v61, %v12096_v61  ;;  %9294 = vmatprep.subr.bf16.mxu1 %v9452_v12 }
0x11ea   :  { %v8130_v4 = vmul.f32 %v12104_v31, %v12104_v31  ;;  %v8120_v21 = vsel %vm186_vm0, %v12104_v31, 0.0  ;;  %v8137_v19 = vsel %vm186_vm0, %v8129_v50, 0.0  ;;  %v8182_v42 = vrot.slane %v9645_v32, %v12262_v46  ;;  %9295 = vmatpush3.bf16.msra.mxu1 %v9452_v12 }
0x11eb   :  { %v8114_v49 = vsel %vm186_vm0, %v12101_v30, 0.0  ;;  %v8128_v18 = vmul.f32 %v12101_v30, %v12101_v30  ;;  %v8131_v37 = vsel %vm186_vm0, %v8127_v26, 0.0  ;;  %9296 = vmatprep.subr.bf16.mxu1 %v9453_v57 }
0x11ec   :  { %8115 = vadd.xlane.f32.xlu1 %v8114_v49  ;;  %v8140_v15 = vsel %vm186_vm0, %v8130_v4, 0.0 }
0x11ed   :  { %8112 = vadd.xlane.f32.xlu0 %v8111_v11  ;;  %v8134_v45 = vsel %vm186_vm0, %v8128_v18, 0.0 }
0x11ee   :  { %9297 = vmatpush3.bf16.msra.mxu1 %v9453_v57 }
0x11ef   :  { %9298 = vmatprep.subr.bf16.mxu1 %v9454_v9 }
0x11f0   :  { %8135 = vadd.xlane.f32.xlu1 %v8134_v45 }
0x11f1   :  { %8121 = vadd.xlane.f32.xlu0 %v8120_v21 }
0x11f2   :  { %9299 = vmatpush3.bf16.msra.mxu1 %v9454_v9 }
0x11f3   :  { %9300 = vmatprep.subr.bf16.mxu1 %v9455_v58 }
0x11f4   :  { %8141 = vadd.xlane.f32.xlu1 %v8140_v15 }
0x11f5   :  { %8132 = vadd.xlane.f32.xlu0 %v8131_v37 }
0x11f6   :  { %9301 = vmatpush3.bf16.msra.mxu1 %v9455_v58 }
0x11f7   :  { %9302 = vmatprep.subr.bf16.mxu1 %v9456_v47 }
0x11f9   :  { %8138 = vadd.xlane.f32.xlu0 %v8137_v19 }
0x11fa   :  { %9303 = vmatpush3.bf16.msra.mxu1 %v9456_v47 }
0x1276   :  { %v8119_v35 = vpop.xlane.xlu0 %8118 }
0x1277   :  { %v8125_v40 = vmul.f32 0.015625, %v8119_v35  ;;  %v9457_v35 = vld [vmem:[%s12223_s10 + $0x68] sm:$0xff]  }
0x1278   :  { %9304 = vmatprep.subr.bf16.mxu1 %v9457_v35 }
0x1279   :  { %v8116_v20 = vpop.xlane.xlu1 %8115  ;;  %v8149_v27 = vmul.f32 %v8125_v40, %v8125_v40  ;;  %v8157_v22 = vsub.f32 %v12093_v53, %v8125_v40  ;;  %9305 = vmatpush3.bf16.msra.mxu1 %v9457_v35 }
0x127a   :  { %v8124_v2 = vmul.f32 0.015625, %v8116_v20  ;;  %v8113_v25 = vpop.xlane.xlu0 %8112  ;;  %v9458_v20 = vld [vmem:[%s12223_s10 + $0x70] sm:$0xff]  }
0x127b   :  { %v8123_v52 = vmul.f32 0.015625, %v8113_v25  ;;  %9306 = vmatprep.subr.bf16.mxu1 %v9458_v20  ;;  %v8783_v25 = vld [vmem:[%s12222_s9 + $0x1] ss:$0 sm:$0xff] }
0x127c   :  { %v8148_v41 = vmul.f32 %v8124_v2, %v8124_v2  ;;  %v8156_v39 = vsub.f32 %v12101_v30, %v8124_v2  ;;  %v9459_v2 = vld [vmem:[%s12223_s10 + $0x78] sm:$0xff]  }
0x127d   :  { %v8136_v34 = vpop.xlane.xlu1 %8135  ;;  %v8147_v54 = vmul.f32 %v8123_v52, %v8123_v52  ;;  %v8155_v28 = vsub.f32 %v12096_v61, %v8123_v52  ;;  %9307 = vmatpush3.bf16.msra.mxu1 %v9458_v20 }
0x127e   :  { %v8144_v14 = vmul.f32 0.015625, %v8136_v34  ;;  %v8122_v10 = vpop.xlane.xlu0 %8121  ;;  %9308 = vmatprep.subr.bf16.mxu1 %v9459_v2 }
0x127f   :  { %v8126_v23 = vmul.f32 0.015625, %v8122_v10 }
0x1280   :  { %v8152_v60 = vsub.f32 %v8144_v14, %v8148_v41 }
0x1281   :  { %v8150_v0 = vmul.f32 %v8126_v23, %v8126_v23  ;;  %v8142_v56 = vpop.xlane.xlu1 %8141  ;;  %v8158_v17 = vsub.f32 %v12104_v31, %v8126_v23  ;;  %9309 = vmatpush3.bf16.msra.mxu1 %v9459_v2 }
0x1282   :  { %v8160_v29 = vadd.f32 1e-06, %v8152_v60  ;;  %v8146_v7 = vmul.f32 0.015625, %v8142_v56  ;;  %v8133_v13 = vpop.xlane.xlu0 %8132 }
0x1283   :  { %v8143_v5 = vmul.f32 0.015625, %v8133_v13 }
0x1284   :  { %9620 = vrsqrt.f32 %v8160_v29  ;;  %v8154_v63 = vsub.f32 %v8146_v7, %v8150_v0 }
0x1285   :  { %v8151_v16 = vsub.f32 %v8143_v5, %v8147_v54 }
0x1286   :  { %v8162_v6 = vadd.f32 1e-06, %v8154_v63  ;;  %v8139_v44 = vpop.xlane.xlu0 %8138 }
0x1287   :  { %v8159_v24 = vadd.f32 1e-06, %v8151_v16  ;;  %v8145_v59 = vmul.f32 0.015625, %v8139_v44 }
0x1288   :  { %9622 = vrsqrt.f32 %v8162_v6 }
0x1289   :  { %9624 = vrsqrt.f32 %v8159_v24  ;;  %v8153_v1 = vsub.f32 %v8145_v59, %v8149_v27 }
0x128b   :  { %v8161_v33 = vadd.f32 1e-06, %v8153_v1 }
0x128d   :  { %9626 = vrsqrt.f32 %v8161_v33 }
0x128e   :  { %v9621_v55 = vpop.eup %9620 }
0x128f   :  { %v8168_v38 = vmul.f32 %v9621_v55, %v8156_v39 }
0x1291   :  { %v8176_v3 = vmul.f32 %v8174_v48, %v8168_v38 }
0x1292   :  { %v9623_v62 = vpop.eup %9622 }
0x1293   :  { %v9625_v36 = vpop.eup %9624  ;;  %v8170_v43 = vmul.f32 %v9623_v62, %v8158_v17  ;;  %v8184_v4 = vadd.f32 %v8182_v42, %v8176_v3 }
0x1294   :  { %v8167_v51 = vmul.f32 %v9625_v36, %v8155_v28 }
0x1295   :  { %v8178_v21 = vmul.f32 %v8174_v48, %v8170_v43 }
0x1296   :  { %v8175_v49 = vmul.f32 %v8174_v48, %v8167_v51 }
0x1297   :  { %v9627_v18 = vpop.eup %9626  ;;  %v8186_v50 = vadd.f32 %v8182_v42, %v8178_v21 }
0x1298   :  { %v8169_v11 = vmul.f32 %v9627_v18, %v8157_v22  ;;  %v8183_v45 = vadd.f32 %v8182_v42, %v8175_v49 }
0x129a   :  { %v8196_v26 = vpack.c.bf16 %v8184_v4, %v8183_v45  ;;  %v8177_v15 = vmul.f32 %v8174_v48, %v8169_v11 }
0x129c   :  { %9290 = vmatprep.mubr.msk.bf16.mxu0 %vm186_vm0, %v8196_v26  ;;  %v8185_v37 = vadd.f32 %v8182_v42, %v8177_v15  ;;  %v8815_v15 = vld [vmem:[%s12224_s11 + $0x1] ss:$0 sm:$0xff] }
0x129e   :  { %v8197_v19 = vpack.c.bf16 %v8186_v50, %v8185_v37 }
0x12a0   :  { %9291 = vmatmul.mubr.msk.bf16.vlgmr.msra.gmra.mrb[92].mxu0 %vm186_vm0, %v8197_v19 }
0x1373   :  { %v9292_v34 = vpop.f32.mrb[92].mxu0 }
0x1374   :  { %v8279_v41 = vadd.f32 %v9292_v34, %v8783_v25  ;;  %v8270_v14 = vpop.f32.mrb[93].mxu0 }
0x1375   :  { %v8271_v10 = vadd.f32 %v8783_v25, %v8270_v14  ;;  %v9293_v52 = vpop.f32.mrb[94].mxu0 }
0x1376   :  { %v8291_v23 = vmul.f32 0.044715, %v8279_v41  ;;  %v8282_v60 = vadd.f32 %v9293_v52, %v8783_v25  ;;  %v8273_v0 = vpop.f32.mrb[95].mxu0  ;;  %v8287_v43 = vmul.f32 0.5, %v8279_v41 }
0x1377   :  { %v8289_v56 = vmul.f32 0.044715, %v8271_v10  ;;  %v8274_v29 = vadd.f32 %v8783_v25, %v8273_v0  ;;  %v8285_v46 = vmul.f32 0.5, %v8271_v10 }
0x1378   :  { %v8295_v7 = vmul.f32 %v8291_v23, %v8279_v41  ;;  %v8292_v13 = vmul.f32 0.044715, %v8282_v60  ;;  %v8288_v51 = vmul.f32 0.5, %v8282_v60 }
0x1379   :  { %v8293_v40 = vmul.f32 %v8289_v56, %v8271_v10  ;;  %v8290_v54 = vmul.f32 0.044715, %v8274_v29  ;;  %v8286_v42 = vmul.f32 0.5, %v8274_v29 }
0x137a   :  { %v8299_v5 = vmul.f32 %v8295_v7, %v8279_v41  ;;  %v8296_v63 = vmul.f32 %v8292_v13, %v8282_v60 }
0x137b   :  { %v8297_v16 = vmul.f32 %v8293_v40, %v8271_v10  ;;  %v8294_v6 = vmul.f32 %v8290_v54, %v8274_v29 }
0x137c   :  { %v8303_v44 = vadd.f32 %v8299_v5, %v8279_v41  ;;  %v8300_v27 = vmul.f32 %v8296_v63, %v8282_v60 }
0x137d   :  { %v8298_v24 = vmul.f32 %v8294_v6, %v8274_v29  ;;  %v8301_v59 = vadd.f32 %v8297_v16, %v8271_v10 }
0x137e   :  { %v8307_v1 = vmul.f32 0.7978846, %v8303_v44  ;;  %v8304_v33 = vadd.f32 %v8300_v27, %v8282_v60 }
0x137f   :  { %v8302_v55 = vadd.f32 %v8298_v24, %v8274_v29  ;;  %v8305_v39 = vmul.f32 0.7978846, %v8301_v59 }
0x1380   :  { %9628 = vtanh.f32 %v8307_v1  ;;  %v8308_v38 = vmul.f32 0.7978846, %v8304_v33 }
0x1381   :  { %v8306_v32 = vmul.f32 0.7978846, %v8302_v55  ;;  %9630 = vtanh.f32 %v8305_v39 }
0x1382   :  { %9632 = vtanh.f32 %v8308_v38 }
0x1383   :  { %9634 = vtanh.f32 %v8306_v32 }
0x138a   :  { %v9629_v8 = vpop.eup %9628 }
0x138b   :  { %v9631_v48 = vpop.eup %9630  ;;  %v8315_v62 = vadd.f32 1.0, %v9629_v8 }
0x138c   :  { %v9633_v28 = vpop.eup %9632  ;;  %v8313_v17 = vadd.f32 1.0, %v9631_v48 }
0x138d   :  { %v9635_v36 = vpop.eup %9634  ;;  %v8316_v3 = vadd.f32 1.0, %v9633_v28  ;;  %v8319_v49 = vmul.f32 %v8315_v62, %v8287_v43 }
0x138e   :  { %v8314_v22 = vadd.f32 1.0, %v9635_v36  ;;  %v8317_v11 = vmul.f32 %v8313_v17, %v8285_v46  ;;  %v8816_v46 = vld [vmem:[%s12225_s12] ss:$0 sm:$0xff] }
0x138f   :  { %v8320_v18 = vmul.f32 %v8316_v3, %v8288_v51 }
0x1390   :  { %v8318_v45 = vmul.f32 %v8314_v22, %v8286_v42 }
0x1391   :  { %v8339_v4 = vpack.c.bf16 %v8320_v18, %v8319_v49  ;;  %v8817_v18 = vld [vmem:[%s12225_s12 + $0x1] ss:$0 sm:$0xff]  ;;  %s9690_s12 = scalar_lea.vmem %s8541_s5, 512 }
0x1392   :  { %v8338_v21 = vpack.c.bf16 %v8318_v45, %v8317_v11  ;;  %p9691_p2 = scmp.ne.s32.totalorder %s8541_s5, %s9690_s12  ;;  %p9696_p4 = scmp.lt.s32.totalorder %s9690_s12, %s9690_s12 }
0x1394   :  { %9310 = vmatprep.mubr.bf16.mxu1 %v8338_v21  ;;  %p9697_p5 = por %p9696_p4, %p9695_p3 }
0x1395   :  { %9311 = vmatmul.mubr.bf16.vlgmr.msra.gmra.mrb[84].mxu1 %v8339_v4 }
0x1396   :  { %p9698_p6 = pnand %p9697_p5, %p9691_p2 }
0x1468   :  { %v9312_v26 = vpop.f32.mrb[84].mxu1 }
0x1469   :  { %v8439_v37 = vadd.f32 %v9312_v26, %v12093_v53  ;;  %v8422_v50 = vpop.f32.mrb[85].mxu1 }
0x146a   :  { %v8437_v19 = vadd.f32 %v8422_v50, %v12096_v61  ;;  %v9313_v12 = vpop.f32.mrb[86].mxu1 }
0x146b   :  { %v12169_v57 = vadd.f32 %v8815_v15, %v8439_v37  ;;  %v8440_v9 = vadd.f32 %v9313_v12, %v12104_v31  ;;  %v8425_v58 = vpop.f32.mrb[87].mxu1 }
0x146c   :  { %v8438_v47 = vadd.f32 %v8425_v58, %v12101_v30  ;;  %v8449_v35 = vadd.f32 %v8815_v15, %v8437_v19 }
0x146d   :  { %v12173_v20 = vadd.f32 %v8815_v15, %v8440_v9  ;;  %v8461_v2 = vsel %vm186_vm0, %v12169_v57, 0.0  ;;  %v8473_v14 = vmul.f32 %v12169_v57, %v12169_v57 }
0x146e   :  { %8462 = vadd.xlane.f32.xlu0 %v8461_v2  ;;  %v8450_v25 = vadd.f32 %v8815_v15, %v8438_v47  ;;  %v8455_v61 = vsel %vm186_vm0, %v8449_v35, 0.0  ;;  %v8471_v34 = vmul.f32 %v8449_v35, %v8449_v35 }
0x146f   :  { %v8464_v53 = vsel %vm186_vm0, %v12173_v20, 0.0  ;;  %v8474_v52 = vmul.f32 %v12173_v20, %v12173_v20  ;;  %v8481_v23 = vsel %vm186_vm0, %v8473_v14, 0.0 }
0x1470   :  { %8465 = vadd.xlane.f32.xlu1 %v8464_v53  ;;  %v8458_v31 = vsel %vm186_vm0, %v8450_v25, 0.0  ;;  %v8472_v41 = vmul.f32 %v8450_v25, %v8450_v25  ;;  %v8475_v30 = vsel %vm186_vm0, %v8471_v34, 0.0 }
0x1471   :  { %v8484_v60 = vsel %vm186_vm0, %v8474_v52, 0.0 }
0x1472   :  { %8456 = vadd.xlane.f32.xlu0 %v8455_v61  ;;  %v8478_v10 = vsel %vm186_vm0, %v8472_v41, 0.0 }
0x1474   :  { %8459 = vadd.xlane.f32.xlu1 %v8458_v31 }
0x1476   :  { %8476 = vadd.xlane.f32.xlu0 %v8475_v30 }
0x1478   :  { %8479 = vadd.xlane.f32.xlu1 %v8478_v10 }
0x147a   :  { %8482 = vadd.xlane.f32.xlu0 %v8481_v23 }
0x147c   :  { %8485 = vadd.xlane.f32.xlu1 %v8484_v60 }
0x14fb   :  { %v8463_v0 = vpop.xlane.xlu0 %8462 }
0x14fc   :  { %v8469_v5 = vmul.f32 0.015625, %v8463_v0 }
0x14fd   :  { %v8466_v56 = vpop.xlane.xlu1 %8465 }
0x14fe   :  { %v8470_v6 = vmul.f32 0.015625, %v8466_v56  ;;  %v8493_v33 = vmul.f32 %v8469_v5, %v8469_v5  ;;  %v8501_v11 = vsub.f32 %v12169_v57, %v8469_v5 }
0x14ff   :  { %v8457_v29 = vpop.xlane.xlu0 %8456 }
0x1500   :  { %v8467_v7 = vmul.f32 0.015625, %v8457_v29  ;;  %v8494_v32 = vmul.f32 %v8470_v6, %v8470_v6  ;;  %v8502_v26 = vsub.f32 %v12173_v20, %v8470_v6 }
0x1501   :  { %v8460_v13 = vpop.xlane.xlu1 %8459 }
0x1502   :  { %v8468_v40 = vmul.f32 0.015625, %v8460_v13  ;;  %v8491_v63 = vmul.f32 %v8467_v7, %v8467_v7  ;;  %v8499_v51 = vsub.f32 %v8449_v35, %v8467_v7 }
0x1503   :  { %v8477_v54 = vpop.xlane.xlu0 %8476 }
0x1504   :  { %v8487_v16 = vmul.f32 0.015625, %v8477_v54  ;;  %v8492_v27 = vmul.f32 %v8468_v40, %v8468_v40  ;;  %v8500_v42 = vsub.f32 %v8450_v25, %v8468_v40 }
0x1505   :  { %v8480_v44 = vpop.xlane.xlu1 %8479 }
0x1506   :  { %v8495_v24 = vsub.f32 %v8487_v16, %v8491_v63  ;;  %v8488_v59 = vmul.f32 0.015625, %v8480_v44 }
0x1507   :  { %v8483_v1 = vpop.xlane.xlu0 %8482 }
0x1508   :  { %v8503_v55 = vadd.f32 1e-06, %v8495_v24  ;;  %v8496_v39 = vsub.f32 %v8488_v59, %v8492_v27  ;;  %v8489_v38 = vmul.f32 0.015625, %v8483_v1 }
0x1509   :  { %v8486_v8 = vpop.xlane.xlu1 %8485 }
0x150a   :  { %9636 = vrsqrt.f32 %v8503_v55  ;;  %v8504_v48 = vadd.f32 1e-06, %v8496_v39  ;;  %v8497_v62 = vsub.f32 %v8489_v38, %v8493_v33  ;;  %v8490_v28 = vmul.f32 0.015625, %v8486_v8 }
0x150c   :  { %9638 = vrsqrt.f32 %v8504_v48  ;;  %v8505_v17 = vadd.f32 1e-06, %v8497_v62  ;;  %v8498_v36 = vsub.f32 %v8490_v28, %v8494_v32 }
0x150e   :  { %9640 = vrsqrt.f32 %v8505_v17  ;;  %v8506_v43 = vadd.f32 1e-06, %v8498_v36 }
0x1510   :  { %9642 = vrsqrt.f32 %v8506_v43 }
0x1514   :  { %v9637_v3 = vpop.eup %9636 }
0x1515   :  { %v8511_v22 = vmul.f32 %v9637_v3, %v8499_v51 }
0x1516   :  { %v9639_v49 = vpop.eup %9638 }
0x1517   :  { %v8519_v45 = vmul.f32 %v8816_v46, %v8511_v22  ;;  %v8512_v4 = vmul.f32 %v9639_v49, %v8500_v42 }
0x1518   :  { %v9641_v21 = vpop.eup %9640 }
0x1519   :  { %v8527_v15 = vadd.f32 %v8817_v18, %v8519_v45  ;;  %v8520_v37 = vmul.f32 %v8816_v46, %v8512_v4  ;;  %v8513_v50 = vmul.f32 %v9641_v21, %v8501_v11 }
0x151a   :  { %v9643_v19 = vpop.eup %9642 }
0x151b   :  { %8531 = vst.msk [vmem:[#allocation7] sm:$0xff] %vm186_vm0, %v8527_v15  ;;  %v8528_v12 = vadd.f32 %v8817_v18, %v8520_v37  ;;  %v8521_v9 = vmul.f32 %v8816_v46, %v8513_v50  ;;  %v8514_v58 = vmul.f32 %v9643_v19, %v8502_v26 }
0x151d   :  { %8532 = vst.msk [vmem:[#allocation7 + $0x8] sm:$0xff] %vm186_vm0, %v8528_v12  ;;  %v8529_v47 = vadd.f32 %v8817_v18, %v8521_v9  ;;  %v8522_v57 = vmul.f32 %v8816_v46, %v8514_v58 }
0x151f   :  { %8533 = vst.msk [vmem:[#allocation7 + $0x10] sm:$0xff] %vm186_vm0, %v8529_v47  ;;  %v8530_v35 = vadd.f32 %v8817_v18, %v8522_v57 }
0x1521   :  { %8534 = vst.msk [vmem:[#allocation7 + $0x18] sm:$0xff] %vm186_vm0, %v8530_v35 }
0x1522   :  { %9701 = shalt.err (!%p9698_p6)
}
0x1523   :  { %s9702_s30 = scalar_lea.hbm %s12226_s13, 512 }
0x1524   :  { %p9703_p7 = scmp.ne.s32.totalorder %s12226_s13, %s9702_s30  ;;  %p9706_p8 = scmp.lt.u32.totalorder %s9702_s30, %s12226_s13 }
0x1526   :  { %p9708_p9 = pnand %p9706_p8, %p9703_p7 }
0x1528   :  { %9711 = shalt.err (!%p9708_p9)
}
0x1529   :  { %s9734_s20 = smov 128   ;;  %s9735_s19 = smov 8  }
0x152a   :  { %8546 = dma.vmem_to_hbm [thread:$0]  %s8541_s5, 512, %s12226_s13, [#allocation4], %s9734_s20, %s9734_s20, %s9735_s19  }
0x152b   :  { %9716 = dma.done.wait [#allocation4], 512  }
0x152c   :  { %9717 = vsyncadd [#allocation4], 4294966784 }
0x152d   :  { %8550 = vsyncpa [#allocation3], 1 }
0x152e   :  { %8551 = vsyncpa [#allocation6], 1 }
0x152f   :  { %8552 = vsyncpa [#allocation4], 1 }

</bundles_post_ra>
